<compile_context>
chip_gen: v5e
topology: v5e:2x2
jax: 0.10.0
libtpu: 0.0.40
codegen_flags: <defaults>
</compile_context>

<pallas_src>
import functools

import jax
import jax.numpy as jnp
from jax import lax
from jax.experimental import pallas as pl
from jax.experimental.pallas import tpu as pltpu

INV_LN2 = 1.4426950408889634
INV_SQRT2 = 0.7071067811865476


def _ceil_div(a, b):
    return -(-a // b)


# --------------------------------------------------------------------------
# Elementwise helpers used inside kernels
# --------------------------------------------------------------------------
def _sigmoid(v):
    return 1.0 / (1.0 + jnp.exp(-v))


def _erf(v):
    # Abramowitz & Stegun 7.1.26 polynomial approximation (|err| < 1.5e-7).
    a1, a2, a3, a4, a5 = (0.254829592, -0.284496736, 1.421413741,
                          -1.453152027, 1.061405429)
    p = 0.3275911
    s = jnp.where(v >= 0.0, 1.0, -1.0)
    av = jnp.abs(v)
    t = 1.0 / (1.0 + p * av)
    y = 1.0 - (((((a5 * t + a4) * t) + a3) * t + a2) * t + a1) * t * jnp.exp(-av * av)
    return s * y


# --------------------------------------------------------------------------
# Pallas kernel: GDN / IGDN on (B, C, S) activations (channels-first,
# spatial on the lane axis -> lane-dense, no layout transposes).
# bf16 in / bf16 out, f32 compute.
# --------------------------------------------------------------------------
def _gdn_kernel(x_ref, g_ref, b_ref, o_ref, *, inverse):
    x = x_ref[0].astype(jnp.float32)                       # (C, tS) bf16 -> f32
    norm = jnp.dot(g_ref[...], x * x,
                   preferred_element_type=jnp.float32) + b_ref[...]
    if inverse:
        y = x * jnp.sqrt(norm)
    else:
        y = x * lax.rsqrt(norm)
    o_ref[0] = y.astype(o_ref.dtype)


def _pick_spatial_tile(C, S, itemsize=2, budget=6 << 20):
    """Largest spatial tile whose (in + out, double-buffered) footprint fits
    the VMEM budget (safe under v7x's 32 MiB scoped default)."""
    if 4 * C * S * itemsize <= budget or S % 128 != 0:
        return S
    t = max(128, (budget // (4 * C * itemsize)) // 128 * 128)
    while S % t != 0:
        t -= 128
    return t


def apply_gdn(x, gamma, beta, inverse=False):
    """x: (B, C, H, W); y_i = x_i / sqrt(beta_i + sum_j gamma[i,j] x_j^2)."""
    B, C, H, W = x.shape
    S = H * W
    tS = _pick_spatial_tile(C, S)
    out = pl.pallas_call(
        functools.partial(_gdn_kernel, inverse=inverse),
        out_shape=jax.ShapeDtypeStruct((B, C, S), jnp.bfloat16),
        grid=(B, S // tS),
        in_specs=[
            pl.BlockSpec((1, C, tS), lambda b, s: (b, 0, s)),
            pl.BlockSpec((C, C), lambda b, s: (0, 0)),
            pl.BlockSpec((C, 1), lambda b, s: (0, 0)),
        ],
        out_specs=pl.BlockSpec((1, C, tS), lambda b, s: (b, 0, s)),
        compiler_params=pltpu.CompilerParams(
            dimension_semantics=("parallel", "parallel")),
    )(x.reshape(B, C, S).astype(jnp.bfloat16),
      gamma.astype(jnp.float32),
      beta.reshape(C, 1).astype(jnp.float32))
    return out.reshape(B, C, H, W)


# --------------------------------------------------------------------------
# Pallas kernel: fused loss reductions.
#   grid = (P, num_tiles):  P  = "parallel"  (one partial per TensorCore)
#                           i  = "arbitrary" (reduction over MSE slab tiles)
#   - per step: vector accumulator (tr, lanes) += (x - x_hat)^2   (no XLU)
#   - at (p==0, i==0): Gaussian bits for y_hat and factorized bits for z_hat
#     from full lane-dense VMEM operands (tiny tensors, one launch saved each)
#   - at i==last: write [sq_partial, bits_y, bits_z] into output row p
# --------------------------------------------------------------------------
def _loss_kernel(x_ref, xh_ref, y_ref, s_ref, ym_ref,
                 z_ref, h_ref, b_ref, a_ref,
                 o_ref, acc_ref, bits_ref, *, K):
    p = pl.program_id(0)
    i = pl.program_id(1)

    @pl.when(i == 0)
    def _init():
        acc_ref[...] = jnp.zeros_like(acc_ref)
        bits_ref[...] = jnp.zeros_like(bits_ref)

    d = x_ref[0] - xh_ref[0]                               # zero-padding is exact
    acc_ref[...] += d * d

    @pl.when((i == 0) & (p == 0))
    def _rates():
        # ---- Gaussian prior bits for y_hat ----
        y = y_ref[...]
        scale = jnp.maximum(s_ref[...], 0.11)              # scale lower bound
        inv_s = pl.reciprocal(scale, approx=True)

        def std_cdf(v):
            return 0.5 * (1.0 + _erf(v * INV_SQRT2))

        lik_y = std_cdf((y + 0.5) * inv_s) - std_cdf((y - 0.5) * inv_s)
        lik_y = jnp.maximum(lik_y, 1e-9)                   # likelihood bound
        bits_y = jnp.sum(jnp.clip(-jnp.log(lik_y) * INV_LN2, 0.0, 50.0)
                         * ym_ref[...])

        # ---- Factorized prior bits for z_hat (per-channel density) ----
        z = z_ref[...]                                     # (C, Tz)

        def cdf_logits(v):
            for k in range(K):
                v = h_ref[k] * v + b_ref[k]                # (C,1) broadcasts
                if k < K - 1:
                    v = v + a_ref[k] * jnp.tanh(v)
            return v

        lik_z = _sigmoid(cdf_logits(z + 0.5)) - _sigmoid(cdf_logits(z - 0.5))
        lik_z = jnp.maximum(lik_z, 1e-9)
        bits_z = jnp.sum(jnp.clip(-jnp.log(lik_z) * INV_LN2, 0.0, 50.0))

        lane = lax.broadcasted_iota(jnp.int32, (8, 128), 1)
        bits_ref[...] = jnp.where(lane == 1, bits_y,
                                  jnp.where(lane == 2, bits_z, 0.0))

    @pl.when(i == pl.num_programs(1) - 1)
    def _flush():
        lane = lax.broadcasted_iota(jnp.int32, (8, 128), 1)
        o_ref[0] = jnp.where(lane == 0, jnp.sum(acc_ref[...]), bits_ref[...])


def rate_distortion_terms(x, x_hat, y_hat, scale, z_hat, fm_h, fm_b, fm_a,
                          lanes=512, P=2):
    """Returns (sum((x-x_hat)^2), bits_y, bits_z) via a single pallas_call."""
    # ---- MSE slab: flatten, split into P parallel parts, lane-dense tiles --
    xf = x.reshape(-1).astype(jnp.float32)
    xhf = x_hat.reshape(-1).astype(jnp.float32)
    T = xf.shape[0]
    rows = _ceil_div(T, lanes)
    rpp = _ceil_div(rows, P)
    rpp8 = _ceil_div(rpp, 8) * 8
    tr = rpp8 if rpp8 <= 1024 else 256                     # >= 512 KiB/step when big
    rpp = _ceil_div(rpp8, tr) * tr
    Tp = P * rpp * lanes
    x_slab = jnp.pad(xf, (0, Tp - T)).reshape(P, rpp, lanes)
    xh_slab = jnp.pad(xhf, (0, Tp - T)).reshape(P, rpp, lanes)

    # ---- y_hat / scale: lane-dense (Ry, 128) slab + validity mask ----------
    yf = y_hat.reshape(-1).astype(jnp.float32)
    sf = scale.reshape(-1).astype(jnp.float32)
    Ty = yf.shape[0]
    Typ = _ceil_div(Ty, 128) * 128
    y_slab = jnp.pad(yf, (0, Typ - Ty)).reshape(-1, 128)
    s_slab = jnp.pad(sf, (0, Typ - Ty)).reshape(-1, 128)
    y_mask = (jnp.arange(Typ) < Ty).astype(jnp.float32).reshape(-1, 128)
    Ry = y_slab.shape[0]

    # ---- z_hat channels-first + hoisted parameter transcendentals ----------
    Bz, Cz, hz, wz = z_hat.shape
    zcf = jnp.transpose(z_hat, (1, 0, 2, 3)).reshape(Cz, Bz * hz * wz)
    zcf = zcf.astype(jnp.float32)
    Tz = zcf.shape[1]
    K = fm_h.shape[0]
    sp_h = jax.nn.softplus(fm_h).reshape(K, Cz, 1).astype(jnp.float32)
    fb = fm_b.reshape(K, Cz, 1).astype(jnp.float32)
    th_a = jnp.tanh(fm_a).reshape(K - 1, Cz, 1).astype(jnp.float32)

    out = pl.pallas_call(
        functools.partial(_loss_kernel, K=K),
        out_shape=jax.ShapeDtypeStruct((P, 8, 128), jnp.float32),
        grid=(P, rpp // tr),
        in_specs=[
            pl.BlockSpec((1, tr, lanes), lambda p, i: (p, i, 0)),
            pl.BlockSpec((1, tr, lanes), lambda p, i: (p, i, 0)),
            pl.BlockSpec((Ry, 128), lambda p, i: (0, 0)),
            pl.BlockSpec((Ry, 128), lambda p, i: (0, 0)),
            pl.BlockSpec((Ry, 128), lambda p, i: (0, 0)),
            pl.BlockSpec((Cz, Tz), lambda p, i: (0, 0)),
            pl.BlockSpec((K, Cz, 1), lambda p, i: (0, 0, 0)),
            pl.BlockSpec((K, Cz, 1), lambda p, i: (0, 0, 0)),
            pl.BlockSpec((K - 1, Cz, 1), lambda p, i: (0, 0, 0)),
        ],
        out_specs=pl.BlockSpec((1, 8, 128), lambda p, i: (p, 0, 0)),
        scratch_shapes=[pltpu.VMEM((tr, lanes), jnp.float32),
                        pltpu.VMEM((8, 128), jnp.float32)],
        compiler_params=pltpu.CompilerParams(
            dimension_semantics=("parallel", "arbitrary")),
    )(x_slab, xh_slab, y_slab, s_slab, y_mask, zcf, sp_h, fb, th_a)

    sq_sum = jnp.sum(out[:, 0, 0])                         # per-core partials
    bits_y = out[0, 0, 1]
    bits_z = out[0, 0, 2]
    return sq_sum, bits_y, bits_z


# --------------------------------------------------------------------------
# Convolutions (lax.conv_general_dilated, bf16 operands, f32 accumulate)
# --------------------------------------------------------------------------
def conv2d(x, w, b, stride, pad, activation=None, out_dtype=jnp.bfloat16):
    """x: (B,Cin,H,W), w: (Cout,Cin,k,k) — nn.Conv2d semantics."""
    out = lax.conv_general_dilated(
        x.astype(jnp.bfloat16), w.astype(jnp.bfloat16),
        window_strides=(stride, stride),
        padding=((pad, pad), (pad, pad)),
        dimension_numbers=("NCHW", "OIHW", "NCHW"),
        preferred_element_type=jnp.float32)
    out = out + b.reshape(1, -1, 1, 1).astype(jnp.float32)
    if activation == "relu":
        out = jnp.maximum(out, 0.0)
    return out.astype(out_dtype)


def conv_transpose2d(x, w, b, stride, pad, output_pad, activation=None,
                     out_dtype=jnp.bfloat16):
    """w: (Cin,Cout,k,k) — nn.ConvTranspose2d semantics via lhs_dilation."""
    k = w.shape[2]
    w_conv = jnp.flip(w, axis=(2, 3)).transpose(1, 0, 2, 3)   # (Cout,Cin,k,k)
    p_lo = k - 1 - pad
    p_hi = k - 1 - pad + output_pad
    out = lax.conv_general_dilated(
        x.astype(jnp.bfloat16), w_conv.astype(jnp.bfloat16),
        window_strides=(1, 1),
        padding=((p_lo, p_hi), (p_lo, p_hi)),
        lhs_dilation=(stride, stride),
        dimension_numbers=("NCHW", "OIHW", "NCHW"),
        preferred_element_type=jnp.float32)
    out = out + b.reshape(1, -1, 1, 1).astype(jnp.float32)
    if activation == "relu":
        out = jnp.maximum(out, 0.0)
    return out.astype(out_dtype)


# --------------------------------------------------------------------------
# Parameter init (deterministic, synthetic)
# --------------------------------------------------------------------------
def _conv_p(key, cin, cout, k):
    kw, kb = jax.random.split(key)
    w = jax.random.normal(kw, (cout, cin, k, k), jnp.float32) / jnp.sqrt(cin * k * k)
    b = 0.01 * jax.random.normal(kb, (cout,), jnp.float32)
    return {"w": w, "b": b}


def _deconv_p(key, cin, cout, k):
    kw, kb = jax.random.split(key)
    w = jax.random.normal(kw, (cin, cout, k, k), jnp.float32) / jnp.sqrt(cin * k * k)
    b = 0.01 * jax.random.normal(kb, (cout,), jnp.float32)
    return {"w": w, "b": b}


def _gdn_p(key, c):
    kg, kb = jax.random.split(key)
    gamma = 0.1 * jnp.eye(c, dtype=jnp.float32) + \
        0.005 * jnp.abs(jax.random.normal(kg, (c, c), jnp.float32))
    beta = 1.0 + 0.05 * jnp.abs(jax.random.normal(kb, (c,), jnp.float32))
    return {"gamma": gamma, "beta": beta}


def init_params(key, N=16, M=24, K_factorized=4):
    ks = jax.random.split(key, 32)
    p = {}
    # Analysis g_a: 3->N->N->N->M, all k5 s2 p2, GDN between
    p["ga1"] = _conv_p(ks[0], 3, N, 5)
    p["ga_gdn1"] = _gdn_p(ks[1], N)
    p["ga2"] = _conv_p(ks[2], N, N, 5)
    p["ga_gdn2"] = _gdn_p(ks[3], N)
    p["ga3"] = _conv_p(ks[4], N, N, 5)
    p["ga_gdn3"] = _gdn_p(ks[5], N)
    p["ga4"] = _conv_p(ks[6], N, M, 5)
    # Synthesis g_s: M->N->N->N->3, deconv k5 s2 p2 op1, IGDN between
    p["gs1"] = _deconv_p(ks[7], M, N, 5)
    p["gs_igdn1"] = _gdn_p(ks[8], N)
    p["gs2"] = _deconv_p(ks[9], N, N, 5)
    p["gs_igdn2"] = _gdn_p(ks[10], N)
    p["gs3"] = _deconv_p(ks[11], N, N, 5)
    p["gs_igdn3"] = _gdn_p(ks[12], N)
    p["gs4"] = _deconv_p(ks[13], N, 3, 5)
    # AnalysisPrior h_a: conv3 s1 + relu, conv5 s2 + relu, conv5 s2
    p["ha1"] = _conv_p(ks[14], M, N, 3)
    p["ha2"] = _conv_p(ks[15], N, N, 5)
    p["ha3"] = _conv_p(ks[16], N, N, 5)
    # SynthesisPrior h_s: deconv5 s2 + relu, deconv5 s2 + relu, conv3 s1 + relu
    p["hs1"] = _deconv_p(ks[17], N, N, 5)
    p["hs2"] = _deconv_p(ks[18], N, N, 5)
    p["hs3"] = _conv_p(ks[19], N, M, 3)
    # FactorizedModel (per-channel univariate density, K layers)
    p["fm_h"] = 0.5 * jax.random.normal(ks[20], (K_factorized, N), jnp.float32) + 0.5
    p["fm_b"] = 0.5 * jax.random.normal(ks[21], (K_factorized, N), jnp.float32)
    p["fm_a"] = 0.1 * jax.random.normal(ks[22], (K_factorized - 1, N), jnp.float32)
    return p


# --------------------------------------------------------------------------
# HyperPrior networks + forward
# --------------------------------------------------------------------------
def g_a(p, x):
    y = conv2d(x, p["ga1"]["w"], p["ga1"]["b"], 2, 2)
    y = apply_gdn(y, p["ga_gdn1"]["gamma"], p["ga_gdn1"]["beta"])
    y = conv2d(y, p["ga2"]["w"], p["ga2"]["b"], 2, 2)
    y = apply_gdn(y, p["ga_gdn2"]["gamma"], p["ga_gdn2"]["beta"])
    y = conv2d(y, p["ga3"]["w"], p["ga3"]["b"], 2, 2)
    y = apply_gdn(y, p["ga_gdn3"]["gamma"], p["ga_gdn3"]["beta"])
    return conv2d(y, p["ga4"]["w"], p["ga4"]["b"], 2, 2, out_dtype=jnp.float32)


def g_s(p, y_hat):
    x = conv_transpose2d(y_hat, p["gs1"]["w"], p["gs1"]["b"], 2, 2, 1)
    x = apply_gdn(x, p["gs_igdn1"]["gamma"], p["gs_igdn1"]["beta"], inverse=True)
    x = conv_transpose2d(x, p["gs2"]["w"], p["gs2"]["b"], 2, 2, 1)
    x = apply_gdn(x, p["gs_igdn2"]["gamma"], p["gs_igdn2"]["beta"], inverse=True)
    x = conv_transpose2d(x, p["gs3"]["w"], p["gs3"]["b"], 2, 2, 1)
    x = apply_gdn(x, p["gs_igdn3"]["gamma"], p["gs_igdn3"]["beta"], inverse=True)
    return conv_transpose2d(x, p["gs4"]["w"], p["gs4"]["b"], 2, 2, 1,
                            out_dtype=jnp.float32)


def h_a(p, y_abs):
    z = conv2d(y_abs, p["ha1"]["w"], p["ha1"]["b"], 1, 1, activation="relu")
    z = conv2d(z, p["ha2"]["w"], p["ha2"]["b"], 2, 2, activation="relu")
    return conv2d(z, p["ha3"]["w"], p["ha3"]["b"], 2, 2, out_dtype=jnp.float32)


def h_s(p, z_hat):
    s = conv_transpose2d(z_hat, p["hs1"]["w"], p["hs1"]["b"], 2, 2, 1,
                         activation="relu")
    s = conv_transpose2d(s, p["hs2"]["w"], p["hs2"]["b"], 2, 2, 1,
                         activation="relu")
    return conv2d(s, p["hs3"]["w"], p["hs3"]["b"], 1, 1, activation="relu",
                  out_dtype=jnp.float32)


def hyperprior_forward(params, x, noise_key, lambda_=0.01):
    B, Cin, H, W = x.shape
    k_y, k_z = jax.random.split(noise_key)

    y = g_a(params, x)                                        # (B, M, H/16, W/16)
    y_hat = y + jax.random.uniform(k_y, y.shape, jnp.float32, -0.5, 0.5)
    x_hat = jnp.clip(g_s(params, y_hat), 0.0, 1.0)            # torch.clamp(g_s, 0, 1)

    z = h_a(params, jnp.abs(y))                               # (B, N, H/64, W/64)
    z_hat = z + jax.random.uniform(k_z, z.shape, jnp.float32, -0.5, 0.5)
    scale = h_s(params, z_hat)                                # (B, M, H/16, W/16)

    sq_sum, bits_y, bits_z = rate_distortion_terms(
        x, x_hat, y_hat, scale, z_hat,
        params["fm_h"], params["fm_b"], params["fm_a"])

    denom = B * H * W
    bpp_y = bits_y / denom
    bpp_z = bits_z / denom
    distortion = sq_sum / (B * Cin * H * W)

    loss = bpp_y + bpp_z + lambda_ * (255.0 ** 2) * distortion
    return loss, bpp_y, bpp_z, distortion, x_hat

# TODO(synk): the `inference()` path (arithmetic entropy coder compress/
# decompress) is inherently sequential bytestream work with no Pallas
# equivalent; only the training forward() is implemented.


if __name__ == "__main__":
    N_, M_ = 16, 24
    key = jax.random.PRNGKey(0)
    pkey, xkey, nkey = jax.random.split(key, 3)
    params = init_params(pkey, N=N_, M=M_)
    x = jax.random.uniform(xkey, (2, 3, 64, 64), jnp.float32)

    fwd = jax.jit(hyperprior_forward)
    loss, bpp_y, bpp_z, dist, x_hat = fwd(params, x, nkey)
    jax.block_until_ready((loss, bpp_y, bpp_z, dist, x_hat))

    assert x_hat.shape == x.shape
    assert bool(jnp.isfinite(loss))
    print("KERNEL_OK")
</pallas_src>

<mosaic_0001>
module attributes {stable_mosaic.version = 11 : i64} {
  func.func @_gdn_kernel(%arg0: i32, %arg1: i32, %arg2: memref<1x16x1024xbf16, #tpu.memory_space<vmem>>, %arg3: memref<16x16xf32, #tpu.memory_space<vmem>>, %arg4: memref<16x1xf32, #tpu.memory_space<vmem>>, %arg5: memref<1x16x1024xbf16, #tpu.memory_space<vmem>>) attributes {dimension_semantics = [#tpu.dimension_semantics<parallel>, #tpu.dimension_semantics<parallel>], iteration_bounds = array<i64: 2, 1>, scalar_prefetch = 0 : i64, scratch_operands = 0 : i64, tpu.core_type = #tpu.core_type<tc>, window_params = [{transform_indices = @transform_0, window_bounds = array<i64: 1, 16, 1024>}, {pipeline_mode = #tpu.pipeline_mode<synchronous>, transform_indices = @transform_1, window_bounds = array<i64: 16, 16>}, {pipeline_mode = #tpu.pipeline_mode<synchronous>, transform_indices = @transform_2, window_bounds = array<i64: 16, 1>}, {transform_indices = @transform_3, window_bounds = array<i64: 1, 16, 1024>}]} {
    %c0 = arith.constant 0 : index
    %c0_0 = arith.constant 0 : index
    %c0_1 = arith.constant 0 : index
    %0 = vector.load %arg2[%c0, %c0_0, %c0_1] : memref<1x16x1024xbf16, #tpu.memory_space<vmem>>, vector<1x16x1024xbf16>
    %1 = vector.shape_cast %0 : vector<1x16x1024xbf16> to vector<16x1024xbf16>
    %2 = arith.extf %1 : vector<16x1024xbf16> to vector<16x1024xf32>
    %c0_2 = arith.constant 0 : index
    %c0_3 = arith.constant 0 : index
    %3 = vector.load %arg3[%c0_2, %c0_3] : memref<16x16xf32, #tpu.memory_space<vmem>>, vector<16x16xf32>
    %4 = arith.mulf %2, %2 : vector<16x1024xf32>
    %cst = arith.constant dense<0.000000e+00> : vector<16x1024xf32>
    %5 = tpu.matmul %3, %4, %cst {dimension_numbers = #tpu.dot_dimension_numbers<[1], [0], [0], [1], [0, 0, 1, 1], [], []>} : vector<16x16xf32>, vector<16x1024xf32>, vector<16x1024xf32> -> vector<16x1024xf32>
    %c0_4 = arith.constant 0 : index
    %c0_5 = arith.constant 0 : index
    %6 = vector.load %arg4[%c0_4, %c0_5] : memref<16x1xf32, #tpu.memory_space<vmem>>, vector<16x1xf32>
    %7 = vector.broadcast %6 : vector<16x1xf32> to vector<16x1024xf32>
    %8 = arith.addf %5, %7 : vector<16x1024xf32>
    %9 = math.rsqrt %8 : vector<16x1024xf32>
    %10 = arith.mulf %2, %9 : vector<16x1024xf32>
    %11 = arith.truncf %10 : vector<16x1024xf32> to vector<16x1024xbf16>
    %c0_6 = arith.constant 0 : index
    %c0_7 = arith.constant 0 : index
    %c0_8 = arith.constant 0 : index
    %12 = vector.load %arg5[%c0_6, %c0_7, %c0_8] : memref<1x16x1024xbf16, #tpu.memory_space<vmem>>, vector<1x16x1024xbf16>
    %13 = vector.shape_cast %12 : vector<1x16x1024xbf16> to vector<16x1024xbf16>
    %14 = vector.shape_cast %11 : vector<16x1024xbf16> to vector<1x16x1024xbf16>
    tpu.vector_store %arg5[%c0_6, %c0_7, %c0_8], %14 {strides = array<i32>} : memref<1x16x1024xbf16, #tpu.memory_space<vmem>>, vector<1x16x1024xbf16>,
    return
  }
  func.func @transform_0(%arg0: i32, %arg1: i32) -> (i32, i32, i32) {
    %c0_i32 = arith.constant 0 : i32
    %c0_i32_0 = arith.constant 0 : i32
    return %arg0, %c0_i32, %arg1 : i32, i32, i32
  }
  func.func @transform_1(%arg0: i32, %arg1: i32) -> (i32, i32) {
    %c0_i32 = arith.constant 0 : i32
    %c0_i32_0 = arith.constant 0 : i32
    %c0_i32_1 = arith.constant 0 : i32
    return %c0_i32, %c0_i32_0 : i32, i32
  }
  func.func @transform_2(%arg0: i32, %arg1: i32) -> (i32, i32) {
    %c0_i32 = arith.constant 0 : i32
    %c0_i32_0 = arith.constant 0 : i32
    %c0_i32_1 = arith.constant 0 : i32
    return %c0_i32, %c0_i32_0 : i32, i32
  }
  func.func @transform_3(%arg0: i32, %arg1: i32) -> (i32, i32, i32) {
    %c0_i32 = arith.constant 0 : i32
    %c0_i32_0 = arith.constant 0 : i32
    return %arg0, %c0_i32, %arg1 : i32, i32, i32
  }
}

module attributes {stable_mosaic.version = 11 : i64} {
  func.func @_gdn_kernel(%arg0: i32, %arg1: i32, %arg2: memref<1x16x256xbf16, #tpu.memory_space<vmem>>, %arg3: memref<16x16xf32, #tpu.memory_space<vmem>>, %arg4: memref<16x1xf32, #tpu.memory_space<vmem>>, %arg5: memref<1x16x256xbf16, #tpu.memory_space<vmem>>) attributes {dimension_semantics = [#tpu.dimension_semantics<parallel>, #tpu.dimension_semantics<parallel>], iteration_bounds = array<i64: 2, 1>, scalar_prefetch = 0 : i64, scratch_operands = 0 : i64, tpu.core_type = #tpu.core_type<tc>, window_params = [{transform_indices = @transform_0, window_bounds = array<i64: 1, 16, 256>}, {pipeline_mode = #tpu.pipeline_mode<synchronous>, transform_indices = @transform_1, window_bounds = array<i64: 16, 16>}, {pipeline_mode = #tpu.pipeline_mode<synchronous>, transform_indices = @transform_2, window_bounds = array<i64: 16, 1>}, {transform_indices = @transform_3, window_bounds = array<i64: 1, 16, 256>}]} {
    %c0 = arith.constant 0 : index
    %c0_0 = arith.constant 0 : index
    %c0_1 = arith.constant 0 : index
    %0 = vector.load %arg2[%c0, %c0_0, %c0_1] : memref<1x16x256xbf16, #tpu.memory_space<vmem>>, vector<1x16x256xbf16>
    %1 = vector.shape_cast %0 : vector<1x16x256xbf16> to vector<16x256xbf16>
    %2 = arith.extf %1 : vector<16x256xbf16> to vector<16x256xf32>
    %c0_2 = arith.constant 0 : index
    %c0_3 = arith.constant 0 : index
    %3 = vector.load %arg3[%c0_2, %c0_3] : memref<16x16xf32, #tpu.memory_space<vmem>>, vector<16x16xf32>
    %4 = arith.mulf %2, %2 : vector<16x256xf32>
    %cst = arith.constant dense<0.000000e+00> : vector<16x256xf32>
    %5 = tpu.matmul %3, %4, %cst {dimension_numbers = #tpu.dot_dimension_numbers<[1], [0], [0], [1], [0, 0, 1, 1], [], []>} : vector<16x16xf32>, vector<16x256xf32>, vector<16x256xf32> -> vector<16x256xf32>
    %c0_4 = arith.constant 0 : index
    %c0_5 = arith.constant 0 : index
    %6 = vector.load %arg4[%c0_4, %c0_5] : memref<16x1xf32, #tpu.memory_space<vmem>>, vector<16x1xf32>
    %7 = vector.broadcast %6 : vector<16x1xf32> to vector<16x256xf32>
    %8 = arith.addf %5, %7 : vector<16x256xf32>
    %9 = math.rsqrt %8 : vector<16x256xf32>
    %10 = arith.mulf %2, %9 : vector<16x256xf32>
    %11 = arith.truncf %10 : vector<16x256xf32> to vector<16x256xbf16>
    %c0_6 = arith.constant 0 : index
    %c0_7 = arith.constant 0 : index
    %c0_8 = arith.constant 0 : index
    %12 = vector.load %arg5[%c0_6, %c0_7, %c0_8] : memref<1x16x256xbf16, #tpu.memory_space<vmem>>, vector<1x16x256xbf16>
    %13 = vector.shape_cast %12 : vector<1x16x256xbf16> to vector<16x256xbf16>
    %14 = vector.shape_cast %11 : vector<16x256xbf16> to vector<1x16x256xbf16>
    tpu.vector_store %arg5[%c0_6, %c0_7, %c0_8], %14 {strides = array<i32>} : memref<1x16x256xbf16, #tpu.memory_space<vmem>>, vector<1x16x256xbf16>,
    return
  }
  func.func @transform_0(%arg0: i32, %arg1: i32) -> (i32, i32, i32) {
    %c0_i32 = arith.constant 0 : i32
    %c0_i32_0 = arith.constant 0 : i32
    return %arg0, %c0_i32, %arg1 : i32, i32, i32
  }
  func.func @transform_1(%arg0: i32, %arg1: i32) -> (i32, i32) {
    %c0_i32 = arith.constant 0 : i32
    %c0_i32_0 = arith.constant 0 : i32
    %c0_i32_1 = arith.constant 0 : i32
    return %c0_i32, %c0_i32_0 : i32, i32
  }
  func.func @transform_2(%arg0: i32, %arg1: i32) -> (i32, i32) {
    %c0_i32 = arith.constant 0 : i32
    %c0_i32_0 = arith.constant 0 : i32
    %c0_i32_1 = arith.constant 0 : i32
    return %c0_i32, %c0_i32_0 : i32, i32
  }
  func.func @transform_3(%arg0: i32, %arg1: i32) -> (i32, i32, i32) {
    %c0_i32 = arith.constant 0 : i32
    %c0_i32_0 = arith.constant 0 : i32
    return %arg0, %c0_i32, %arg1 : i32, i32, i32
  }
}

module attributes {stable_mosaic.version = 11 : i64} {
  func.func @_gdn_kernel(%arg0: i32, %arg1: i32, %arg2: memref<1x16x64xbf16, #tpu.memory_space<vmem>>, %arg3: memref<16x16xf32, #tpu.memory_space<vmem>>, %arg4: memref<16x1xf32, #tpu.memory_space<vmem>>, %arg5: memref<1x16x64xbf16, #tpu.memory_space<vmem>>) attributes {dimension_semantics = [#tpu.dimension_semantics<parallel>, #tpu.dimension_semantics<parallel>], iteration_bounds = array<i64: 2, 1>, scalar_prefetch = 0 : i64, scratch_operands = 0 : i64, tpu.core_type = #tpu.core_type<tc>, window_params = [{transform_indices = @transform_0, window_bounds = array<i64: 1, 16, 64>}, {pipeline_mode = #tpu.pipeline_mode<synchronous>, transform_indices = @transform_1, window_bounds = array<i64: 16, 16>}, {pipeline_mode = #tpu.pipeline_mode<synchronous>, transform_indices = @transform_2, window_bounds = array<i64: 16, 1>}, {transform_indices = @transform_3, window_bounds = array<i64: 1, 16, 64>}]} {
    %c0 = arith.constant 0 : index
    %c0_0 = arith.constant 0 : index
    %c0_1 = arith.constant 0 : index
    %0 = vector.load %arg2[%c0, %c0_0, %c0_1] : memref<1x16x64xbf16, #tpu.memory_space<vmem>>, vector<1x16x64xbf16>
    %1 = vector.shape_cast %0 : vector<1x16x64xbf16> to vector<16x64xbf16>
    %2 = arith.extf %1 : vector<16x64xbf16> to vector<16x64xf32>
    %c0_2 = arith.constant 0 : index
    %c0_3 = arith.constant 0 : index
    %3 = vector.load %arg3[%c0_2, %c0_3] : memref<16x16xf32, #tpu.memory_space<vmem>>, vector<16x16xf32>
    %4 = arith.mulf %2, %2 : vector<16x64xf32>
    %cst = arith.constant dense<0.000000e+00> : vector<16x64xf32>
    %5 = tpu.matmul %3, %4, %cst {dimension_numbers = #tpu.dot_dimension_numbers<[1], [0], [0], [1], [0, 0, 1, 1], [], []>} : vector<16x16xf32>, vector<16x64xf32>, vector<16x64xf32> -> vector<16x64xf32>
    %c0_4 = arith.constant 0 : index
    %c0_5 = arith.constant 0 : index
    %6 = vector.load %arg4[%c0_4, %c0_5] : memref<16x1xf32, #tpu.memory_space<vmem>>, vector<16x1xf32>
    %7 = vector.broadcast %6 : vector<16x1xf32> to vector<16x64xf32>
    %8 = arith.addf %5, %7 : vector<16x64xf32>
    %9 = math.rsqrt %8 : vector<16x64xf32>
    %10 = arith.mulf %2, %9 : vector<16x64xf32>
    %11 = arith.truncf %10 : vector<16x64xf32> to vector<16x64xbf16>
    %c0_6 = arith.constant 0 : index
    %c0_7 = arith.constant 0 : index
    %c0_8 = arith.constant 0 : index
    %12 = vector.load %arg5[%c0_6, %c0_7, %c0_8] : memref<1x16x64xbf16, #tpu.memory_space<vmem>>, vector<1x16x64xbf16>
    %13 = vector.shape_cast %12 : vector<1x16x64xbf16> to vector<16x64xbf16>
    %14 = vector.shape_cast %11 : vector<16x64xbf16> to vector<1x16x64xbf16>
    tpu.vector_store %arg5[%c0_6, %c0_7, %c0_8], %14 {strides = array<i32>} : memref<1x16x64xbf16, #tpu.memory_space<vmem>>, vector<1x16x64xbf16>,
    return
  }
  func.func @transform_0(%arg0: i32, %arg1: i32) -> (i32, i32, i32) {
    %c0_i32 = arith.constant 0 : i32
    %c0_i32_0 = arith.constant 0 : i32
    return %arg0, %c0_i32, %arg1 : i32, i32, i32
  }
  func.func @transform_1(%arg0: i32, %arg1: i32) -> (i32, i32) {
    %c0_i32 = arith.constant 0 : i32
    %c0_i32_0 = arith.constant 0 : i32
    %c0_i32_1 = arith.constant 0 : i32
    return %c0_i32, %c0_i32_0 : i32, i32
  }
  func.func @transform_2(%arg0: i32, %arg1: i32) -> (i32, i32) {
    %c0_i32 = arith.constant 0 : i32
    %c0_i32_0 = arith.constant 0 : i32
    %c0_i32_1 = arith.constant 0 : i32
    return %c0_i32, %c0_i32_0 : i32, i32
  }
  func.func @transform_3(%arg0: i32, %arg1: i32) -> (i32, i32, i32) {
    %c0_i32 = arith.constant 0 : i32
    %c0_i32_0 = arith.constant 0 : i32
    return %arg0, %c0_i32, %arg1 : i32, i32, i32
  }
}

module attributes {stable_mosaic.version = 11 : i64} {
  func.func @_gdn_kernel(%arg0: i32, %arg1: i32, %arg2: memref<1x16x64xbf16, #tpu.memory_space<vmem>>, %arg3: memref<16x16xf32, #tpu.memory_space<vmem>>, %arg4: memref<16x1xf32, #tpu.memory_space<vmem>>, %arg5: memref<1x16x64xbf16, #tpu.memory_space<vmem>>) attributes {dimension_semantics = [#tpu.dimension_semantics<parallel>, #tpu.dimension_semantics<parallel>], iteration_bounds = array<i64: 2, 1>, scalar_prefetch = 0 : i64, scratch_operands = 0 : i64, tpu.core_type = #tpu.core_type<tc>, window_params = [{transform_indices = @transform_0, window_bounds = array<i64: 1, 16, 64>}, {pipeline_mode = #tpu.pipeline_mode<synchronous>, transform_indices = @transform_1, window_bounds = array<i64: 16, 16>}, {pipeline_mode = #tpu.pipeline_mode<synchronous>, transform_indices = @transform_2, window_bounds = array<i64: 16, 1>}, {transform_indices = @transform_3, window_bounds = array<i64: 1, 16, 64>}]} {
    %c0 = arith.constant 0 : index
    %c0_0 = arith.constant 0 : index
    %c0_1 = arith.constant 0 : index
    %0 = vector.load %arg2[%c0, %c0_0, %c0_1] : memref<1x16x64xbf16, #tpu.memory_space<vmem>>, vector<1x16x64xbf16>
    %1 = vector.shape_cast %0 : vector<1x16x64xbf16> to vector<16x64xbf16>
    %2 = arith.extf %1 : vector<16x64xbf16> to vector<16x64xf32>
    %c0_2 = arith.constant 0 : index
    %c0_3 = arith.constant 0 : index
    %3 = vector.load %arg3[%c0_2, %c0_3] : memref<16x16xf32, #tpu.memory_space<vmem>>, vector<16x16xf32>
    %4 = arith.mulf %2, %2 : vector<16x64xf32>
    %cst = arith.constant dense<0.000000e+00> : vector<16x64xf32>
    %5 = tpu.matmul %3, %4, %cst {dimension_numbers = #tpu.dot_dimension_numbers<[1], [0], [0], [1], [0, 0, 1, 1], [], []>} : vector<16x16xf32>, vector<16x64xf32>, vector<16x64xf32> -> vector<16x64xf32>
    %c0_4 = arith.constant 0 : index
    %c0_5 = arith.constant 0 : index
    %6 = vector.load %arg4[%c0_4, %c0_5] : memref<16x1xf32, #tpu.memory_space<vmem>>, vector<16x1xf32>
    %7 = vector.broadcast %6 : vector<16x1xf32> to vector<16x64xf32>
    %8 = arith.addf %5, %7 : vector<16x64xf32>
    %9 = math.sqrt %8 : vector<16x64xf32>
    %10 = arith.mulf %2, %9 : vector<16x64xf32>
    %11 = arith.truncf %10 : vector<16x64xf32> to vector<16x64xbf16>
    %c0_6 = arith.constant 0 : index
    %c0_7 = arith.constant 0 : index
    %c0_8 = arith.constant 0 : index
    %12 = vector.load %arg5[%c0_6, %c0_7, %c0_8] : memref<1x16x64xbf16, #tpu.memory_space<vmem>>, vector<1x16x64xbf16>
    %13 = vector.shape_cast %12 : vector<1x16x64xbf16> to vector<16x64xbf16>
    %14 = vector.shape_cast %11 : vector<16x64xbf16> to vector<1x16x64xbf16>
    tpu.vector_store %arg5[%c0_6, %c0_7, %c0_8], %14 {strides = array<i32>} : memref<1x16x64xbf16, #tpu.memory_space<vmem>>, vector<1x16x64xbf16>,
    return
  }
  func.func @transform_0(%arg0: i32, %arg1: i32) -> (i32, i32, i32) {
    %c0_i32 = arith.constant 0 : i32
    %c0_i32_0 = arith.constant 0 : i32
    return %arg0, %c0_i32, %arg1 : i32, i32, i32
  }
  func.func @transform_1(%arg0: i32, %arg1: i32) -> (i32, i32) {
    %c0_i32 = arith.constant 0 : i32
    %c0_i32_0 = arith.constant 0 : i32
    %c0_i32_1 = arith.constant 0 : i32
    return %c0_i32, %c0_i32_0 : i32, i32
  }
  func.func @transform_2(%arg0: i32, %arg1: i32) -> (i32, i32) {
    %c0_i32 = arith.constant 0 : i32
    %c0_i32_0 = arith.constant 0 : i32
    %c0_i32_1 = arith.constant 0 : i32
    return %c0_i32, %c0_i32_0 : i32, i32
  }
  func.func @transform_3(%arg0: i32, %arg1: i32) -> (i32, i32, i32) {
    %c0_i32 = arith.constant 0 : i32
    %c0_i32_0 = arith.constant 0 : i32
    return %arg0, %c0_i32, %arg1 : i32, i32, i32
  }
}

module attributes {stable_mosaic.version = 11 : i64} {
  func.func @_gdn_kernel(%arg0: i32, %arg1: i32, %arg2: memref<1x16x256xbf16, #tpu.memory_space<vmem>>, %arg3: memref<16x16xf32, #tpu.memory_space<vmem>>, %arg4: memref<16x1xf32, #tpu.memory_space<vmem>>, %arg5: memref<1x16x256xbf16, #tpu.memory_space<vmem>>) attributes {dimension_semantics = [#tpu.dimension_semantics<parallel>, #tpu.dimension_semantics<parallel>], iteration_bounds = array<i64: 2, 1>, scalar_prefetch = 0 : i64, scratch_operands = 0 : i64, tpu.core_type = #tpu.core_type<tc>, window_params = [{transform_indices = @transform_0, window_bounds = array<i64: 1, 16, 256>}, {pipeline_mode = #tpu.pipeline_mode<synchronous>, transform_indices = @transform_1, window_bounds = array<i64: 16, 16>}, {pipeline_mode = #tpu.pipeline_mode<synchronous>, transform_indices = @transform_2, window_bounds = array<i64: 16, 1>}, {transform_indices = @transform_3, window_bounds = array<i64: 1, 16, 256>}]} {
    %c0 = arith.constant 0 : index
    %c0_0 = arith.constant 0 : index
    %c0_1 = arith.constant 0 : index
    %0 = vector.load %arg2[%c0, %c0_0, %c0_1] : memref<1x16x256xbf16, #tpu.memory_space<vmem>>, vector<1x16x256xbf16>
    %1 = vector.shape_cast %0 : vector<1x16x256xbf16> to vector<16x256xbf16>
    %2 = arith.extf %1 : vector<16x256xbf16> to vector<16x256xf32>
    %c0_2 = arith.constant 0 : index
    %c0_3 = arith.constant 0 : index
    %3 = vector.load %arg3[%c0_2, %c0_3] : memref<16x16xf32, #tpu.memory_space<vmem>>, vector<16x16xf32>
    %4 = arith.mulf %2, %2 : vector<16x256xf32>
    %cst = arith.constant dense<0.000000e+00> : vector<16x256xf32>
    %5 = tpu.matmul %3, %4, %cst {dimension_numbers = #tpu.dot_dimension_numbers<[1], [0], [0], [1], [0, 0, 1, 1], [], []>} : vector<16x16xf32>, vector<16x256xf32>, vector<16x256xf32> -> vector<16x256xf32>
    %c0_4 = arith.constant 0 : index
    %c0_5 = arith.constant 0 : index
    %6 = vector.load %arg4[%c0_4, %c0_5] : memref<16x1xf32, #tpu.memory_space<vmem>>, vector<16x1xf32>
    %7 = vector.broadcast %6 : vector<16x1xf32> to vector<16x256xf32>
    %8 = arith.addf %5, %7 : vector<16x256xf32>
    %9 = math.sqrt %8 : vector<16x256xf32>
    %10 = arith.mulf %2, %9 : vector<16x256xf32>
    %11 = arith.truncf %10 : vector<16x256xf32> to vector<16x256xbf16>
    %c0_6 = arith.constant 0 : index
    %c0_7 = arith.constant 0 : index
    %c0_8 = arith.constant 0 : index
    %12 = vector.load %arg5[%c0_6, %c0_7, %c0_8] : memref<1x16x256xbf16, #tpu.memory_space<vmem>>, vector<1x16x256xbf16>
    %13 = vector.shape_cast %12 : vector<1x16x256xbf16> to vector<16x256xbf16>
    %14 = vector.shape_cast %11 : vector<16x256xbf16> to vector<1x16x256xbf16>
    tpu.vector_store %arg5[%c0_6, %c0_7, %c0_8], %14 {strides = array<i32>} : memref<1x16x256xbf16, #tpu.memory_space<vmem>>, vector<1x16x256xbf16>,
    return
  }
  func.func @transform_0(%arg0: i32, %arg1: i32) -> (i32, i32, i32) {
    %c0_i32 = arith.constant 0 : i32
    %c0_i32_0 = arith.constant 0 : i32
    return %arg0, %c0_i32, %arg1 : i32, i32, i32
  }
  func.func @transform_1(%arg0: i32, %arg1: i32) -> (i32, i32) {
    %c0_i32 = arith.constant 0 : i32
    %c0_i32_0 = arith.constant 0 : i32
    %c0_i32_1 = arith.constant 0 : i32
    return %c0_i32, %c0_i32_0 : i32, i32
  }
  func.func @transform_2(%arg0: i32, %arg1: i32) -> (i32, i32) {
    %c0_i32 = arith.constant 0 : i32
    %c0_i32_0 = arith.constant 0 : i32
    %c0_i32_1 = arith.constant 0 : i32
    return %c0_i32, %c0_i32_0 : i32, i32
  }
  func.func @transform_3(%arg0: i32, %arg1: i32) -> (i32, i32, i32) {
    %c0_i32 = arith.constant 0 : i32
    %c0_i32_0 = arith.constant 0 : i32
    return %arg0, %c0_i32, %arg1 : i32, i32, i32
  }
}

module attributes {stable_mosaic.version = 11 : i64} {
  func.func @_gdn_kernel(%arg0: i32, %arg1: i32, %arg2: memref<1x16x1024xbf16, #tpu.memory_space<vmem>>, %arg3: memref<16x16xf32, #tpu.memory_space<vmem>>, %arg4: memref<16x1xf32, #tpu.memory_space<vmem>>, %arg5: memref<1x16x1024xbf16, #tpu.memory_space<vmem>>) attributes {dimension_semantics = [#tpu.dimension_semantics<parallel>, #tpu.dimension_semantics<parallel>], iteration_bounds = array<i64: 2, 1>, scalar_prefetch = 0 : i64, scratch_operands = 0 : i64, tpu.core_type = #tpu.core_type<tc>, window_params = [{transform_indices = @transform_0, window_bounds = array<i64: 1, 16, 1024>}, {pipeline_mode = #tpu.pipeline_mode<synchronous>, transform_indices = @transform_1, window_bounds = array<i64: 16, 16>}, {pipeline_mode = #tpu.pipeline_mode<synchronous>, transform_indices = @transform_2, window_bounds = array<i64: 16, 1>}, {transform_indices = @transform_3, window_bounds = array<i64: 1, 16, 1024>}]} {
    %c0 = arith.constant 0 : index
    %c0_0 = arith.constant 0 : index
    %c0_1 = arith.constant 0 : index
    %0 = vector.load %arg2[%c0, %c0_0, %c0_1] : memref<1x16x1024xbf16, #tpu.memory_space<vmem>>, vector<1x16x1024xbf16>
    %1 = vector.shape_cast %0 : vector<1x16x1024xbf16> to vector<16x1024xbf16>
    %2 = arith.extf %1 : vector<16x1024xbf16> to vector<16x1024xf32>
    %c0_2 = arith.constant 0 : index
    %c0_3 = arith.constant 0 : index
    %3 = vector.load %arg3[%c0_2, %c0_3] : memref<16x16xf32, #tpu.memory_space<vmem>>, vector<16x16xf32>
    %4 = arith.mulf %2, %2 : vector<16x1024xf32>
    %cst = arith.constant dense<0.000000e+00> : vector<16x1024xf32>
    %5 = tpu.matmul %3, %4, %cst {dimension_numbers = #tpu.dot_dimension_numbers<[1], [0], [0], [1], [0, 0, 1, 1], [], []>} : vector<16x16xf32>, vector<16x1024xf32>, vector<16x1024xf32> -> vector<16x1024xf32>
    %c0_4 = arith.constant 0 : index
    %c0_5 = arith.constant 0 : index
    %6 = vector.load %arg4[%c0_4, %c0_5] : memref<16x1xf32, #tpu.memory_space<vmem>>, vector<16x1xf32>
    %7 = vector.broadcast %6 : vector<16x1xf32> to vector<16x1024xf32>
    %8 = arith.addf %5, %7 : vector<16x1024xf32>
    %9 = math.sqrt %8 : vector<16x1024xf32>
    %10 = arith.mulf %2, %9 : vector<16x1024xf32>
    %11 = arith.truncf %10 : vector<16x1024xf32> to vector<16x1024xbf16>
    %c0_6 = arith.constant 0 : index
    %c0_7 = arith.constant 0 : index
    %c0_8 = arith.constant 0 : index
    %12 = vector.load %arg5[%c0_6, %c0_7, %c0_8] : memref<1x16x1024xbf16, #tpu.memory_space<vmem>>, vector<1x16x1024xbf16>
    %13 = vector.shape_cast %12 : vector<1x16x1024xbf16> to vector<16x1024xbf16>
    %14 = vector.shape_cast %11 : vector<16x1024xbf16> to vector<1x16x1024xbf16>
    tpu.vector_store %arg5[%c0_6, %c0_7, %c0_8], %14 {strides = array<i32>} : memref<1x16x1024xbf16, #tpu.memory_space<vmem>>, vector<1x16x1024xbf16>,
    return
  }
  func.func @transform_0(%arg0: i32, %arg1: i32) -> (i32, i32, i32) {
    %c0_i32 = arith.constant 0 : i32
    %c0_i32_0 = arith.constant 0 : i32
    return %arg0, %c0_i32, %arg1 : i32, i32, i32
  }
  func.func @transform_1(%arg0: i32, %arg1: i32) -> (i32, i32) {
    %c0_i32 = arith.constant 0 : i32
    %c0_i32_0 = arith.constant 0 : i32
    %c0_i32_1 = arith.constant 0 : i32
    return %c0_i32, %c0_i32_0 : i32, i32
  }
  func.func @transform_2(%arg0: i32, %arg1: i32) -> (i32, i32) {
    %c0_i32 = arith.constant 0 : i32
    %c0_i32_0 = arith.constant 0 : i32
    %c0_i32_1 = arith.constant 0 : i32
    return %c0_i32, %c0_i32_0 : i32, i32
  }
  func.func @transform_3(%arg0: i32, %arg1: i32) -> (i32, i32, i32) {
    %c0_i32 = arith.constant 0 : i32
    %c0_i32_0 = arith.constant 0 : i32
    return %arg0, %c0_i32, %arg1 : i32, i32, i32
  }
}

module attributes {stable_mosaic.version = 11 : i64} {
  func.func @_loss_kernel(%arg0: i32, %arg1: i32, %arg2: memref<1x24x512xf32, #tpu.memory_space<vmem>>, %arg3: memref<1x24x512xf32, #tpu.memory_space<vmem>>, %arg4: memref<6x128xf32, #tpu.memory_space<vmem>>, %arg5: memref<6x128xf32, #tpu.memory_space<vmem>>, %arg6: memref<6x128xf32, #tpu.memory_space<vmem>>, %arg7: memref<16x2xf32, #tpu.memory_space<vmem>>, %arg8: memref<4x16x1xf32, #tpu.memory_space<vmem>>, %arg9: memref<4x16x1xf32, #tpu.memory_space<vmem>>, %arg10: memref<3x16x1xf32, #tpu.memory_space<vmem>>, %arg11: memref<1x8x128xf32, #tpu.memory_space<vmem>>, %arg12: memref<24x512xf32, #tpu.memory_space<vmem>>, %arg13: memref<8x128xf32, #tpu.memory_space<vmem>>) attributes {dimension_semantics = [#tpu.dimension_semantics<parallel>, #tpu.dimension_semantics<arbitrary>], iteration_bounds = array<i64: 2, 1>, scalar_prefetch = 0 : i64, scratch_operands = 2 : i64, tpu.core_type = #tpu.core_type<tc>, window_params = [{transform_indices = @transform_0, window_bounds = array<i64: 1, 24, 512>}, {transform_indices = @transform_1, window_bounds = array<i64: 1, 24, 512>}, {pipeline_mode = #tpu.pipeline_mode<synchronous>, transform_indices = @transform_2, window_bounds = array<i64: 6, 128>}, {pipeline_mode = #tpu.pipeline_mode<synchronous>, transform_indices = @transform_3, window_bounds = array<i64: 6, 128>}, {pipeline_mode = #tpu.pipeline_mode<synchronous>, transform_indices = @transform_4, window_bounds = array<i64: 6, 128>}, {pipeline_mode = #tpu.pipeline_mode<synchronous>, transform_indices = @transform_5, window_bounds = array<i64: 16, 2>}, {pipeline_mode = #tpu.pipeline_mode<synchronous>, transform_indices = @transform_6, window_bounds = array<i64: 4, 16, 1>}, {pipeline_mode = #tpu.pipeline_mode<synchronous>, transform_indices = @transform_7, window_bounds = array<i64: 4, 16, 1>}, {pipeline_mode = #tpu.pipeline_mode<synchronous>, transform_indices = @transform_8, window_bounds = array<i64: 3, 16, 1>}, {transform_indices = @transform_9, window_bounds = array<i64: 1, 8, 128>}]} {
    %c0_i32 = arith.constant 0 : i32
    %0 = arith.cmpi eq, %arg1, %c0_i32 : i32
    %1 = arith.extui %0 : i1 to i32
    %c0_i32_0 = arith.constant 0 : i32
    %2 = arith.cmpi ne, %1, %c0_i32_0 : i32
    scf.if %2 {
      %cst = arith.constant 0.000000e+00 : f32
      %20 = vector.broadcast %cst : f32 to vector<24x512xf32>
      %c0_15 = arith.constant 0 : index
      %c0_16 = arith.constant 0 : index
      %21 = vector.load %arg12[%c0_15, %c0_16] : memref<24x512xf32, #tpu.memory_space<vmem>>, vector<24x512xf32>
      tpu.vector_store %arg12[%c0_15, %c0_16], %20 {strides = array<i32>} : memref<24x512xf32, #tpu.memory_space<vmem>>, vector<24x512xf32>,
      %cst_17 = arith.constant 0.000000e+00 : f32
      %22 = vector.broadcast %cst_17 : f32 to vector<8x128xf32>
      %c0_18 = arith.constant 0 : index
      %c0_19 = arith.constant 0 : index
      %23 = vector.load %arg13[%c0_18, %c0_19] : memref<8x128xf32, #tpu.memory_space<vmem>>, vector<8x128xf32>
      tpu.vector_store %arg13[%c0_18, %c0_19], %22 {strides = array<i32>} : memref<8x128xf32, #tpu.memory_space<vmem>>, vector<8x128xf32>,
    } else {
    }
    %c0 = arith.constant 0 : index
    %c0_1 = arith.constant 0 : index
    %c0_2 = arith.constant 0 : index
    %3 = vector.load %arg2[%c0, %c0_1, %c0_2] : memref<1x24x512xf32, #tpu.memory_space<vmem>>, vector<1x24x512xf32>
    %4 = vector.shape_cast %3 : vector<1x24x512xf32> to vector<24x512xf32>
    %c0_3 = arith.constant 0 : index
    %c0_4 = arith.constant 0 : index
    %c0_5 = arith.constant 0 : index
    %5 = vector.load %arg3[%c0_3, %c0_4, %c0_5] : memref<1x24x512xf32, #tpu.memory_space<vmem>>, vector<1x24x512xf32>
    %6 = vector.shape_cast %5 : vector<1x24x512xf32> to vector<24x512xf32>
    %7 = arith.subf %4, %6 : vector<24x512xf32>
    %c0_6 = arith.constant 0 : index
    %c0_7 = arith.constant 0 : index
    %8 = vector.load %arg12[%c0_6, %c0_7] : memref<24x512xf32, #tpu.memory_space<vmem>>, vector<24x512xf32>
    %9 = arith.mulf %7, %7 : vector<24x512xf32>
    %10 = arith.addf %8, %9 : vector<24x512xf32>
    %c0_8 = arith.constant 0 : index
    %c0_9 = arith.constant 0 : index
    %11 = vector.load %arg12[%c0_8, %c0_9] : memref<24x512xf32, #tpu.memory_space<vmem>>, vector<24x512xf32>
    tpu.vector_store %arg12[%c0_8, %c0_9], %10 {strides = array<i32>} : memref<24x512xf32, #tpu.memory_space<vmem>>, vector<24x512xf32>,
    %c0_i32_10 = arith.constant 0 : i32
    %12 = arith.cmpi eq, %arg1, %c0_i32_10 : i32
    %c0_i32_11 = arith.constant 0 : i32
    %13 = arith.cmpi eq, %arg0, %c0_i32_11 : i32
    %14 = arith.andi %12, %13 : i1
    %15 = arith.extui %14 : i1 to i32
    %c0_i32_12 = arith.constant 0 : i32
    %16 = arith.cmpi ne, %15, %c0_i32_12 : i32
    scf.if %16 {
      %c0_15 = arith.constant 0 : index
      %c0_16 = arith.constant 0 : index
      %20 = vector.load %arg4[%c0_15, %c0_16] : memref<6x128xf32, #tpu.memory_space<vmem>>, vector<6x128xf32>
      %c0_17 = arith.constant 0 : index
      %c0_18 = arith.constant 0 : index
      %21 = vector.load %arg5[%c0_17, %c0_18] : memref<6x128xf32, #tpu.memory_space<vmem>>, vector<6x128xf32>
      %cst = arith.constant 1.100000e-01 : f32
      %22 = vector.broadcast %cst : f32 to vector<6x128xf32>
      %23 = arith.maximumf %21, %22 : vector<6x128xf32>
      %24 = tpu.reciprocal %23 {approx = true} : vector<6x128xf32> -> vector<6x128xf32>
      %cst_19 = arith.constant 5.000000e-01 : f32
      %25 = vector.broadcast %cst_19 : f32 to vector<6x128xf32>
      %26 = arith.addf %20, %25 : vector<6x128xf32>
      %27 = arith.mulf %26, %24 : vector<6x128xf32>
      %cst_20 = arith.constant 0.707106769 : f32
      %28 = vector.broadcast %cst_20 : f32 to vector<6x128xf32>
      %29 = arith.mulf %27, %28 : vector<6x128xf32>
      %cst_21 = arith.constant 0.000000e+00 : f32
      %30 = vector.broadcast %cst_21 : f32 to vector<6x128xf32>
      %31 = arith.cmpf oge, %29, %30 : vector<6x128xf32>
      %cst_22 = arith.constant 1.000000e+00 : f32
      %cst_23 = arith.constant -1.000000e+00 : f32
      %32 = vector.broadcast %cst_22 : f32 to vector<6x128xf32>
      %33 = vector.broadcast %cst_23 : f32 to vector<6x128xf32>
      %34 = arith.select %31, %32, %33 : vector<6x128xi1>, vector<6x128xf32>
      %35 = math.absf %29 : vector<6x128xf32>
      %cst_24 = arith.constant 0.327591091 : f32
      %36 = vector.broadcast %cst_24 : f32 to vector<6x128xf32>
      %37 = arith.mulf %36, %35 : vector<6x128xf32>
      %cst_25 = arith.constant 1.000000e+00 : f32
      %38 = vector.broadcast %cst_25 : f32 to vector<6x128xf32>
      %39 = arith.addf %38, %37 : vector<6x128xf32>
      %cst_26 = arith.constant 1.000000e+00 : f32
      %40 = vector.broadcast %cst_26 : f32 to vector<6x128xf32>
      %41 = arith.divf %40, %39 : vector<6x128xf32>
      %cst_27 = arith.constant 1.06140542 : f32
      %42 = vector.broadcast %cst_27 : f32 to vector<6x128xf32>
      %43 = arith.mulf %42, %41 : vector<6x128xf32>
      %cst_28 = arith.constant -1.45315206 : f32
      %44 = vector.broadcast %cst_28 : f32 to vector<6x128xf32>
      %45 = arith.addf %43, %44 : vector<6x128xf32>
      %46 = arith.mulf %45, %41 : vector<6x128xf32>
      %cst_29 = arith.constant 1.42141378 : f32
      %47 = vector.broadcast %cst_29 : f32 to vector<6x128xf32>
      %48 = arith.addf %46, %47 : vector<6x128xf32>
      %49 = arith.mulf %48, %41 : vector<6x128xf32>
      %cst_30 = arith.constant -0.284496725 : f32
      %50 = vector.broadcast %cst_30 : f32 to vector<6x128xf32>
      %51 = arith.addf %49, %50 : vector<6x128xf32>
      %52 = arith.mulf %51, %41 : vector<6x128xf32>
      %cst_31 = arith.constant 0.254829586 : f32
      %53 = vector.broadcast %cst_31 : f32 to vector<6x128xf32>
      %54 = arith.addf %52, %53 : vector<6x128xf32>
      %55 = arith.mulf %54, %41 : vector<6x128xf32>
      %cst_32 = arith.constant 0.000000e+00 : f32
      %56 = vector.broadcast %cst_32 : f32 to vector<6x128xf32>
      %57 = arith.subf %56, %35 : vector<6x128xf32>
      %58 = arith.mulf %57, %35 : vector<6x128xf32>
      %59 = math.exp %58 : vector<6x128xf32>
      %60 = arith.mulf %55, %59 : vector<6x128xf32>
      %cst_33 = arith.constant 1.000000e+00 : f32
      %61 = vector.broadcast %cst_33 : f32 to vector<6x128xf32>
      %62 = arith.subf %61, %60 : vector<6x128xf32>
      %63 = arith.mulf %34, %62 : vector<6x128xf32>
      %cst_34 = arith.constant 1.000000e+00 : f32
      %64 = vector.broadcast %cst_34 : f32 to vector<6x128xf32>
      %65 = arith.addf %64, %63 : vector<6x128xf32>
      %cst_35 = arith.constant 5.000000e-01 : f32
      %66 = vector.broadcast %cst_35 : f32 to vector<6x128xf32>
      %67 = arith.mulf %66, %65 : vector<6x128xf32>
      %cst_36 = arith.constant 5.000000e-01 : f32
      %68 = vector.broadcast %cst_36 : f32 to vector<6x128xf32>
      %69 = arith.subf %20, %68 : vector<6x128xf32>
      %70 = arith.mulf %69, %24 : vector<6x128xf32>
      %cst_37 = arith.constant 0.707106769 : f32
      %71 = vector.broadcast %cst_37 : f32 to vector<6x128xf32>
      %72 = arith.mulf %70, %71 : vector<6x128xf32>
      %cst_38 = arith.constant 0.000000e+00 : f32
      %73 = vector.broadcast %cst_38 : f32 to vector<6x128xf32>
      %74 = arith.cmpf oge, %72, %73 : vector<6x128xf32>
      %cst_39 = arith.constant 1.000000e+00 : f32
      %cst_40 = arith.constant -1.000000e+00 : f32
      %75 = vector.broadcast %cst_39 : f32 to vector<6x128xf32>
      %76 = vector.broadcast %cst_40 : f32 to vector<6x128xf32>
      %77 = arith.select %74, %75, %76 : vector<6x128xi1>, vector<6x128xf32>
      %78 = math.absf %72 : vector<6x128xf32>
      %cst_41 = arith.constant 0.327591091 : f32
      %79 = vector.broadcast %cst_41 : f32 to vector<6x128xf32>
      %80 = arith.mulf %79, %78 : vector<6x128xf32>
      %cst_42 = arith.constant 1.000000e+00 : f32
      %81 = vector.broadcast %cst_42 : f32 to vector<6x128xf32>
      %82 = arith.addf %81, %80 : vector<6x128xf32>
      %cst_43 = arith.constant 1.000000e+00 : f32
      %83 = vector.broadcast %cst_43 : f32 to vector<6x128xf32>
      %84 = arith.divf %83, %82 : vector<6x128xf32>
      %cst_44 = arith.constant 1.06140542 : f32
      %85 = vector.broadcast %cst_44 : f32 to vector<6x128xf32>
      %86 = arith.mulf %85, %84 : vector<6x128xf32>
      %cst_45 = arith.constant -1.45315206 : f32
      %87 = vector.broadcast %cst_45 : f32 to vector<6x128xf32>
      %88 = arith.addf %86, %87 : vector<6x128xf32>
      %89 = arith.mulf %88, %84 : vector<6x128xf32>
      %cst_46 = arith.constant 1.42141378 : f32
      %90 = vector.broadcast %cst_46 : f32 to vector<6x128xf32>
      %91 = arith.addf %89, %90 : vector<6x128xf32>
      %92 = arith.mulf %91, %84 : vector<6x128xf32>
      %cst_47 = arith.constant -0.284496725 : f32
      %93 = vector.broadcast %cst_47 : f32 to vector<6x128xf32>
      %94 = arith.addf %92, %93 : vector<6x128xf32>
      %95 = arith.mulf %94, %84 : vector<6x128xf32>
      %cst_48 = arith.constant 0.254829586 : f32
      %96 = vector.broadcast %cst_48 : f32 to vector<6x128xf32>
      %97 = arith.addf %95, %96 : vector<6x128xf32>
      %98 = arith.mulf %97, %84 : vector<6x128xf32>
      %cst_49 = arith.constant 0.000000e+00 : f32
      %99 = vector.broadcast %cst_49 : f32 to vector<6x128xf32>
      %100 = arith.subf %99, %78 : vector<6x128xf32>
      %101 = arith.mulf %100, %78 : vector<6x128xf32>
      %102 = math.exp %101 : vector<6x128xf32>
      %103 = arith.mulf %98, %102 : vector<6x128xf32>
      %cst_50 = arith.constant 1.000000e+00 : f32
      %104 = vector.broadcast %cst_50 : f32 to vector<6x128xf32>
      %105 = arith.subf %104, %103 : vector<6x128xf32>
      %106 = arith.mulf %77, %105 : vector<6x128xf32>
      %cst_51 = arith.constant 1.000000e+00 : f32
      %107 = vector.broadcast %cst_51 : f32 to vector<6x128xf32>
      %108 = arith.addf %107, %106 : vector<6x128xf32>
      %cst_52 = arith.constant 5.000000e-01 : f32
      %109 = vector.broadcast %cst_52 : f32 to vector<6x128xf32>
      %110 = arith.mulf %109, %108 : vector<6x128xf32>
      %111 = arith.subf %67, %110 : vector<6x128xf32>
      %cst_53 = arith.constant 9.99999971E-10 : f32
      %112 = vector.broadcast %cst_53 : f32 to vector<6x128xf32>
      %113 = arith.maximumf %111, %112 : vector<6x128xf32>
      %114 = math.log %113 : vector<6x128xf32>
      %cst_54 = arith.constant 0.000000e+00 : f32
      %115 = vector.broadcast %cst_54 : f32 to vector<6x128xf32>
      %116 = arith.subf %115, %114 : vector<6x128xf32>
      %cst_55 = arith.constant 1.44269502 : f32
      %117 = vector.broadcast %cst_55 : f32 to vector<6x128xf32>
      %118 = arith.mulf %116, %117 : vector<6x128xf32>
      %cst_56 = arith.constant 0.000000e+00 : f32
      %cst_57 = arith.constant 5.000000e+01 : f32
      %119 = vector.broadcast %cst_56 : f32 to vector<6x128xf32>
      %120 = arith.maximumf %119, %118 : vector<6x128xf32>
      %121 = vector.broadcast %cst_57 : f32 to vector<6x128xf32>
      %122 = arith.minimumf %121, %120 : vector<6x128xf32>
      %c0_58 = arith.constant 0 : index
      %c0_59 = arith.constant 0 : index
      %123 = vector.load %arg6[%c0_58, %c0_59] : memref<6x128xf32, #tpu.memory_space<vmem>>, vector<6x128xf32>
      %124 = arith.mulf %122, %123 : vector<6x128xf32>
      %125 = vector.shape_cast %124 : vector<6x128xf32> to vector<1x6x128xf32>
      %cst_60 = arith.constant dense<0.000000e+00> : vector<1xf32>
      %126 = vector.multi_reduction <add>, %125, %cst_60 [1, 2] : vector<1x6x128xf32> to vector<1xf32>
      %127 = vector.shape_cast %126 : vector<1xf32> to vector<1x1x1xf32>
      %128 = vector.extract %127[0, 0, 0] : f32 from vector<1x1x1xf32>
      %c0_61 = arith.constant 0 : index
      %c0_62 = arith.constant 0 : index
      %129 = vector.load %arg7[%c0_61, %c0_62] : memref<16x2xf32, #tpu.memory_space<vmem>>, vector<16x2xf32>
      %cst_63 = arith.constant 5.000000e-01 : f32
      %130 = vector.broadcast %cst_63 : f32 to vector<16x2xf32>
      %131 = arith.addf %129, %130 : vector<16x2xf32>
      %c0_64 = arith.constant 0 : index
      %c0_65 = arith.constant 0 : index
      %c0_66 = arith.constant 0 : index
      %132 = vector.load %arg8[%c0_64, %c0_65, %c0_66] : memref<4x16x1xf32, #tpu.memory_space<vmem>>, vector<1x16x1xf32>
      %133 = vector.shape_cast %132 : vector<1x16x1xf32> to vector<16x1xf32>
      %134 = vector.broadcast %133 : vector<16x1xf32> to vector<16x2xf32>
      %135 = arith.mulf %134, %131 : vector<16x2xf32>
      %c0_67 = arith.constant 0 : index
      %c0_68 = arith.constant 0 : index
      %c0_69 = arith.constant 0 : index
      %136 = vector.load %arg9[%c0_67, %c0_68, %c0_69] : memref<4x16x1xf32, #tpu.memory_space<vmem>>, vector<1x16x1xf32>
      %137 = vector.shape_cast %136 : vector<1x16x1xf32> to vector<16x1xf32>
      %138 = vector.broadcast %137 : vector<16x1xf32> to vector<16x2xf32>
      %139 = arith.addf %135, %138 : vector<16x2xf32>
      %c0_70 = arith.constant 0 : index
      %c0_71 = arith.constant 0 : index
      %c0_72 = arith.constant 0 : index
      %140 = vector.load %arg10[%c0_70, %c0_71, %c0_72] : memref<3x16x1xf32, #tpu.memory_space<vmem>>, vector<1x16x1xf32>
      %141 = vector.shape_cast %140 : vector<1x16x1xf32> to vector<16x1xf32>
      %142 = math.tanh %139 : vector<16x2xf32>
      %143 = vector.broadcast %141 : vector<16x1xf32> to vector<16x2xf32>
      %144 = arith.mulf %143, %142 : vector<16x2xf32>
      %145 = arith.addf %139, %144 : vector<16x2xf32>
      %c1 = arith.constant 1 : index
      %c0_73 = arith.constant 0 : index
      %c0_74 = arith.constant 0 : index
      %146 = vector.load %arg8[%c1, %c0_73, %c0_74] : memref<4x16x1xf32, #tpu.memory_space<vmem>>, vector<1x16x1xf32>
      %147 = vector.shape_cast %146 : vector<1x16x1xf32> to vector<16x1xf32>
      %148 = vector.broadcast %147 : vector<16x1xf32> to vector<16x2xf32>
      %149 = arith.mulf %148, %145 : vector<16x2xf32>
      %c1_75 = arith.constant 1 : index
      %c0_76 = arith.constant 0 : index
      %c0_77 = arith.constant 0 : index
      %150 = vector.load %arg9[%c1_75, %c0_76, %c0_77] : memref<4x16x1xf32, #tpu.memory_space<vmem>>, vector<1x16x1xf32>
      %151 = vector.shape_cast %150 : vector<1x16x1xf32> to vector<16x1xf32>
      %152 = vector.broadcast %151 : vector<16x1xf32> to vector<16x2xf32>
      %153 = arith.addf %149, %152 : vector<16x2xf32>
      %c1_78 = arith.constant 1 : index
      %c0_79 = arith.constant 0 : index
      %c0_80 = arith.constant 0 : index
      %154 = vector.load %arg10[%c1_78, %c0_79, %c0_80] : memref<3x16x1xf32, #tpu.memory_space<vmem>>, vector<1x16x1xf32>
      %155 = vector.shape_cast %154 : vector<1x16x1xf32> to vector<16x1xf32>
      %156 = math.tanh %153 : vector<16x2xf32>
      %157 = vector.broadcast %155 : vector<16x1xf32> to vector<16x2xf32>
      %158 = arith.mulf %157, %156 : vector<16x2xf32>
      %159 = arith.addf %153, %158 : vector<16x2xf32>
      %c2 = arith.constant 2 : index
      %c0_81 = arith.constant 0 : index
      %c0_82 = arith.constant 0 : index
      %160 = vector.load %arg8[%c2, %c0_81, %c0_82] : memref<4x16x1xf32, #tpu.memory_space<vmem>>, vector<1x16x1xf32>
      %161 = vector.shape_cast %160 : vector<1x16x1xf32> to vector<16x1xf32>
      %162 = vector.broadcast %161 : vector<16x1xf32> to vector<16x2xf32>
      %163 = arith.mulf %162, %159 : vector<16x2xf32>
      %c2_83 = arith.constant 2 : index
      %c0_84 = arith.constant 0 : index
      %c0_85 = arith.constant 0 : index
      %164 = vector.load %arg9[%c2_83, %c0_84, %c0_85] : memref<4x16x1xf32, #tpu.memory_space<vmem>>, vector<1x16x1xf32>
      %165 = vector.shape_cast %164 : vector<1x16x1xf32> to vector<16x1xf32>
      %166 = vector.broadcast %165 : vector<16x1xf32> to vector<16x2xf32>
      %167 = arith.addf %163, %166 : vector<16x2xf32>
      %c2_86 = arith.constant 2 : index
      %c0_87 = arith.constant 0 : index
      %c0_88 = arith.constant 0 : index
      %168 = vector.load %arg10[%c2_86, %c0_87, %c0_88] : memref<3x16x1xf32, #tpu.memory_space<vmem>>, vector<1x16x1xf32>
      %169 = vector.shape_cast %168 : vector<1x16x1xf32> to vector<16x1xf32>
      %170 = math.tanh %167 : vector<16x2xf32>
      %171 = vector.broadcast %169 : vector<16x1xf32> to vector<16x2xf32>
      %172 = arith.mulf %171, %170 : vector<16x2xf32>
      %173 = arith.addf %167, %172 : vector<16x2xf32>
      %c3 = arith.constant 3 : index
      %c0_89 = arith.constant 0 : index
      %c0_90 = arith.constant 0 : index
      %174 = vector.load %arg8[%c3, %c0_89, %c0_90] : memref<4x16x1xf32, #tpu.memory_space<vmem>>, vector<1x16x1xf32>
      %175 = vector.shape_cast %174 : vector<1x16x1xf32> to vector<16x1xf32>
      %176 = vector.broadcast %175 : vector<16x1xf32> to vector<16x2xf32>
      %177 = arith.mulf %176, %173 : vector<16x2xf32>
      %c3_91 = arith.constant 3 : index
      %c0_92 = arith.constant 0 : index
      %c0_93 = arith.constant 0 : index
      %178 = vector.load %arg9[%c3_91, %c0_92, %c0_93] : memref<4x16x1xf32, #tpu.memory_space<vmem>>, vector<1x16x1xf32>
      %179 = vector.shape_cast %178 : vector<1x16x1xf32> to vector<16x1xf32>
      %180 = vector.broadcast %179 : vector<16x1xf32> to vector<16x2xf32>
      %181 = arith.addf %177, %180 : vector<16x2xf32>
      %cst_94 = arith.constant 0.000000e+00 : f32
      %182 = vector.broadcast %cst_94 : f32 to vector<16x2xf32>
      %183 = arith.subf %182, %181 : vector<16x2xf32>
      %184 = math.exp %183 : vector<16x2xf32>
      %cst_95 = arith.constant 1.000000e+00 : f32
      %185 = vector.broadcast %cst_95 : f32 to vector<16x2xf32>
      %186 = arith.addf %185, %184 : vector<16x2xf32>
      %cst_96 = arith.constant 1.000000e+00 : f32
      %187 = vector.broadcast %cst_96 : f32 to vector<16x2xf32>
      %188 = arith.divf %187, %186 : vector<16x2xf32>
      %cst_97 = arith.constant 5.000000e-01 : f32
      %189 = vector.broadcast %cst_97 : f32 to vector<16x2xf32>
      %190 = arith.subf %129, %189 : vector<16x2xf32>
      %c0_98 = arith.constant 0 : index
      %c0_99 = arith.constant 0 : index
      %c0_100 = arith.constant 0 : index
      %191 = vector.load %arg8[%c0_98, %c0_99, %c0_100] : memref<4x16x1xf32, #tpu.memory_space<vmem>>, vector<1x16x1xf32>
      %192 = vector.shape_cast %191 : vector<1x16x1xf32> to vector<16x1xf32>
      %193 = vector.broadcast %192 : vector<16x1xf32> to vector<16x2xf32>
      %194 = arith.mulf %193, %190 : vector<16x2xf32>
      %c0_101 = arith.constant 0 : index
      %c0_102 = arith.constant 0 : index
      %c0_103 = arith.constant 0 : index
      %195 = vector.load %arg9[%c0_101, %c0_102, %c0_103] : memref<4x16x1xf32, #tpu.memory_space<vmem>>, vector<1x16x1xf32>
      %196 = vector.shape_cast %195 : vector<1x16x1xf32> to vector<16x1xf32>
      %197 = vector.broadcast %196 : vector<16x1xf32> to vector<16x2xf32>
      %198 = arith.addf %194, %197 : vector<16x2xf32>
      %c0_104 = arith.constant 0 : index
      %c0_105 = arith.constant 0 : index
      %c0_106 = arith.constant 0 : index
      %199 = vector.load %arg10[%c0_104, %c0_105, %c0_106] : memref<3x16x1xf32, #tpu.memory_space<vmem>>, vector<1x16x1xf32>
      %200 = vector.shape_cast %199 : vector<1x16x1xf32> to vector<16x1xf32>
      %201 = math.tanh %198 : vector<16x2xf32>
      %202 = vector.broadcast %200 : vector<16x1xf32> to vector<16x2xf32>
      %203 = arith.mulf %202, %201 : vector<16x2xf32>
      %204 = arith.addf %198, %203 : vector<16x2xf32>
      %c1_107 = arith.constant 1 : index
      %c0_108 = arith.constant 0 : index
      %c0_109 = arith.constant 0 : index
      %205 = vector.load %arg8[%c1_107, %c0_108, %c0_109] : memref<4x16x1xf32, #tpu.memory_space<vmem>>, vector<1x16x1xf32>
      %206 = vector.shape_cast %205 : vector<1x16x1xf32> to vector<16x1xf32>
      %207 = vector.broadcast %206 : vector<16x1xf32> to vector<16x2xf32>
      %208 = arith.mulf %207, %204 : vector<16x2xf32>
      %c1_110 = arith.constant 1 : index
      %c0_111 = arith.constant 0 : index
      %c0_112 = arith.constant 0 : index
      %209 = vector.load %arg9[%c1_110, %c0_111, %c0_112] : memref<4x16x1xf32, #tpu.memory_space<vmem>>, vector<1x16x1xf32>
      %210 = vector.shape_cast %209 : vector<1x16x1xf32> to vector<16x1xf32>
      %211 = vector.broadcast %210 : vector<16x1xf32> to vector<16x2xf32>
      %212 = arith.addf %208, %211 : vector<16x2xf32>
      %c1_113 = arith.constant 1 : index
      %c0_114 = arith.constant 0 : index
      %c0_115 = arith.constant 0 : index
      %213 = vector.load %arg10[%c1_113, %c0_114, %c0_115] : memref<3x16x1xf32, #tpu.memory_space<vmem>>, vector<1x16x1xf32>
      %214 = vector.shape_cast %213 : vector<1x16x1xf32> to vector<16x1xf32>
      %215 = math.tanh %212 : vector<16x2xf32>
      %216 = vector.broadcast %214 : vector<16x1xf32> to vector<16x2xf32>
      %217 = arith.mulf %216, %215 : vector<16x2xf32>
      %218 = arith.addf %212, %217 : vector<16x2xf32>
      %c2_116 = arith.constant 2 : index
      %c0_117 = arith.constant 0 : index
      %c0_118 = arith.constant 0 : index
      %219 = vector.load %arg8[%c2_116, %c0_117, %c0_118] : memref<4x16x1xf32, #tpu.memory_space<vmem>>, vector<1x16x1xf32>
      %220 = vector.shape_cast %219 : vector<1x16x1xf32> to vector<16x1xf32>
      %221 = vector.broadcast %220 : vector<16x1xf32> to vector<16x2xf32>
      %222 = arith.mulf %221, %218 : vector<16x2xf32>
      %c2_119 = arith.constant 2 : index
      %c0_120 = arith.constant 0 : index
      %c0_121 = arith.constant 0 : index
      %223 = vector.load %arg9[%c2_119, %c0_120, %c0_121] : memref<4x16x1xf32, #tpu.memory_space<vmem>>, vector<1x16x1xf32>
      %224 = vector.shape_cast %223 : vector<1x16x1xf32> to vector<16x1xf32>
      %225 = vector.broadcast %224 : vector<16x1xf32> to vector<16x2xf32>
      %226 = arith.addf %222, %225 : vector<16x2xf32>
      %c2_122 = arith.constant 2 : index
      %c0_123 = arith.constant 0 : index
      %c0_124 = arith.constant 0 : index
      %227 = vector.load %arg10[%c2_122, %c0_123, %c0_124] : memref<3x16x1xf32, #tpu.memory_space<vmem>>, vector<1x16x1xf32>
      %228 = vector.shape_cast %227 : vector<1x16x1xf32> to vector<16x1xf32>
      %229 = math.tanh %226 : vector<16x2xf32>
      %230 = vector.broadcast %228 : vector<16x1xf32> to vector<16x2xf32>
      %231 = arith.mulf %230, %229 : vector<16x2xf32>
      %232 = arith.addf %226, %231 : vector<16x2xf32>
      %c3_125 = arith.constant 3 : index
      %c0_126 = arith.constant 0 : index
      %c0_127 = arith.constant 0 : index
      %233 = vector.load %arg8[%c3_125, %c0_126, %c0_127] : memref<4x16x1xf32, #tpu.memory_space<vmem>>, vector<1x16x1xf32>
      %234 = vector.shape_cast %233 : vector<1x16x1xf32> to vector<16x1xf32>
      %235 = vector.broadcast %234 : vector<16x1xf32> to vector<16x2xf32>
      %236 = arith.mulf %235, %232 : vector<16x2xf32>
      %c3_128 = arith.constant 3 : index
      %c0_129 = arith.constant 0 : index
      %c0_130 = arith.constant 0 : index
      %237 = vector.load %arg9[%c3_128, %c0_129, %c0_130] : memref<4x16x1xf32, #tpu.memory_space<vmem>>, vector<1x16x1xf32>
      %238 = vector.shape_cast %237 : vector<1x16x1xf32> to vector<16x1xf32>
      %239 = vector.broadcast %238 : vector<16x1xf32> to vector<16x2xf32>
      %240 = arith.addf %236, %239 : vector<16x2xf32>
      %cst_131 = arith.constant 0.000000e+00 : f32
      %241 = vector.broadcast %cst_131 : f32 to vector<16x2xf32>
      %242 = arith.subf %241, %240 : vector<16x2xf32>
      %243 = math.exp %242 : vector<16x2xf32>
      %cst_132 = arith.constant 1.000000e+00 : f32
      %244 = vector.broadcast %cst_132 : f32 to vector<16x2xf32>
      %245 = arith.addf %244, %243 : vector<16x2xf32>
      %cst_133 = arith.constant 1.000000e+00 : f32
      %246 = vector.broadcast %cst_133 : f32 to vector<16x2xf32>
      %247 = arith.divf %246, %245 : vector<16x2xf32>
      %248 = arith.subf %188, %247 : vector<16x2xf32>
      %cst_134 = arith.constant 9.99999971E-10 : f32
      %249 = vector.broadcast %cst_134 : f32 to vector<16x2xf32>
      %250 = arith.maximumf %248, %249 : vector<16x2xf32>
      %251 = math.log %250 : vector<16x2xf32>
      %cst_135 = arith.constant 0.000000e+00 : f32
      %252 = vector.broadcast %cst_135 : f32 to vector<16x2xf32>
      %253 = arith.subf %252, %251 : vector<16x2xf32>
      %cst_136 = arith.constant 1.44269502 : f32
      %254 = vector.broadcast %cst_136 : f32 to vector<16x2xf32>
      %255 = arith.mulf %253, %254 : vector<16x2xf32>
      %cst_137 = arith.constant 0.000000e+00 : f32
      %cst_138 = arith.constant 5.000000e+01 : f32
      %256 = vector.broadcast %cst_137 : f32 to vector<16x2xf32>
      %257 = arith.maximumf %256, %255 : vector<16x2xf32>
      %258 = vector.broadcast %cst_138 : f32 to vector<16x2xf32>
      %259 = arith.minimumf %258, %257 : vector<16x2xf32>
      %260 = vector.shape_cast %259 : vector<16x2xf32> to vector<1x16x2xf32>
      %cst_139 = arith.constant dense<0.000000e+00> : vector<1xf32>
      %261 = vector.multi_reduction <add>, %260, %cst_139 [1, 2] : vector<1x16x2xf32> to vector<1xf32>
      %262 = vector.shape_cast %261 : vector<1xf32> to vector<1x1x1xf32>
      %263 = vector.extract %262[0, 0, 0] : f32 from vector<1x1x1xf32>
      %264 = tpu.iota {dimensions = array<i32: 1>} : vector<8x128xi32>
      %c1_i32 = arith.constant 1 : i32
      %265 = vector.broadcast %c1_i32 : i32 to vector<8x128xi32>
      %266 = arith.cmpi eq, %264, %265 : vector<8x128xi32>
      %c2_i32 = arith.constant 2 : i32
      %267 = vector.broadcast %c2_i32 : i32 to vector<8x128xi32>
      %268 = arith.cmpi eq, %264, %267 : vector<8x128xi32>
      %cst_140 = arith.constant 0.000000e+00 : f32
      %269 = vector.broadcast %263 : f32 to vector<8x128xf32>
      %270 = vector.broadcast %cst_140 : f32 to vector<8x128xf32>
      %271 = arith.select %268, %269, %270 : vector<8x128xi1>, vector<8x128xf32>
      %272 = vector.broadcast %128 : f32 to vector<8x128xf32>
      %273 = arith.select %266, %272, %271 : vector<8x128xi1>, vector<8x128xf32>
      %c0_141 = arith.constant 0 : index
      %c0_142 = arith.constant 0 : index
      %274 = vector.load %arg13[%c0_141, %c0_142] : memref<8x128xf32, #tpu.memory_space<vmem>>, vector<8x128xf32>
      tpu.vector_store %arg13[%c0_141, %c0_142], %273 {strides = array<i32>} : memref<8x128xf32, #tpu.memory_space<vmem>>, vector<8x128xf32>,
    } else {
    }
    %c0_i32_13 = arith.constant 0 : i32
    %17 = arith.cmpi eq, %arg1, %c0_i32_13 : i32
    %18 = arith.extui %17 : i1 to i32
    %c0_i32_14 = arith.constant 0 : i32
    %19 = arith.cmpi ne, %18, %c0_i32_14 : i32
    scf.if %19 {
      %20 = tpu.iota {dimensions = array<i32: 1>} : vector<8x128xi32>
      %c0_i32_15 = arith.constant 0 : i32
      %21 = vector.broadcast %c0_i32_15 : i32 to vector<8x128xi32>
      %22 = arith.cmpi eq, %20, %21 : vector<8x128xi32>
      %c0_16 = arith.constant 0 : index
      %c0_17 = arith.constant 0 : index
      %23 = vector.load %arg12[%c0_16, %c0_17] : memref<24x512xf32, #tpu.memory_space<vmem>>, vector<24x512xf32>
      %24 = vector.shape_cast %23 : vector<24x512xf32> to vector<1x24x512xf32>
      %cst = arith.constant dense<0.000000e+00> : vector<1xf32>
      %25 = vector.multi_reduction <add>, %24, %cst [1, 2] : vector<1x24x512xf32> to vector<1xf32>
      %26 = vector.shape_cast %25 : vector<1xf32> to vector<1x1x1xf32>
      %27 = vector.extract %26[0, 0, 0] : f32 from vector<1x1x1xf32>
      %c0_18 = arith.constant 0 : index
      %c0_19 = arith.constant 0 : index
      %28 = vector.load %arg13[%c0_18, %c0_19] : memref<8x128xf32, #tpu.memory_space<vmem>>, vector<8x128xf32>
      %29 = vector.broadcast %27 : f32 to vector<8x128xf32>
      %30 = arith.select %22, %29, %28 : vector<8x128xi1>, vector<8x128xf32>
      %c0_20 = arith.constant 0 : index
      %c0_21 = arith.constant 0 : index
      %c0_22 = arith.constant 0 : index
      %31 = vector.load %arg11[%c0_20, %c0_21, %c0_22] : memref<1x8x128xf32, #tpu.memory_space<vmem>>, vector<1x8x128xf32>
      %32 = vector.shape_cast %31 : vector<1x8x128xf32> to vector<8x128xf32>
      %33 = vector.shape_cast %30 : vector<8x128xf32> to vector<1x8x128xf32>
      tpu.vector_store %arg11[%c0_20, %c0_21, %c0_22], %33 {strides = array<i32>} : memref<1x8x128xf32, #tpu.memory_space<vmem>>, vector<1x8x128xf32>,
    } else {
    }
    return
  }
  func.func @transform_0(%arg0: i32, %arg1: i32) -> (i32, i32, i32) {
    %c0_i32 = arith.constant 0 : i32
    %c0_i32_0 = arith.constant 0 : i32
    return %arg0, %arg1, %c0_i32 : i32, i32, i32
  }
  func.func @transform_1(%arg0: i32, %arg1: i32) -> (i32, i32, i32) {
    %c0_i32 = arith.constant 0 : i32
    %c0_i32_0 = arith.constant 0 : i32
    return %arg0, %arg1, %c0_i32 : i32, i32, i32
  }
  func.func @transform_2(%arg0: i32, %arg1: i32) -> (i32, i32) {
    %c0_i32 = arith.constant 0 : i32
    %c0_i32_0 = arith.constant 0 : i32
    %c0_i32_1 = arith.constant 0 : i32
    return %c0_i32, %c0_i32_0 : i32, i32
  }
  func.func @transform_3(%arg0: i32, %arg1: i32) -> (i32, i32) {
    %c0_i32 = arith.constant 0 : i32
    %c0_i32_0 = arith.constant 0 : i32
    %c0_i32_1 = arith.constant 0 : i32
    return %c0_i32, %c0_i32_0 : i32, i32
  }
  func.func @transform_4(%arg0: i32, %arg1: i32) -> (i32, i32) {
    %c0_i32 = arith.constant 0 : i32
    %c0_i32_0 = arith.constant 0 : i32
    %c0_i32_1 = arith.constant 0 : i32
    return %c0_i32, %c0_i32_0 : i32, i32
  }
  func.func @transform_5(%arg0: i32, %arg1: i32) -> (i32, i32) {
    %c0_i32 = arith.constant 0 : i32
    %c0_i32_0 = arith.constant 0 : i32
    %c0_i32_1 = arith.constant 0 : i32
    return %c0_i32, %c0_i32_0 : i32, i32
  }
  func.func @transform_6(%arg0: i32, %arg1: i32) -> (i32, i32, i32) {
    %c0_i32 = arith.constant 0 : i32
    %c0_i32_0 = arith.constant 0 : i32
    %c0_i32_1 = arith.constant 0 : i32
    %c0_i32_2 = arith.constant 0 : i32
    return %c0_i32, %c0_i32_0, %c0_i32_1 : i32, i32, i32
  }
  func.func @transform_7(%arg0: i32, %arg1: i32) -> (i32, i32, i32) {
    %c0_i32 = arith.constant 0 : i32
    %c0_i32_0 = arith.constant 0 : i32
    %c0_i32_1 = arith.constant 0 : i32
    %c0_i32_2 = arith.constant 0 : i32
    return %c0_i32, %c0_i32_0, %c0_i32_1 : i32, i32, i32
  }
  func.func @transform_8(%arg0: i32, %arg1: i32) -> (i32, i32, i32) {
    %c0_i32 = arith.constant 0 : i32
    %c0_i32_0 = arith.constant 0 : i32
    %c0_i32_1 = arith.constant 0 : i32
    %c0_i32_2 = arith.constant 0 : i32
    return %c0_i32, %c0_i32_0, %c0_i32_1 : i32, i32, i32
  }
  func.func @transform_9(%arg0: i32, %arg1: i32) -> (i32, i32, i32) {
    %c0_i32 = arith.constant 0 : i32
    %c0_i32_0 = arith.constant 0 : i32
    %c0_i32_1 = arith.constant 0 : i32
    return %arg0, %c0_i32, %c0_i32_0 : i32, i32, i32
  }
}

</mosaic_0001>

<bundles_post_ra>
// kernel: hyperprior_forward.9
= control target key start
LH: loop header
LB: loop body
LE: loop exit
PB: predicated region body
PF: predicated region fallthrough
CT: control target
= control target key end

     0   :  { %s866_s12 = smov 0   ;;  %s868_s13 = smov 0   ;;  %s1216_s0 = inlined_call_operand.vmem [shape: bf16[2,16,1024], index: 0, kind: input, shape index: {}]   ;;  %s1217_s1 = inlined_call_operand.vmem [shape: f32[16,16], index: 1, kind: input, shape index: {}]   ;;  %s1218_s2 = inlined_call_operand.vmem [shape: f32[16,1], index: 2, kind: input, shape index: {}]   ;;  %s1219_s3 = inlined_call_operand.vmem [shape: bf16[2,16,1024], index: 3, kind: output, shape index: {}]  }
   0x1   :  { %s870_s14 = smov 0  }
   0x2 LB: > { %s25_s15 = sadd.s32 1, %s839_s13  ;;  %p738_p0 = scmp.ge.s32.totalorder %s843_s14, 1  ;;  %s843_s14 = sphi %s870_s14, %s13_s14   ;;  %s839_s13 = sphi %s868_s13, %s1227_s13   ;;  %s835_s12 = sphi %s866_s12, %s1226_s12  }
   0x3   : > { %p27_p1 = scmp.ge.s32.totalorder %s25_s15, 2  ;;  %p158_p2 = scmp.lt.s32.totalorder %s843_s14, 3 }
   0x5   : > { %s1229_s15 = smov (%p27_p1, %s25_s15), 0  ;;  %p159_p3 = pnand %p738_p0, %p158_p2 }
   0x6   : > { %p191_p4 = scmp.lt.s32.totalorder (!%p159_p3), %s835_s12, 1 }
   0x7   : > { %162 = sbr.rel (%p159_p3) target bundleno = 214 (0xd6), region = 32 }
   0xc   : > { %v252_v0 = vld [vmem:[%s1218_s2] sm:$0xff]  ;;  %v845_v1 = vmov 0   ;;  %s1231_s12 = smov (!%p191_p4, %s835_s12), 1  ;;  %vm264_vm0 = vcmask 130048   ;;  %v253_v10 = vld [vmem:[%s1218_s2 + $0x8] sm:$0xff] }
   0xd   : > { %788 = vset.pattern.permute.xlu0 %v845_v1  ;;  %s761_s18 = sshll.u32 %s1231_s12, 6  ;;  %v234_v31 = vld [vmem:[%s1217_s1] sm:$0xff]  ;;  %v235_v44 = vld [vmem:[%s1217_s1 + $0x8] sm:$0xff] }
   0xe   : > { %256 = vperm.xlu0 %788, %v252_v0   ;;  %s198_s21 = scalar_lea.vmem %s1216_s0, %s761_s18  ;;  %s1052_s30 = scalar_lea.vmem %s1219_s3, %s761_s18 }
   0xf   : > { %v214_v2 = vld [vmem:[%s198_s21 + $0x20] sm:$0xff]  ;;  %v215_v3 = vld [vmem:[%s198_s21 + $0x28] sm:$0xff]  ;;  %v217_v15 = vld [vmem:[%s198_s21 + $0x38] sm:$0xff] }
  0x10   : > { %v210_v4 = vld [vmem:[%s198_s21] sm:$0xff]  ;;  %v895_v5 = vunpack.c.l.bf16 %v214_v2  ;;  %v897_v6 = vunpack.c.h.bf16 %v214_v2  ;;  %v899_v7 = vunpack.c.l.bf16 %v215_v3  ;;  %v901_v8 = vunpack.c.h.bf16 %v215_v3  ;;  %v211_v9 = vld [vmem:[%s198_s21 + $0x8] sm:$0xff]  ;;  %v216_v16 = vld [vmem:[%s198_s21 + $0x30] sm:$0xff] }
  0x11   : > { %v906_v11 = vunpack.c.l.bf16 %v210_v4  ;;  %v908_v12 = vunpack.c.h.bf16 %v210_v4  ;;  %v910_v13 = vunpack.c.l.bf16 %v211_v9  ;;  %v912_v14 = vunpack.c.h.bf16 %v211_v9  ;;  %v213_v21 = vld [vmem:[%s198_s21 + $0x18] sm:$0xff]  ;;  %v212_v22 = vld [vmem:[%s198_s21 + $0x10] sm:$0xff] }
  0x12   : > { %v244_v17 = vmul.f32 %v895_v5, %v895_v5  ;;  %v245_v18 = vmul.f32 %v897_v6, %v897_v6  ;;  %v246_v19 = vmul.f32 %v899_v7, %v899_v7  ;;  %v247_v20 = vmul.f32 %v901_v8, %v901_v8 }
  0x13   : > { %v236_v23 = vmul.f32 %v906_v11, %v906_v11  ;;  %v237_v24 = vmul.f32 %v908_v12, %v908_v12  ;;  %v238_v25 = vmul.f32 %v910_v13, %v910_v13  ;;  %v239_v26 = vmul.f32 %v912_v14, %v912_v14 }
  0x14   : > { %285 = vmatpush.msra.mxu0 %v244_v17  ;;  %308 = vmatpush.msra.mxu1 %v245_v18  ;;  %v930_v27 = vunpack.c.l.bf16 %v217_v15  ;;  %v932_v28 = vunpack.c.h.bf16 %v217_v15  ;;  %v934_v29 = vunpack.c.l.bf16 %v216_v16  ;;  %v936_v30 = vunpack.c.h.bf16 %v216_v16 }
  0x15   : > { %331 = vmatpush.msra.mxu2 %v246_v19  ;;  %354 = vmatpush.msra.mxu3 %v247_v20  ;;  %v941_v32 = vunpack.c.l.bf16 %v213_v21  ;;  %v943_v33 = vunpack.c.h.bf16 %v213_v21  ;;  %v945_v34 = vunpack.c.l.bf16 %v212_v22  ;;  %v947_v35 = vunpack.c.h.bf16 %v212_v22 }
  0x16   : > { %261 = vperm.xlu0 %788, %v253_v10   ;;  %286 = vmatpush.msra.mxu0 %v236_v23  ;;  %v250_v36 = vmul.f32 %v930_v27, %v930_v27  ;;  %v251_v37 = vmul.f32 %v932_v28, %v932_v28  ;;  %v248_v38 = vmul.f32 %v934_v29, %v934_v29 }
  0x17   : > { %309 = vmatpush.msra.mxu1 %v237_v24  ;;  %332 = vmatpush.msra.mxu2 %v238_v25  ;;  %v249_v39 = vmul.f32 %v936_v30, %v936_v30  ;;  %v242_v40 = vmul.f32 %v941_v32, %v941_v32  ;;  %v243_v41 = vmul.f32 %v943_v33, %v943_v33 }
  0x18   : > { %355 = vmatpush.msra.mxu3 %v239_v26  ;;  %743 = vmatmul.msk.f32.vlgmr.msra.gmra.mxu0 %vm264_vm0, %v234_v31  ;;  %v240_v42 = vmul.f32 %v945_v34, %v945_v34  ;;  %v241_v43 = vmul.f32 %v947_v35, %v947_v35 }
  0x19   : > { %745 = vmatmul.msk.f32.vlgmr.msra.gmra.mxu1 %vm264_vm0, %v234_v31  ;;  %747 = vmatmul.msk.f32.vlgmr.msra.gmra.mxu2 %vm264_vm0, %v234_v31 }
  0x1a   : > { %749 = vmatmul.msk.f32.vlgmr.msra.gmra.mxu3 %vm264_vm0, %v234_v31  ;;  %423 = vmatpush.msrb.mxu2 %v250_v36 }
  0x1b   : > { %446 = vmatpush.msrb.mxu3 %v251_v37  ;;  %377 = vmatpush.msrb.mxu0 %v248_v38 }
  0x1c   : > { %400 = vmatpush.msrb.mxu1 %v249_v39  ;;  %424 = vmatpush.msrb.mxu2 %v242_v40 }
  0x1d   : > { %447 = vmatpush.msrb.mxu3 %v243_v41  ;;  %378 = vmatpush.msrb.mxu0 %v240_v42 }
  0x1e   : > { %401 = vmatpush.msrb.mxu1 %v241_v43 }
  0x20   : > { %744 = vmatmul.msk.f32.gmra.mxu0 %vm264_vm0, %v235_v44 }
  0x21   : > { %746 = vmatmul.msk.f32.gmra.mxu1 %vm264_vm0, %v235_v44  ;;  %748 = vmatmul.msk.f32.gmra.mxu2 %vm264_vm0, %v235_v44 }
  0x22   : > { %750 = vmatmul.msk.f32.gmra.mxu3 %vm264_vm0, %v235_v44 }
  0x28   : > { %751 = vmatmul.msk.f32.vlgmr.msrb.gmra.mxu0 %vm264_vm0, %v234_v31 }
  0x29   : > { %753 = vmatmul.msk.f32.vlgmr.msrb.gmra.mxu1 %vm264_vm0, %v234_v31  ;;  %755 = vmatmul.msk.f32.vlgmr.msrb.gmra.mxu2 %vm264_vm0, %v234_v31 }
  0x2a   : > { %757 = vmatmul.msk.f32.vlgmr.msrb.gmra.mxu3 %vm264_vm0, %v234_v31 }
  0x30   : > { %752 = vmatmul.msk.f32.gmra.mxu0 %vm264_vm0, %v235_v44 }
  0x31   : > { %754 = vmatmul.msk.f32.gmra.mxu1 %vm264_vm0, %v235_v44  ;;  %756 = vmatmul.msk.f32.gmra.mxu2 %vm264_vm0, %v235_v44 }
  0x32   : > { %758 = vmatmul.msk.f32.gmra.mxu3 %vm264_vm0, %v235_v44 }
  0x80   : > { %v984_v45 = vpop.permute.xlu0 %256 }
  0x88   : > { %v988_v50 = vpop.permute.xlu0 %261 }
  0x95   : > { %v288_v46 = vpop.f32.mrf.mxu0 }
  0x96   : > { %v311_v47 = vpop.f32.mrf.mxu1  ;;  %v289_v48 = vadd.f32 %v288_v46, %v984_v45 }
  0x97   : > { %v312_v49 = vadd.f32 %v311_v47, %v984_v45 }
  0x98   : > { %789 = vrsqrt.f32 %v289_v48  ;;  %vm461_vm1 = vweird.f32 %v289_v48 }
  0x99   : > { %791 = vrsqrt.f32 %v312_v49  ;;  %vm471_vm3 = vweird.f32 %v312_v49 }
  0x9c   : > { %v334_v51 = vpop.f32.mrf.mxu2 }
  0x9d   : > { %v357_v52 = vpop.f32.mrf.mxu3  ;;  %v991_v53 = vadd.f32 %v334_v51, %v984_v45  ;;  %v291_v55 = vpop.f32.mrf.mxu0 }
  0x9e   : > { %v994_v54 = vadd.f32 %v357_v52, %v984_v45  ;;  %v314_v56 = vpop.f32.mrf.mxu1  ;;  %v790_v57 = vpop.eup %789  ;;  %v997_v58 = vadd.f32 %v291_v55, %v988_v50 }
  0x9f   : > { %v1000_v59 = vadd.f32 %v314_v56, %v988_v50  ;;  %v792_v60 = vpop.eup %791  ;;  %v456_v61 = vmul.f32 %v790_v57, %v289_v48  ;;  %793 = vrsqrt.f32 %v991_v53  ;;  %vm462_vm2 = vweird.f32 %v790_v57 }
  0xa0   : > { %v466_v62 = vmul.f32 %v792_v60, %v312_v49  ;;  %795 = vrsqrt.f32 %v994_v54  ;;  %vm472_vm4 = vweird.f32 %v792_v60  ;;  %vm481_vm5 = vweird.f32 %v991_v53  ;;  %vm463_vm9 = vmor %vm461_vm1, %vm462_vm2 }
  0xa1   : > { %v457_v63 = vmul.f32 %v790_v57, %v456_v61  ;;  %797 = vrsqrt.f32 %v997_v58  ;;  %vm541_vm6 = vweird.f32 %v997_v58  ;;  %vm491_vm7 = vweird.f32 %v994_v54  ;;  %vm473_vm10 = vmor %vm471_vm3, %vm472_vm4 }
  0xa2   : > { %v467_v0 = vmul.f32 %v792_v60, %v466_v62  ;;  %799 = vrsqrt.f32 %v1000_v59  ;;  %vm551_vm8 = vweird.f32 %v1000_v59 }
  0xa3   : > { %v458_v1 = vmul.f32 0.5, %v457_v63 }
  0xa4   : > { %v468_v2 = vmul.f32 0.5, %v467_v0  ;;  %v337_v3 = vpop.f32.mrf.mxu2 }
  0xa5   : > { %v1006_v4 = vpop.eup %793  ;;  %v459_v9 = vsub.f32 1.5, %v458_v1  ;;  %v1009_v10 = vadd.f32 %v337_v3, %v988_v50  ;;  %v360_v15 = vpop.f32.mrf.mxu3 }
  0xa6   : > { %v1011_v16 = vpop.eup %795  ;;  %v469_v17 = vsub.f32 1.5, %v468_v2  ;;  %v476_v18 = vmul.f32 %v1006_v4, %v991_v53  ;;  %v380_v19 = vpop.f32.mrf.mxu0  ;;  %v1032_v31 = vadd.f32 %v360_v15, %v988_v50  ;;  %vm482_vm11 = vweird.f32 %v1006_v4 }
  0xa7   : > { %v1017_v20 = vpop.eup %797  ;;  %v460_v21 = vmul.f32 %v790_v57, %v459_v9  ;;  %v486_v22 = vmul.f32 %v1011_v16, %v994_v54  ;;  %801 = vrsqrt.f32 %v1009_v10  ;;  %v1040_v39 = vadd.f32 %v380_v19, %v984_v45  ;;  %v403_v44 = vpop.f32.mrf.mxu1  ;;  %vm483_vm14 = vmor %vm481_vm5, %vm482_vm11 }
  0xa8   : > { %v1024_v23 = vpop.eup %799  ;;  %v470_v24 = vmul.f32 %v792_v60, %v469_v17  ;;  %v477_v25 = vmul.f32 %v1006_v4, %v476_v18  ;;  %v536_v26 = vmul.f32 %v1017_v20, %v997_v58  ;;  %vm492_vm12 = vweird.f32 %v1011_v16 }
  0xa9   : > { %v464_v36 = vsel %vm463_vm9, %v790_v57, %v460_v21  ;;  %v487_v37 = vmul.f32 %v1011_v16, %v486_v22  ;;  %v546_v38 = vmul.f32 %v1024_v23, %v1000_v59  ;;  %803 = vrsqrt.f32 %v1032_v31  ;;  %vm493_vm0 = vmor %vm491_vm7, %vm492_vm12 }
  0xaa   : > { %v615_v40 = vmul.f32 %v464_v36, %v906_v11  ;;  %v474_v41 = vsel %vm473_vm10, %v792_v60, %v470_v24  ;;  %v478_v42 = vmul.f32 0.5, %v477_v25  ;;  %v537_v43 = vmul.f32 %v1017_v20, %v536_v26 }
  0xab   : > { %v616_v46 = vmul.f32 %v474_v41, %v908_v12  ;;  %v488_v47 = vmul.f32 0.5, %v487_v37  ;;  %v547_v48 = vmul.f32 %v1024_v23, %v546_v38  ;;  %805 = vrsqrt.f32 %v1040_v39 }
  0xac   : > { %v479_v11 = vsub.f32 1.5, %v478_v42  ;;  %v538_v49 = vmul.f32 0.5, %v537_v43  ;;  %v426_v51 = vpop.f32.mrf.mxu2  ;;  %vm542_vm13 = vweird.f32 %v1017_v20  ;;  %vm552_vm15 = vweird.f32 %v1024_v23 }
  0xad   : > { %v1056_v12 = vpop.eup %801  ;;  %v631_v52 = vpack.c.bf16 %v616_v46, %v615_v40  ;;  %v489_v55 = vsub.f32 1.5, %v488_v47  ;;  %v548_v56 = vmul.f32 0.5, %v547_v48  ;;  %v1071_v0 = vadd.f32 %v403_v44, %v984_v45  ;;  %v449_v9 = vpop.f32.mrf.mxu3  ;;  %vm543_vm1 = vmor %vm541_vm6, %vm542_vm13 }
  0xae   : > { %v480_v57 = vmul.f32 %v1006_v4, %v479_v11  ;;  %v539_v60 = vsub.f32 1.5, %v538_v49  ;;  %v556_v61 = vmul.f32 %v1056_v12, %v1009_v10  ;;  %v1081_v3 = vadd.f32 %v426_v51, %v984_v45  ;;  %vm553_vm2 = vmor %vm551_vm8, %vm552_vm15  ;;  %v383_v26 = vpop.f32.mrf.mxu0 }
  0xaf   : > { %639 = vst [vmem:[%s1052_s30] sm:$0xff] %v631_v52  ;;  %v490_v62 = vmul.f32 %v1011_v16, %v489_v55  ;;  %v549_v63 = vsub.f32 1.5, %v548_v56  ;;  %807 = vrsqrt.f32 %v1071_v0  ;;  %v406_v59 = vpop.f32.mrf.mxu1  ;;  %vm562_vm3 = vweird.f32 %v1056_v12 }
  0xb0   : > { %v484_v1 = vsel %vm483_vm14, %v1006_v4, %v480_v57  ;;  %v540_v2 = vmul.f32 %v1017_v20, %v539_v60  ;;  %v557_v53 = vmul.f32 %v1056_v12, %v556_v61  ;;  %v804_v4 = vpop.eup %803  ;;  %809 = vrsqrt.f32 %v1081_v3 }
  0xb1   : > { %v617_v15 = vmul.f32 %v484_v1, %v910_v13  ;;  %v494_v17 = vsel %vm493_vm0, %v1011_v16, %v490_v62  ;;  %v550_v54 = vmul.f32 %v1024_v23, %v549_v63  ;;  %v1097_v16 = vpop.eup %805  ;;  %v566_v22 = vmul.f32 %v804_v4, %v1032_v31 }
  0xb2   : > { %v618_v18 = vmul.f32 %v494_v17, %v912_v14  ;;  %v544_v19 = vsel %vm543_vm1, %v1017_v20, %v540_v2  ;;  %v558_v13 = vmul.f32 0.5, %v557_v53  ;;  %v496_v20 = vmul.f32 %v1097_v16, %v1040_v39 }
  0xb3   : > { %v623_v58 = vmul.f32 %v544_v19, %v895_v5  ;;  %v554_v21 = vsel %vm553_vm2, %v1024_v23, %v550_v54  ;;  %v567_v36 = vmul.f32 %v804_v4, %v566_v22  ;;  %vm561_vm4 = vweird.f32 %v1009_v10 }
  0xb4   : > { %v632_v24 = vpack.c.bf16 %v618_v18, %v617_v15  ;;  %v624_v14 = vmul.f32 %v554_v21, %v897_v6  ;;  %v559_v25 = vsub.f32 1.5, %v558_v13  ;;  %v497_v37 = vmul.f32 %v1097_v16, %v496_v20  ;;  %v429_v38 = vpop.f32.mrf.mxu2  ;;  %vm1123_vm5 = vmor %vm561_vm4, %vm562_vm3 }
  0xb5   : > { %v1111_v6 = vadd.f32 %v449_v9, %v984_v45  ;;  %v808_v40 = vpop.eup %807  ;;  %v568_v41 = vmul.f32 0.5, %v567_v36  ;;  %v1115_v42 = vadd.f32 %v383_v26, %v988_v50  ;;  %v1118_v43 = vadd.f32 %v406_v59, %v988_v50  ;;  %v452_v51 = vpop.f32.mrf.mxu3 }
  0xb6   : > { %640 = vst [vmem:[%s1052_s30 + $0x8] sm:$0xff] %v632_v24  ;;  %v635_v5 = vpack.c.bf16 %v624_v14, %v623_v58  ;;  %v560_v23 = vmul.f32 %v1056_v12, %v559_v25  ;;  %vm572_vm6 = vweird.f32 %v804_v4  ;;  %v498_v45 = vmul.f32 0.5, %v497_v37  ;;  %v1138_v52 = vpop.eup %809 }
  0xb7   : > { %vm501_vm7 = vweird.f32 %v1040_v39  ;;  %v506_v10 = vmul.f32 %v808_v40, %v1071_v0  ;;  %v569_v47 = vsub.f32 1.5, %v568_v41  ;;  %811 = vrsqrt.f32 %v1111_v6 }
  0xb8   : > { %643 = vst [vmem:[%s1052_s30 + $0x20] sm:$0xff] %v635_v5  ;;  %v564_v46 = vsel %vm1123_vm5, %v1056_v12, %v560_v23  ;;  %v1134_v48 = vadd.f32 %v429_v38, %v988_v50  ;;  %v499_v11 = vsub.f32 1.5, %v498_v45  ;;  %vm502_vm8 = vweird.f32 %v1097_v16 }
  0xb9   : > { %v507_v49 = vmul.f32 %v808_v40, %v506_v10  ;;  %813 = vrsqrt.f32 %v1115_v42  ;;  %v570_v55 = vmul.f32 %v804_v4, %v569_v47  ;;  %vm571_vm9 = vweird.f32 %v1032_v31  ;;  %vm1152_vm12 = vmor %vm501_vm7, %vm502_vm8 }
  0xba   : > { %vm511_vm10 = vweird.f32 %v1071_v0  ;;  %815 = vrsqrt.f32 %v1118_v43  ;;  %v625_v12 = vmul.f32 %v564_v46, %v899_v7  ;;  %vm573_vm11 = vmor %vm571_vm9, %vm572_vm6  ;;  %v500_v56 = vmul.f32 %v1097_v16, %v499_v11 }
  0xbb   : > { %v508_v57 = vmul.f32 0.5, %v507_v49  ;;  %v516_v60 = vmul.f32 %v1138_v52, %v1081_v3  ;;  %v574_v61 = vsel %vm573_vm11, %v804_v4, %v570_v55  ;;  %vm512_vm13 = vweird.f32 %v808_v40 }
  0xbc   : > { %817 = vrsqrt.f32 %v1134_v48  ;;  %v1158_v7 = vadd.f32 %v452_v51, %v988_v50  ;;  %v626_v62 = vmul.f32 %v574_v61, %v901_v8  ;;  %v504_v63 = vsel %vm1152_vm12, %v1097_v16, %v500_v56  ;;  %vm513_vm14 = vmor %vm511_vm10, %vm512_vm13 }
  0xbd   : > { %v509_v1 = vsub.f32 1.5, %v508_v57  ;;  %v517_v39 = vmul.f32 %v1138_v52, %v516_v60  ;;  %v812_v2 = vpop.eup %811  ;;  %v619_v8 = vmul.f32 %v504_v63, %v945_v34  ;;  %vm522_vm15 = vweird.f32 %v1138_v52 }
  0xbe   : > { %819 = vrsqrt.f32 %v1158_v7  ;;  %v636_v9 = vpack.c.bf16 %v626_v62, %v625_v12  ;;  %v526_v50 = vmul.f32 %v812_v2, %v1111_v6  ;;  %vm521_vm0 = vweird.f32 %v1081_v3 }
  0xbf   : > { %v814_v53 = vpop.eup %813  ;;  %v510_v15 = vmul.f32 %v808_v40, %v509_v1  ;;  %v518_v17 = vmul.f32 0.5, %v517_v39  ;;  %vm1181_vm1 = vmor %vm521_vm0, %vm522_vm15  ;;  %vm531_vm2 = vweird.f32 %v1111_v6  ;;  %vm532_vm3 = vweird.f32 %v812_v2 }
  0xc0   : > { %v816_v54 = vpop.eup %815  ;;  %v576_v4 = vmul.f32 %v814_v53, %v1115_v42  ;;  %644 = vst [vmem:[%s1052_s30 + $0x28] sm:$0xff] %v636_v9  ;;  %v527_v13 = vmul.f32 %v812_v2, %v526_v50  ;;  %vm581_vm4 = vweird.f32 %v1115_v42  ;;  %vm582_vm5 = vweird.f32 %v814_v53  ;;  %vm533_vm7 = vmor %vm531_vm2, %vm532_vm3 }
  0xc1   : > { %v514_v18 = vsel %vm513_vm14, %v808_v40, %v510_v15  ;;  %v519_v19 = vsub.f32 1.5, %v518_v17  ;;  %v586_v16 = vmul.f32 %v816_v54, %v1118_v43  ;;  %vm592_vm6 = vweird.f32 %v816_v54  ;;  %vm583_vm9 = vmor %vm581_vm4, %vm582_vm5 }
  0xc2   : > { %v818_v58 = vpop.eup %817  ;;  %v620_v21 = vmul.f32 %v514_v18, %v947_v35  ;;  %v577_v34 = vmul.f32 %v814_v53, %v576_v4  ;;  %v528_v22 = vmul.f32 0.5, %v527_v13  ;;  %vm591_vm8 = vweird.f32 %v1118_v43 }
  0xc3   : > { %v520_v0 = vmul.f32 %v1138_v52, %v519_v19  ;;  %v587_v24 = vmul.f32 %v816_v54, %v586_v16  ;;  %v596_v14 = vmul.f32 %v818_v58, %v1134_v48  ;;  %vm602_vm10 = vweird.f32 %v818_v58  ;;  %vm593_vm11 = vmor %vm591_vm8, %vm592_vm6 }
  0xc4   : > { %v820_v25 = vpop.eup %819  ;;  %v633_v20 = vpack.c.bf16 %v620_v21, %v619_v8  ;;  %v578_v35 = vmul.f32 0.5, %v577_v34  ;;  %v529_v59 = vsub.f32 1.5, %v528_v22  ;;  %vm601_vm12 = vweird.f32 %v1134_v48 }
  0xc5   : > { %v524_v3 = vsel %vm1181_vm1, %v1138_v52, %v520_v0  ;;  %v588_v36 = vmul.f32 0.5, %v587_v24  ;;  %v597_v5 = vmul.f32 %v818_v58, %v596_v14  ;;  %v606_v37 = vmul.f32 %v820_v25, %v1158_v7  ;;  %vm603_vm13 = vmor %vm601_vm12, %vm602_vm10 }
  0xc6   : > { %641 = vst [vmem:[%s1052_s30 + $0x10] sm:$0xff] %v633_v20  ;;  %v579_v23 = vsub.f32 1.5, %v578_v35  ;;  %v530_v38 = vmul.f32 %v812_v2, %v529_v59  ;;  %v621_v44 = vmul.f32 %v524_v3, %v941_v32  ;;  %vm612_vm14 = vweird.f32 %v820_v25 }
  0xc7   : > { %v589_v40 = vsub.f32 1.5, %v588_v36  ;;  %v598_v41 = vmul.f32 0.5, %v597_v5  ;;  %v607_v10 = vmul.f32 %v820_v25, %v606_v37  ;;  %vm611_vm15 = vweird.f32 %v1158_v7 }
  0xc8   : > { %v580_v45 = vmul.f32 %v814_v53, %v579_v23  ;;  %v534_v46 = vsel %vm533_vm7, %v812_v2, %v530_v38  ;;  %vm613_vm0 = vmor %vm611_vm15, %vm612_vm14 }
  0xc9   : > { %v590_v42 = vmul.f32 %v816_v54, %v589_v40  ;;  %v599_v47 = vsub.f32 1.5, %v598_v41  ;;  %v622_v11 = vmul.f32 %v534_v46, %v943_v33  ;;  %v608_v51 = vmul.f32 0.5, %v607_v10 }
  0xca   : > { %v584_v49 = vsel %vm583_vm9, %v814_v53, %v580_v45 }
  0xcb   : > { %v627_v32 = vmul.f32 %v584_v49, %v934_v29  ;;  %v594_v6 = vsel %vm593_vm11, %v816_v54, %v590_v42  ;;  %v600_v52 = vmul.f32 %v818_v58, %v599_v47  ;;  %v634_v43 = vpack.c.bf16 %v622_v11, %v621_v44 }
  0xcc   : > { %v628_v55 = vmul.f32 %v594_v6, %v936_v30  ;;  %v609_v12 = vsub.f32 1.5, %v608_v51 }
  0xcd   : > { %v604_v56 = vsel %vm603_vm13, %v818_v58, %v600_v52  ;;  %642 = vst [vmem:[%s1052_s30 + $0x18] sm:$0xff] %v634_v43 }
  0xce   : > { %v637_v33 = vpack.c.bf16 %v628_v55, %v627_v32  ;;  %v610_v57 = vmul.f32 %v820_v25, %v609_v12  ;;  %v629_v29 = vmul.f32 %v604_v56, %v930_v27 }
  0xd0   : > { %645 = vst [vmem:[%s1052_s30 + $0x30] sm:$0xff] %v637_v33  ;;  %v614_v60 = vsel %vm613_vm0, %v820_v25, %v610_v57 }
  0xd1   : > { %v630_v48 = vmul.f32 %v614_v60, %v932_v28 }
  0xd3   : > { %v638_v61 = vpack.c.bf16 %v630_v48, %v629_v29 }
  0xd5   : > { %646 = vst [vmem:[%s1052_s30 + $0x38] sm:$0xff] %v638_v61 }
  0xd6 PF: > { %s13_s14 = sadd.s32 1, %s843_s14   ;;  %s1226_s12 = smov %s839_s13 }
  0xd7   : > { %p10_p5 = scmp.ge.s32.totalorder %s13_s14, 4   ;;  %s1227_s13 = smov %s1229_s15 }
  0xd9   :  { %12 = sbr.rel (!%p10_p5) target bundleno = 2 (0x2), region = 62 }

// kernel: hyperprior_forward.10
= control target key start
LH: loop header
LB: loop body
LE: loop exit
PB: predicated region body
PF: predicated region fallthrough
CT: control target
= control target key end

     0   :  { %s522_s12 = smov 0   ;;  %s524_s13 = smov 0   ;;  %s594_s0 = inlined_call_operand.vmem [shape: bf16[2,16,256], index: 0, kind: input, shape index: {}]   ;;  %s595_s1 = inlined_call_operand.vmem [shape: f32[16,16], index: 1, kind: input, shape index: {}]   ;;  %s596_s2 = inlined_call_operand.vmem [shape: f32[16,1], index: 2, kind: input, shape index: {}]   ;;  %s597_s3 = inlined_call_operand.vmem [shape: bf16[2,16,256], index: 3, kind: output, shape index: {}]  }
   0x1   :  { %s526_s14 = smov 0  }
   0x2 LB: > { %s25_s15 = sadd.s32 1, %s495_s13  ;;  %p426_p0 = scmp.ge.s32.totalorder %s499_s14, 1  ;;  %s499_s14 = sphi %s526_s14, %s13_s14   ;;  %s495_s13 = sphi %s524_s13, %s599_s13   ;;  %s491_s12 = sphi %s522_s12, %s598_s12  }
   0x3   : > { %p27_p1 = scmp.ge.s32.totalorder %s25_s15, 2  ;;  %p158_p2 = scmp.lt.s32.totalorder %s499_s14, 3 }
   0x5   : > { %s601_s15 = smov (%p27_p1, %s25_s15), 0  ;;  %p159_p3 = pnand %p426_p0, %p158_p2 }
   0x6   : > { %p191_p4 = scmp.lt.s32.totalorder (!%p159_p3), %s491_s12, 1 }
   0x7   : > { %162 = sbr.rel (%p159_p3) target bundleno = 183 (0xb7), region = 32 }
   0xc   : > { %v222_v0 = vld [vmem:[%s596_s2] sm:$0xff]  ;;  %v501_v1 = vmov 0   ;;  %s603_s12 = smov (!%p191_p4, %s491_s12), 1  ;;  %v223_v8 = vld [vmem:[%s596_s2 + $0x8] sm:$0xff]  ;;  %vm234_vm0 = vcmask 130048  }
   0xd   : > { %468 = vset.pattern.permute.xlu0 %v501_v1  ;;  %s437_s18 = sshll.u32 %s603_s12, 4  ;;  %v216_v13 = vld [vmem:[%s595_s1] sm:$0xff]  ;;  %v217_v14 = vld [vmem:[%s595_s1 + $0x8] sm:$0xff] }
   0xe   : > { %226 = vperm.xlu0 %468, %v222_v0   ;;  %s198_s21 = scalar_lea.vmem %s594_s0, %s437_s18  ;;  %s208_s30 = scalar_lea.vmem %s597_s3, %s437_s18 }
   0xf   : > { %v211_v2 = vld [vmem:[%s198_s21 + $0x8] sm:$0xff]  ;;  %v210_v3 = vld [vmem:[%s198_s21] sm:$0xff] }
  0x10   : > { %v551_v4 = vunpack.c.l.bf16 %v211_v2  ;;  %v553_v5 = vunpack.c.h.bf16 %v211_v2  ;;  %v555_v6 = vunpack.c.l.bf16 %v210_v3  ;;  %v557_v7 = vunpack.c.h.bf16 %v210_v3 }
  0x12   : > { %v220_v9 = vmul.f32 %v551_v4, %v551_v4  ;;  %v221_v10 = vmul.f32 %v553_v5, %v553_v5  ;;  %v218_v11 = vmul.f32 %v555_v6, %v555_v6  ;;  %v219_v12 = vmul.f32 %v557_v7, %v557_v7 }
  0x14   : > { %255 = vmatpush.msra.mxu0 %v220_v9  ;;  %439 = vmatpush.msra.mxu2 %v220_v9 }
  0x15   : > { %278 = vmatpush.msra.mxu1 %v221_v10  ;;  %441 = vmatpush.msra.mxu3 %v221_v10 }
  0x16   : > { %231 = vperm.xlu0 %468, %v223_v8   ;;  %256 = vmatpush.msra.mxu0 %v218_v11 }
  0x17   : > { %440 = vmatpush.msra.mxu2 %v218_v11  ;;  %279 = vmatpush.msra.mxu1 %v219_v12 }
  0x18   : > { %442 = vmatpush.msra.mxu3 %v219_v12  ;;  %431 = vmatmul.msk.f32.vlgmr.msra.gmra.mxu0 %vm234_vm0, %v216_v13 }
  0x19   : > { %432 = vmatmul.msk.f32.vlgmr.msra.gmra.mxu2 %vm234_vm0, %v217_v14  ;;  %433 = vmatmul.msk.f32.vlgmr.msra.gmra.mxu1 %vm234_vm0, %v216_v13 }
  0x1a   : > { %434 = vmatmul.msk.f32.vlgmr.msra.gmra.mxu3 %vm234_vm0, %v217_v14 }
  0x80   : > { %v227_v15 = vpop.permute.xlu0 %226 }
  0x88   : > { %v232_v20 = vpop.permute.xlu0 %231 }
  0x95   : > { %v258_v16 = vpop.f32.mrf.mxu0 }
  0x96   : > { %v259_v17 = vadd.f32 %v258_v16, %v227_v15  ;;  %v281_v18 = vpop.f32.mrf.mxu1 }
  0x97   : > { %v282_v19 = vadd.f32 %v281_v18, %v227_v15 }
  0x98   : > { %469 = vrsqrt.f32 %v259_v17  ;;  %vm293_vm3 = vweird.f32 %v259_v17 }
  0x99   : > { %471 = vrsqrt.f32 %v282_v19  ;;  %vm303_vm5 = vweird.f32 %v282_v19 }
  0x9c   : > { %v261_v21 = vpop.f32.mrf.mxu2 }
  0x9d   : > { %v262_v22 = vadd.f32 %v261_v21, %v232_v20  ;;  %v284_v23 = vpop.f32.mrf.mxu3 }
  0x9e   : > { %v285_v24 = vadd.f32 %v284_v23, %v232_v20  ;;  %v470_v25 = vpop.eup %469 }
  0x9f   : > { %473 = vrsqrt.f32 %v262_v22  ;;  %v472_v26 = vpop.eup %471  ;;  %v288_v27 = vmul.f32 %v470_v25, %v259_v17  ;;  %vm294_vm1 = vweird.f32 %v470_v25  ;;  %vm313_vm9 = vweird.f32 %v262_v22 }
  0xa0   : > { %475 = vrsqrt.f32 %v285_v24  ;;  %v298_v28 = vmul.f32 %v472_v26, %v282_v19  ;;  %vm304_vm2 = vweird.f32 %v472_v26  ;;  %vm295_vm4 = vmor %vm293_vm3, %vm294_vm1  ;;  %vm323_vm11 = vweird.f32 %v285_v24 }
  0xa1   : > { %v289_v29 = vmul.f32 %v470_v25, %v288_v27  ;;  %vm305_vm6 = vmor %vm303_vm5, %vm304_vm2 }
  0xa2   : > { %v299_v30 = vmul.f32 %v472_v26, %v298_v28 }
  0xa3   : > { %v290_v31 = vmul.f32 0.5, %v289_v29 }
  0xa4   : > { %v300_v33 = vmul.f32 0.5, %v299_v30 }
  0xa5   : > { %v474_v32 = vpop.eup %473  ;;  %v291_v35 = vsub.f32 1.5, %v290_v31 }
  0xa6   : > { %v476_v34 = vpop.eup %475  ;;  %v308_v36 = vmul.f32 %v474_v32, %v262_v22  ;;  %v301_v37 = vsub.f32 1.5, %v300_v33  ;;  %vm314_vm7 = vweird.f32 %v474_v32 }
  0xa7   : > { %v318_v38 = vmul.f32 %v476_v34, %v285_v24  ;;  %v292_v39 = vmul.f32 %v470_v25, %v291_v35  ;;  %vm324_vm8 = vweird.f32 %v476_v34  ;;  %vm315_vm10 = vmor %vm313_vm9, %vm314_vm7 }
  0xa8   : > { %v309_v40 = vmul.f32 %v474_v32, %v308_v36  ;;  %v302_v41 = vmul.f32 %v472_v26, %v301_v37  ;;  %vm325_vm12 = vmor %vm323_vm11, %vm324_vm8 }
  0xa9   : > { %v319_v42 = vmul.f32 %v476_v34, %v318_v38  ;;  %v296_v43 = vsel %vm295_vm4, %v470_v25, %v292_v39 }
  0xaa   : > { %v310_v44 = vmul.f32 0.5, %v309_v40  ;;  %v327_v45 = vmul.f32 %v296_v43, %v555_v6  ;;  %v306_v46 = vsel %vm305_vm6, %v472_v26, %v302_v41 }
  0xab   : > { %v320_v47 = vmul.f32 0.5, %v319_v42  ;;  %v328_v48 = vmul.f32 %v306_v46, %v557_v7 }
  0xac   : > { %v311_v49 = vsub.f32 1.5, %v310_v44 }
  0xad   : > { %v321_v50 = vsub.f32 1.5, %v320_v47  ;;  %v331_v51 = vpack.c.bf16 %v328_v48, %v327_v45 }
  0xae   : > { %v312_v52 = vmul.f32 %v474_v32, %v311_v49 }
  0xaf   : > { %v322_v53 = vmul.f32 %v476_v34, %v321_v50  ;;  %333 = vst [vmem:[%s208_s30] sm:$0xff] %v331_v51 }
  0xb0   : > { %v316_v54 = vsel %vm315_vm10, %v474_v32, %v312_v52 }
  0xb1   : > { %v329_v55 = vmul.f32 %v316_v54, %v551_v4  ;;  %v326_v56 = vsel %vm325_vm12, %v476_v34, %v322_v53 }
  0xb2   : > { %v330_v57 = vmul.f32 %v326_v56, %v553_v5 }
  0xb4   : > { %v332_v58 = vpack.c.bf16 %v330_v57, %v329_v55 }
  0xb6   : > { %334 = vst [vmem:[%s208_s30 + $0x8] sm:$0xff] %v332_v58 }
  0xb7 PF: > { %s13_s14 = sadd.s32 1, %s499_s14   ;;  %s598_s12 = smov %s495_s13 }
  0xb8   : > { %p10_p5 = scmp.ge.s32.totalorder %s13_s14, 4   ;;  %s599_s13 = smov %s601_s15 }
  0xba   :  { %12 = sbr.rel (!%p10_p5) target bundleno = 2 (0x2), region = 62 }

// kernel: hyperprior_forward.11
= control target key start
LH: loop header
LB: loop body
LE: loop exit
PB: predicated region body
PF: predicated region fallthrough
CT: control target
= control target key end

     0   :  { %s458_s12 = smov 0   ;;  %s460_s13 = smov 0   ;;  %s510_s0 = inlined_call_operand.vmem [shape: bf16[2,16,64], index: 0, kind: input, shape index: {}]   ;;  %s511_s1 = inlined_call_operand.vmem [shape: f32[16,16], index: 1, kind: input, shape index: {}]   ;;  %s512_s2 = inlined_call_operand.vmem [shape: f32[16,1], index: 2, kind: input, shape index: {}]   ;;  %s513_s3 = inlined_call_operand.vmem [shape: bf16[2,16,64], index: 3, kind: output, shape index: {}]  }
   0x1   :  { %s462_s14 = smov 0  }
   0x2 LB: > { %s25_s15 = sadd.s32 1, %s431_s13  ;;  %p366_p0 = scmp.ge.s32.totalorder %s435_s14, 1  ;;  %s435_s14 = sphi %s462_s14, %s13_s14   ;;  %s431_s13 = sphi %s460_s13, %s515_s13   ;;  %s427_s12 = sphi %s458_s12, %s514_s12  }
   0x3   : > { %p27_p1 = scmp.ge.s32.totalorder %s25_s15, 2  ;;  %p156_p2 = scmp.lt.s32.totalorder %s435_s14, 3 }
   0x5   : > { %s517_s15 = smov (%p27_p1, %s25_s15), 0  ;;  %p157_p3 = pnand %p366_p0, %p156_p2 }
   0x6   : > { %p186_p4 = scmp.lt.s32.totalorder (!%p157_p3), %s427_s12, 1 }
   0x7   : > { %160 = sbr.rel (%p157_p3) target bundleno = 175 (0xaf), region = 32 }
   0xc   : > { %v210_v0 = vld [vmem:[%s512_s2] sm:$0xff]  ;;  %v437_v1 = vmov 0   ;;  %s519_s12 = smov (!%p186_p4, %s427_s12), 1  ;;  %v211_v5 = vld [vmem:[%s512_s2 + $0x8] sm:$0xff]  ;;  %vm222_vm0 = vcmask 130048   ;;  %vm276_vm7 = vcmask 519168  }
   0xd   : > { %408 = vset.pattern.permute.xlu0 %v437_v1  ;;  %s375_s18 = sshll.u32 %s519_s12, 3  ;;  %v206_v8 = vld [vmem:[%s511_s1] sm:$0xff]  ;;  %v207_v9 = vld [vmem:[%s511_s1 + $0x8] sm:$0xff] }
   0xe   : > { %214 = vperm.xlu0 %408, %v210_v0   ;;  %s193_s21 = scalar_lea.vmem %s510_s0, %s375_s18  ;;  %s201_s30 = scalar_lea.vmem %s513_s3, %s375_s18 }
   0xf   : > { %v378_v2 = vld [vmem:[%s193_s21] sm:$0xff]  }
  0x10   : > { %v380_v3 = vunpack.c.h.bf16 %v378_v2  ;;  %v379_v4 = vunpack.c.l.bf16 %v378_v2 }
  0x12   : > { %v209_v6 = vmul.f32 %v380_v3, %v380_v3  ;;  %v208_v7 = vmul.f32 %v379_v4, %v379_v4 }
  0x14   : > { %243 = vmatpush.msra.mxu0 %v209_v6  ;;  %381 = vmatpush.msra.mxu1 %v209_v6 }
  0x16   : > { %219 = vperm.xlu0 %408, %v211_v5   ;;  %244 = vmatpush.msra.mxu0 %v208_v7 }
  0x17   : > { %382 = vmatpush.msra.mxu1 %v208_v7  ;;  %371 = vmatmul.msk.f32.vlgmr.msra.gmra.mxu0 %vm222_vm0, %v206_v8 }
  0x18   : > { %372 = vmatmul.msk.f32.vlgmr.msra.gmra.mxu1 %vm222_vm0, %v207_v9 }
  0x80   : > { %v215_v10 = vpop.permute.xlu0 %214 }
  0x88   : > { %v220_v11 = vpop.permute.xlu0 %219 }
  0x94   : > { %v246_v12 = vpop.f32.mrf.mxu0 }
  0x95   : > { %v249_v13 = vpop.f32.mrf.mxu1  ;;  %v247_v14 = vadd.f32 %v246_v12, %v215_v10 }
  0x96   : > { %v250_v15 = vadd.f32 %v249_v13, %v220_v11 }
  0x97   : > { %409 = vrsqrt.f32 %v247_v14  ;;  %vm258_vm3 = vweird.f32 %v247_v14 }
  0x98   : > { %411 = vrsqrt.f32 %v250_v15  ;;  %vm268_vm5 = vweird.f32 %v250_v15 }
  0x9d   : > { %v410_v16 = vpop.eup %409 }
  0x9e   : > { %v412_v17 = vpop.eup %411  ;;  %v253_v18 = vmul.f32 %v410_v16, %v247_v14  ;;  %vm259_vm1 = vweird.f32 %v410_v16 }
  0x9f   : > { %v263_v19 = vmul.f32 %v412_v17, %v250_v15  ;;  %vm269_vm2 = vweird.f32 %v412_v17  ;;  %vm260_vm4 = vmor %vm258_vm3, %vm259_vm1 }
  0xa0   : > { %v254_v20 = vmul.f32 %v410_v16, %v253_v18  ;;  %vm270_vm6 = vmor %vm268_vm5, %vm269_vm2 }
  0xa1   : > { %v264_v21 = vmul.f32 %v412_v17, %v263_v19 }
  0xa2   : > { %v255_v22 = vmul.f32 0.5, %v254_v20 }
  0xa3   : > { %v265_v23 = vmul.f32 0.5, %v264_v21 }
  0xa4   : > { %v256_v24 = vsub.f32 1.5, %v255_v22 }
  0xa5   : > { %v266_v25 = vsub.f32 1.5, %v265_v23 }
  0xa6   : > { %v257_v26 = vmul.f32 %v410_v16, %v256_v24 }
  0xa7   : > { %v267_v27 = vmul.f32 %v412_v17, %v266_v25 }
  0xa8   : > { %v261_v28 = vsel %vm260_vm4, %v410_v16, %v257_v26 }
  0xa9   : > { %v272_v29 = vmul.f32 %v379_v4, %v261_v28  ;;  %v271_v30 = vsel %vm270_vm6, %v412_v17, %v267_v27 }
  0xaa   : > { %v273_v31 = vmul.f32 %v380_v3, %v271_v30 }
  0xab   : > { %v274_v32 = vpack.c.bf16 %v272_v29, %v272_v29 }
  0xac   : > { %v275_v33 = vpack.c.bf16 %v273_v31, %v273_v31 }
  0xad   : > { %277 = vst.msk [vmem:[%s201_s30] sm:$0xf] %vm276_vm7, %v274_v32 }
  0xae   : > { %278 = vst.msk [vmem:[%s201_s30 + $0x4] sm:$0xf] %vm276_vm7, %v275_v33 }
  0xaf PF: > { %s13_s14 = sadd.s32 1, %s435_s14   ;;  %s514_s12 = smov %s431_s13 }
  0xb0   : > { %p10_p5 = scmp.ge.s32.totalorder %s13_s14, 4   ;;  %s515_s13 = smov %s517_s15 }
  0xb2   :  { %12 = sbr.rel (!%p10_p5) target bundleno = 2 (0x2), region = 62 }

// kernel: reverse.1
= control target key start
LH: loop header
LB: loop body
LE: loop exit
PB: predicated region body
PF: predicated region fallthrough
CT: control target
= control target key end

     0   :  { %s608_s0 = inlined_call_operand.vmem [shape: bf16[16,16,5,5], index: 0, kind: input, shape index: {}]   ;;  %s609_s1 = inlined_call_operand.vmem [shape: bf16[16,16,5,5], index: 1, kind: output, shape index: {}]  }
   0x1   :  { %v350_v0 = vld [vmem:[%s608_s0 + $0xc0] sm:$0xff]   ;;  %v351_v1 = vld [vmem:[%s608_s0 + $0x98] sm:$0xff]   ;;  %v353_v2 = vld [vmem:[%s608_s0 + $0x70] sm:$0xff]  }
   0x2   :  { %7 = vst [vmem:[%s609_s1] sm:$0xff] %v350_v0   ;;  %v355_v3 = vld [vmem:[%s608_s0 + $0x48] sm:$0xff]   ;;  %v357_v4 = vld [vmem:[%s608_s0 + $0x20] sm:$0xff]   ;;  %v359_v5 = vld [vmem:[%s608_s0 + $0xb8] sm:$0xff]  }
   0x3   :  { %352 = vst [vmem:[%s609_s1 + $0x28] sm:$0xff] %v351_v1   ;;  %v361_v6 = vld [vmem:[%s608_s0 + $0x90] sm:$0xff]   ;;  %v363_v7 = vld [vmem:[%s608_s0 + $0x68] sm:$0xff]   ;;  %v365_v8 = vld [vmem:[%s608_s0 + $0x40] sm:$0xff]  }
   0x4   :  { %354 = vst [vmem:[%s609_s1 + $0x50] sm:$0xff] %v353_v2   ;;  %v367_v9 = vld [vmem:[%s608_s0 + $0x18] sm:$0xff]   ;;  %v369_v10 = vld [vmem:[%s608_s0 + $0xb0] sm:$0xff]   ;;  %v371_v11 = vld [vmem:[%s608_s0 + $0x88] sm:$0xff]  }
   0x5   :  { %356 = vst [vmem:[%s609_s1 + $0x78] sm:$0xff] %v355_v3   ;;  %v373_v12 = vld [vmem:[%s608_s0 + $0x60] sm:$0xff]   ;;  %v375_v13 = vld [vmem:[%s608_s0 + $0x38] sm:$0xff]   ;;  %v377_v14 = vld [vmem:[%s608_s0 + $0x10] sm:$0xff]  }
   0x6   :  { %358 = vst [vmem:[%s609_s1 + $0xa0] sm:$0xff] %v357_v4   ;;  %v379_v15 = vld [vmem:[%s608_s0 + $0xa8] sm:$0xff]   ;;  %v381_v16 = vld [vmem:[%s608_s0 + $0x80] sm:$0xff]   ;;  %v383_v17 = vld [vmem:[%s608_s0 + $0x58] sm:$0xff]  }
   0x7   :  { %360 = vst [vmem:[%s609_s1 + $0x8] sm:$0xff] %v359_v5   ;;  %v385_v18 = vld [vmem:[%s608_s0 + $0x30] sm:$0xff]   ;;  %v387_v19 = vld [vmem:[%s608_s0 + $0x8] sm:$0xff]   ;;  %v389_v20 = vld [vmem:[%s608_s0 + $0xa0] sm:$0xff]  }
   0x8   :  { %362 = vst [vmem:[%s609_s1 + $0x30] sm:$0xff] %v361_v6   ;;  %v391_v21 = vld [vmem:[%s608_s0 + $0x78] sm:$0xff]   ;;  %v393_v22 = vld [vmem:[%s608_s0 + $0x50] sm:$0xff]   ;;  %v395_v23 = vld [vmem:[%s608_s0 + $0x28] sm:$0xff]  }
   0x9   :  { %364 = vst [vmem:[%s609_s1 + $0x58] sm:$0xff] %v363_v7   ;;  %v169_v24 = vld [vmem:[%s608_s0] sm:$0xff]  }
   0xa   :  { %366 = vst [vmem:[%s609_s1 + $0x80] sm:$0xff] %v365_v8  }
   0xb   :  { %368 = vst [vmem:[%s609_s1 + $0xa8] sm:$0xff] %v367_v9  }
   0xc   :  { %370 = vst [vmem:[%s609_s1 + $0x10] sm:$0xff] %v369_v10  }
   0xd   :  { %372 = vst [vmem:[%s609_s1 + $0x38] sm:$0xff] %v371_v11  }
   0xe   :  { %374 = vst [vmem:[%s609_s1 + $0x60] sm:$0xff] %v373_v12  }
   0xf   :  { %376 = vst [vmem:[%s609_s1 + $0x88] sm:$0xff] %v375_v13  }
  0x10   :  { %378 = vst [vmem:[%s609_s1 + $0xb0] sm:$0xff] %v377_v14  }
  0x11   :  { %380 = vst [vmem:[%s609_s1 + $0x18] sm:$0xff] %v379_v15  }
  0x12   :  { %382 = vst [vmem:[%s609_s1 + $0x40] sm:$0xff] %v381_v16  }
  0x13   :  { %384 = vst [vmem:[%s609_s1 + $0x68] sm:$0xff] %v383_v17  }
  0x14   :  { %386 = vst [vmem:[%s609_s1 + $0x90] sm:$0xff] %v385_v18  }
  0x15   :  { %388 = vst [vmem:[%s609_s1 + $0xb8] sm:$0xff] %v387_v19  }
  0x16   :  { %390 = vst [vmem:[%s609_s1 + $0x20] sm:$0xff] %v389_v20  }
  0x17   :  { %392 = vst [vmem:[%s609_s1 + $0x48] sm:$0xff] %v391_v21  }
  0x18   :  { %394 = vst [vmem:[%s609_s1 + $0x70] sm:$0xff] %v393_v22  }
  0x19   :  { %396 = vst [vmem:[%s609_s1 + $0x98] sm:$0xff] %v395_v23  }
  0x1a   :  { %397 = vst [vmem:[%s609_s1 + $0xc0] sm:$0xff] %v169_v24  }

// kernel: reverse
= control target key start
LH: loop header
LB: loop body
LE: loop exit
PB: predicated region body
PF: predicated region fallthrough
CT: control target
= control target key end

     0   :  { %s608_s0 = inlined_call_operand.vmem [shape: bf16[24,16,5,5], index: 0, kind: input, shape index: {}]   ;;  %s609_s1 = inlined_call_operand.vmem [shape: bf16[24,16,5,5], index: 1, kind: output, shape index: {}]  }
   0x1   :  { %v350_v0 = vld [vmem:[%s608_s0 + $0xc0] sm:$0xff]   ;;  %v351_v1 = vld [vmem:[%s608_s0 + $0x98] sm:$0xff]   ;;  %v353_v2 = vld [vmem:[%s608_s0 + $0x70] sm:$0xff]  }
   0x2   :  { %7 = vst [vmem:[%s609_s1] sm:$0xff] %v350_v0   ;;  %v355_v3 = vld [vmem:[%s608_s0 + $0x48] sm:$0xff]   ;;  %v357_v4 = vld [vmem:[%s608_s0 + $0x20] sm:$0xff]   ;;  %v359_v5 = vld [vmem:[%s608_s0 + $0xb8] sm:$0xff]  }
   0x3   :  { %352 = vst [vmem:[%s609_s1 + $0x28] sm:$0xff] %v351_v1   ;;  %v361_v6 = vld [vmem:[%s608_s0 + $0x90] sm:$0xff]   ;;  %v363_v7 = vld [vmem:[%s608_s0 + $0x68] sm:$0xff]   ;;  %v365_v8 = vld [vmem:[%s608_s0 + $0x40] sm:$0xff]  }
   0x4   :  { %354 = vst [vmem:[%s609_s1 + $0x50] sm:$0xff] %v353_v2   ;;  %v367_v9 = vld [vmem:[%s608_s0 + $0x18] sm:$0xff]   ;;  %v369_v10 = vld [vmem:[%s608_s0 + $0xb0] sm:$0xff]   ;;  %v371_v11 = vld [vmem:[%s608_s0 + $0x88] sm:$0xff]  }
   0x5   :  { %356 = vst [vmem:[%s609_s1 + $0x78] sm:$0xff] %v355_v3   ;;  %v373_v12 = vld [vmem:[%s608_s0 + $0x60] sm:$0xff]   ;;  %v375_v13 = vld [vmem:[%s608_s0 + $0x38] sm:$0xff]   ;;  %v377_v14 = vld [vmem:[%s608_s0 + $0x10] sm:$0xff]  }
   0x6   :  { %358 = vst [vmem:[%s609_s1 + $0xa0] sm:$0xff] %v357_v4   ;;  %v379_v15 = vld [vmem:[%s608_s0 + $0xa8] sm:$0xff]   ;;  %v381_v16 = vld [vmem:[%s608_s0 + $0x80] sm:$0xff]   ;;  %v383_v17 = vld [vmem:[%s608_s0 + $0x58] sm:$0xff]  }
   0x7   :  { %360 = vst [vmem:[%s609_s1 + $0x8] sm:$0xff] %v359_v5   ;;  %v385_v18 = vld [vmem:[%s608_s0 + $0x30] sm:$0xff]   ;;  %v387_v19 = vld [vmem:[%s608_s0 + $0x8] sm:$0xff]   ;;  %v389_v20 = vld [vmem:[%s608_s0 + $0xa0] sm:$0xff]  }
   0x8   :  { %362 = vst [vmem:[%s609_s1 + $0x30] sm:$0xff] %v361_v6   ;;  %v391_v21 = vld [vmem:[%s608_s0 + $0x78] sm:$0xff]   ;;  %v393_v22 = vld [vmem:[%s608_s0 + $0x50] sm:$0xff]   ;;  %v395_v23 = vld [vmem:[%s608_s0 + $0x28] sm:$0xff]  }
   0x9   :  { %364 = vst [vmem:[%s609_s1 + $0x58] sm:$0xff] %v363_v7   ;;  %v169_v24 = vld [vmem:[%s608_s0] sm:$0xff]  }
   0xa   :  { %366 = vst [vmem:[%s609_s1 + $0x80] sm:$0xff] %v365_v8  }
   0xb   :  { %368 = vst [vmem:[%s609_s1 + $0xa8] sm:$0xff] %v367_v9  }
   0xc   :  { %370 = vst [vmem:[%s609_s1 + $0x10] sm:$0xff] %v369_v10  }
   0xd   :  { %372 = vst [vmem:[%s609_s1 + $0x38] sm:$0xff] %v371_v11  }
   0xe   :  { %374 = vst [vmem:[%s609_s1 + $0x60] sm:$0xff] %v373_v12  }
   0xf   :  { %376 = vst [vmem:[%s609_s1 + $0x88] sm:$0xff] %v375_v13  }
  0x10   :  { %378 = vst [vmem:[%s609_s1 + $0xb0] sm:$0xff] %v377_v14  }
  0x11   :  { %380 = vst [vmem:[%s609_s1 + $0x18] sm:$0xff] %v379_v15  }
  0x12   :  { %382 = vst [vmem:[%s609_s1 + $0x40] sm:$0xff] %v381_v16  }
  0x13   :  { %384 = vst [vmem:[%s609_s1 + $0x68] sm:$0xff] %v383_v17  }
  0x14   :  { %386 = vst [vmem:[%s609_s1 + $0x90] sm:$0xff] %v385_v18  }
  0x15   :  { %388 = vst [vmem:[%s609_s1 + $0xb8] sm:$0xff] %v387_v19  }
  0x16   :  { %390 = vst [vmem:[%s609_s1 + $0x20] sm:$0xff] %v389_v20  }
  0x17   :  { %392 = vst [vmem:[%s609_s1 + $0x48] sm:$0xff] %v391_v21  }
  0x18   :  { %394 = vst [vmem:[%s609_s1 + $0x70] sm:$0xff] %v393_v22  }
  0x19   :  { %396 = vst [vmem:[%s609_s1 + $0x98] sm:$0xff] %v395_v23  }
  0x1a   :  { %397 = vst [vmem:[%s609_s1 + $0xc0] sm:$0xff] %v169_v24  }

// kernel: hyperprior_forward.12
= control target key start
LH: loop header
LB: loop body
LE: loop exit
PB: predicated region body
PF: predicated region fallthrough
CT: control target
= control target key end

     0   :  { %s462_s12 = smov 0   ;;  %s464_s13 = smov 0   ;;  %s514_s0 = inlined_call_operand.vmem [shape: bf16[2,16,64], index: 0, kind: input, shape index: {}]   ;;  %s515_s1 = inlined_call_operand.vmem [shape: f32[16,16], index: 1, kind: input, shape index: {}]   ;;  %s516_s2 = inlined_call_operand.vmem [shape: f32[16,1], index: 2, kind: input, shape index: {}]   ;;  %s517_s3 = inlined_call_operand.vmem [shape: bf16[2,16,64], index: 3, kind: output, shape index: {}]  }
   0x1   :  { %s466_s14 = smov 0  }
   0x2 LB: > { %s25_s15 = sadd.s32 1, %s435_s13  ;;  %p370_p0 = scmp.ge.s32.totalorder %s439_s14, 1  ;;  %s439_s14 = sphi %s466_s14, %s13_s14   ;;  %s435_s13 = sphi %s464_s13, %s519_s13   ;;  %s431_s12 = sphi %s462_s12, %s518_s12  }
   0x3   : > { %p27_p1 = scmp.ge.s32.totalorder %s25_s15, 2  ;;  %p156_p2 = scmp.lt.s32.totalorder %s439_s14, 3 }
   0x5   : > { %s521_s15 = smov (%p27_p1, %s25_s15), 0  ;;  %p157_p3 = pnand %p370_p0, %p156_p2 }
   0x6   : > { %p186_p4 = scmp.lt.s32.totalorder (!%p157_p3), %s431_s12, 1 }
   0x7   : > { %160 = sbr.rel (%p157_p3) target bundleno = 178 (0xb2), region = 32 }
   0xc   : > { %v210_v0 = vld [vmem:[%s516_s2] sm:$0xff]  ;;  %v441_v1 = vmov 0   ;;  %s523_s12 = smov (!%p186_p4, %s431_s12), 1  ;;  %v211_v5 = vld [vmem:[%s516_s2 + $0x8] sm:$0xff]  ;;  %vm222_vm0 = vcmask 130048   ;;  %vm280_vm5 = vcmask 519168  }
   0xd   : > { %412 = vset.pattern.permute.xlu0 %v441_v1  ;;  %s379_s18 = sshll.u32 %s523_s12, 3  ;;  %v206_v8 = vld [vmem:[%s515_s1] sm:$0xff]  ;;  %v207_v9 = vld [vmem:[%s515_s1 + $0x8] sm:$0xff] }
   0xe   : > { %214 = vperm.xlu0 %412, %v210_v0   ;;  %s193_s21 = scalar_lea.vmem %s514_s0, %s379_s18  ;;  %s201_s30 = scalar_lea.vmem %s517_s3, %s379_s18 }
   0xf   : > { %v382_v2 = vld [vmem:[%s193_s21] sm:$0xff]  }
  0x10   : > { %v384_v3 = vunpack.c.h.bf16 %v382_v2  ;;  %v383_v4 = vunpack.c.l.bf16 %v382_v2 }
  0x12   : > { %v209_v6 = vmul.f32 %v384_v3, %v384_v3  ;;  %v208_v7 = vmul.f32 %v383_v4, %v383_v4 }
  0x14   : > { %243 = vmatpush.msra.mxu0 %v209_v6  ;;  %385 = vmatpush.msra.mxu1 %v209_v6 }
  0x16   : > { %219 = vperm.xlu0 %412, %v211_v5   ;;  %244 = vmatpush.msra.mxu0 %v208_v7 }
  0x17   : > { %386 = vmatpush.msra.mxu1 %v208_v7  ;;  %375 = vmatmul.msk.f32.vlgmr.msra.gmra.mxu0 %vm222_vm0, %v206_v8 }
  0x18   : > { %376 = vmatmul.msk.f32.vlgmr.msra.gmra.mxu1 %vm222_vm0, %v207_v9 }
  0x80   : > { %v215_v10 = vpop.permute.xlu0 %214 }
  0x88   : > { %v220_v11 = vpop.permute.xlu0 %219 }
  0x94   : > { %v246_v12 = vpop.f32.mrf.mxu0 }
  0x95   : > { %v249_v13 = vpop.f32.mrf.mxu1  ;;  %v247_v14 = vadd.f32 %v246_v12, %v215_v10 }
  0x96   : > { %v250_v15 = vadd.f32 %v249_v13, %v220_v11 }
  0x97   : > { %413 = vrsqrt.f32 %v247_v14  ;;  %vm259_vm1 = vcmp.eq.f32.partialorder %v247_v14, inf  ;;  %v262_v29 = vand.u32 2147483648, %v247_v14  ;;  %vm261_vm2 = vcmp.eq.f32.partialorder %v247_v14, 0.0 }
  0x98   : > { %415 = vrsqrt.f32 %v250_v15  ;;  %vm271_vm3 = vcmp.eq.f32.partialorder %v250_v15, inf  ;;  %v274_v32 = vand.u32 2147483648, %v250_v15  ;;  %vm273_vm4 = vcmp.eq.f32.partialorder %v250_v15, 0.0 }
  0x9d   : > { %v414_v16 = vpop.eup %413 }
  0x9e   : > { %v416_v17 = vpop.eup %415  ;;  %v253_v18 = vmul.f32 %v414_v16, %v247_v14 }
  0x9f   : > { %v265_v19 = vmul.f32 %v416_v17, %v250_v15 }
  0xa0   : > { %v254_v20 = vmul.f32 %v414_v16, %v253_v18 }
  0xa1   : > { %v266_v21 = vmul.f32 %v416_v17, %v265_v19 }
  0xa2   : > { %v255_v22 = vmul.f32 0.5, %v254_v20 }
  0xa3   : > { %v267_v23 = vmul.f32 0.5, %v266_v21 }
  0xa4   : > { %v256_v24 = vsub.f32 1.5, %v255_v22 }
  0xa5   : > { %v268_v25 = vsub.f32 1.5, %v267_v23 }
  0xa6   : > { %v257_v26 = vmul.f32 %v414_v16, %v256_v24 }
  0xa7   : > { %v269_v27 = vmul.f32 %v416_v17, %v268_v25 }
  0xa8   : > { %v258_v28 = vmul.f32 %v257_v26, %v247_v14 }
  0xa9   : > { %v270_v30 = vmul.f32 %v269_v27, %v250_v15 }
  0xaa   : > { %v260_v31 = vsel %vm259_vm1, %v247_v14, %v258_v28 }
  0xab   : > { %v263_v33 = vsel %vm261_vm2, %v262_v29, %v260_v31  ;;  %v272_v34 = vsel %vm271_vm3, %v250_v15, %v270_v30 }
  0xac   : > { %v276_v35 = vmul.f32 %v383_v4, %v263_v33  ;;  %v275_v36 = vsel %vm273_vm4, %v274_v32, %v272_v34 }
  0xad   : > { %v277_v37 = vmul.f32 %v384_v3, %v275_v36 }
  0xae   : > { %v278_v38 = vpack.c.bf16 %v276_v35, %v276_v35 }
  0xaf   : > { %v279_v39 = vpack.c.bf16 %v277_v37, %v277_v37 }
  0xb0   : > { %281 = vst.msk [vmem:[%s201_s30] sm:$0xf] %vm280_vm5, %v278_v38 }
  0xb1   : > { %282 = vst.msk [vmem:[%s201_s30 + $0x4] sm:$0xf] %vm280_vm5, %v279_v39 }
  0xb2 PF: > { %s13_s14 = sadd.s32 1, %s439_s14   ;;  %s518_s12 = smov %s435_s13 }
  0xb3   : > { %p10_p5 = scmp.ge.s32.totalorder %s13_s14, 4   ;;  %s519_s13 = smov %s521_s15 }
  0xb5   :  { %12 = sbr.rel (!%p10_p5) target bundleno = 2 (0x2), region = 62 }

// kernel: hyperprior_forward.13
= control target key start
LH: loop header
LB: loop body
LE: loop exit
PB: predicated region body
PF: predicated region fallthrough
CT: control target
= control target key end

     0   :  { %s530_s12 = smov 0   ;;  %s532_s13 = smov 0   ;;  %s602_s0 = inlined_call_operand.vmem [shape: bf16[2,16,256], index: 0, kind: input, shape index: {}]   ;;  %s603_s1 = inlined_call_operand.vmem [shape: f32[16,16], index: 1, kind: input, shape index: {}]   ;;  %s604_s2 = inlined_call_operand.vmem [shape: f32[16,1], index: 2, kind: input, shape index: {}]   ;;  %s605_s3 = inlined_call_operand.vmem [shape: bf16[2,16,256], index: 3, kind: output, shape index: {}]  }
   0x1   :  { %s534_s14 = smov 0  }
   0x2 LB: > { %s25_s15 = sadd.s32 1, %s503_s13  ;;  %p434_p0 = scmp.ge.s32.totalorder %s507_s14, 1  ;;  %s507_s14 = sphi %s534_s14, %s13_s14   ;;  %s503_s13 = sphi %s532_s13, %s607_s13   ;;  %s499_s12 = sphi %s530_s12, %s606_s12  }
   0x3   : > { %p27_p1 = scmp.ge.s32.totalorder %s25_s15, 2  ;;  %p158_p2 = scmp.lt.s32.totalorder %s507_s14, 3 }
   0x5   : > { %s609_s15 = smov (%p27_p1, %s25_s15), 0  ;;  %p159_p3 = pnand %p434_p0, %p158_p2 }
   0x6   : > { %p191_p4 = scmp.lt.s32.totalorder (!%p159_p3), %s499_s12, 1 }
   0x7   : > { %162 = sbr.rel (%p159_p3) target bundleno = 186 (0xba), region = 32 }
   0xc   : > { %v222_v0 = vld [vmem:[%s604_s2] sm:$0xff]  ;;  %v509_v1 = vmov 0   ;;  %s611_s12 = smov (!%p191_p4, %s499_s12), 1  ;;  %v223_v8 = vld [vmem:[%s604_s2 + $0x8] sm:$0xff]  ;;  %vm234_vm0 = vcmask 130048  }
   0xd   : > { %476 = vset.pattern.permute.xlu0 %v509_v1  ;;  %s445_s18 = sshll.u32 %s611_s12, 4  ;;  %v216_v13 = vld [vmem:[%s603_s1] sm:$0xff]  ;;  %v217_v14 = vld [vmem:[%s603_s1 + $0x8] sm:$0xff] }
   0xe   : > { %226 = vperm.xlu0 %476, %v222_v0   ;;  %s198_s21 = scalar_lea.vmem %s602_s0, %s445_s18  ;;  %s208_s30 = scalar_lea.vmem %s605_s3, %s445_s18 }
   0xf   : > { %v211_v2 = vld [vmem:[%s198_s21 + $0x8] sm:$0xff]  ;;  %v210_v3 = vld [vmem:[%s198_s21] sm:$0xff] }
  0x10   : > { %v559_v4 = vunpack.c.l.bf16 %v211_v2  ;;  %v561_v5 = vunpack.c.h.bf16 %v211_v2  ;;  %v563_v6 = vunpack.c.l.bf16 %v210_v3  ;;  %v565_v7 = vunpack.c.h.bf16 %v210_v3 }
  0x12   : > { %v220_v9 = vmul.f32 %v559_v4, %v559_v4  ;;  %v221_v10 = vmul.f32 %v561_v5, %v561_v5  ;;  %v218_v11 = vmul.f32 %v563_v6, %v563_v6  ;;  %v219_v12 = vmul.f32 %v565_v7, %v565_v7 }
  0x14   : > { %255 = vmatpush.msra.mxu0 %v220_v9  ;;  %447 = vmatpush.msra.mxu2 %v220_v9 }
  0x15   : > { %278 = vmatpush.msra.mxu1 %v221_v10  ;;  %449 = vmatpush.msra.mxu3 %v221_v10 }
  0x16   : > { %231 = vperm.xlu0 %476, %v223_v8   ;;  %256 = vmatpush.msra.mxu0 %v218_v11 }
  0x17   : > { %448 = vmatpush.msra.mxu2 %v218_v11  ;;  %279 = vmatpush.msra.mxu1 %v219_v12 }
  0x18   : > { %450 = vmatpush.msra.mxu3 %v219_v12  ;;  %439 = vmatmul.msk.f32.vlgmr.msra.gmra.mxu0 %vm234_vm0, %v216_v13 }
  0x19   : > { %440 = vmatmul.msk.f32.vlgmr.msra.gmra.mxu2 %vm234_vm0, %v217_v14  ;;  %441 = vmatmul.msk.f32.vlgmr.msra.gmra.mxu1 %vm234_vm0, %v216_v13 }
  0x1a   : > { %442 = vmatmul.msk.f32.vlgmr.msra.gmra.mxu3 %vm234_vm0, %v217_v14 }
  0x80   : > { %v227_v15 = vpop.permute.xlu0 %226 }
  0x88   : > { %v232_v20 = vpop.permute.xlu0 %231 }
  0x95   : > { %v258_v16 = vpop.f32.mrf.mxu0 }
  0x96   : > { %v259_v17 = vadd.f32 %v258_v16, %v227_v15  ;;  %v281_v18 = vpop.f32.mrf.mxu1 }
  0x97   : > { %v282_v19 = vadd.f32 %v281_v18, %v227_v15 }
  0x98   : > { %477 = vrsqrt.f32 %v259_v17  ;;  %vm294_vm1 = vcmp.eq.f32.partialorder %v259_v17, inf  ;;  %vm296_vm2 = vcmp.eq.f32.partialorder %v259_v17, 0.0  ;;  %v297_v45 = vand.u32 2147483648, %v259_v17 }
  0x99   : > { %479 = vrsqrt.f32 %v282_v19  ;;  %vm306_vm3 = vcmp.eq.f32.partialorder %v282_v19, inf  ;;  %v309_v49 = vand.u32 2147483648, %v282_v19  ;;  %vm308_vm4 = vcmp.eq.f32.partialorder %v282_v19, 0.0 }
  0x9c   : > { %v261_v21 = vpop.f32.mrf.mxu2 }
  0x9d   : > { %v262_v22 = vadd.f32 %v261_v21, %v232_v20  ;;  %v284_v23 = vpop.f32.mrf.mxu3 }
  0x9e   : > { %v285_v24 = vadd.f32 %v284_v23, %v232_v20  ;;  %v478_v25 = vpop.eup %477 }
  0x9f   : > { %481 = vrsqrt.f32 %v262_v22  ;;  %v480_v26 = vpop.eup %479  ;;  %v288_v27 = vmul.f32 %v478_v25, %v259_v17  ;;  %vm318_vm5 = vcmp.eq.f32.partialorder %v262_v22, inf  ;;  %v321_v61 = vand.u32 2147483648, %v262_v22 }
  0xa0   : > { %483 = vrsqrt.f32 %v285_v24  ;;  %v300_v28 = vmul.f32 %v480_v26, %v282_v19  ;;  %vm320_vm6 = vcmp.eq.f32.partialorder %v262_v22, 0.0  ;;  %vm330_vm7 = vcmp.eq.f32.partialorder %v285_v24, inf }
  0xa1   : > { %v289_v29 = vmul.f32 %v478_v25, %v288_v27  ;;  %v333_v0 = vand.u32 2147483648, %v285_v24  ;;  %vm332_vm8 = vcmp.eq.f32.partialorder %v285_v24, 0.0 }
  0xa2   : > { %v301_v30 = vmul.f32 %v480_v26, %v300_v28 }
  0xa3   : > { %v290_v31 = vmul.f32 0.5, %v289_v29 }
  0xa4   : > { %v302_v33 = vmul.f32 0.5, %v301_v30 }
  0xa5   : > { %v482_v32 = vpop.eup %481  ;;  %v291_v35 = vsub.f32 1.5, %v290_v31 }
  0xa6   : > { %v484_v34 = vpop.eup %483  ;;  %v312_v36 = vmul.f32 %v482_v32, %v262_v22  ;;  %v303_v37 = vsub.f32 1.5, %v302_v33 }
  0xa7   : > { %v324_v38 = vmul.f32 %v484_v34, %v285_v24  ;;  %v292_v39 = vmul.f32 %v478_v25, %v291_v35 }
  0xa8   : > { %v313_v40 = vmul.f32 %v482_v32, %v312_v36  ;;  %v304_v41 = vmul.f32 %v480_v26, %v303_v37 }
  0xa9   : > { %v325_v42 = vmul.f32 %v484_v34, %v324_v38  ;;  %v293_v43 = vmul.f32 %v292_v39, %v259_v17 }
  0xaa   : > { %v314_v44 = vmul.f32 0.5, %v313_v40  ;;  %v305_v46 = vmul.f32 %v304_v41, %v282_v19 }
  0xab   : > { %v326_v47 = vmul.f32 0.5, %v325_v42  ;;  %v295_v48 = vsel %vm294_vm1, %v259_v17, %v293_v43 }
  0xac   : > { %v315_v50 = vsub.f32 1.5, %v314_v44  ;;  %v298_v51 = vsel %vm296_vm2, %v297_v45, %v295_v48  ;;  %v307_v52 = vsel %vm306_vm3, %v282_v19, %v305_v46 }
  0xad   : > { %v327_v53 = vsub.f32 1.5, %v326_v47  ;;  %v335_v54 = vmul.f32 %v298_v51, %v563_v6  ;;  %v310_v55 = vsel %vm308_vm4, %v309_v49, %v307_v52 }
  0xae   : > { %v316_v56 = vmul.f32 %v482_v32, %v315_v50  ;;  %v336_v57 = vmul.f32 %v310_v55, %v565_v7 }
  0xaf   : > { %v328_v58 = vmul.f32 %v484_v34, %v327_v53 }
  0xb0   : > { %v317_v59 = vmul.f32 %v316_v56, %v262_v22  ;;  %v339_v60 = vpack.c.bf16 %v336_v57, %v335_v54 }
  0xb1   : > { %v329_v62 = vmul.f32 %v328_v58, %v285_v24 }
  0xb2   : > { %v319_v63 = vsel %vm318_vm5, %v262_v22, %v317_v59  ;;  %341 = vst [vmem:[%s208_s30] sm:$0xff] %v339_v60 }
  0xb3   : > { %v322_v1 = vsel %vm320_vm6, %v321_v61, %v319_v63  ;;  %v331_v2 = vsel %vm330_vm7, %v285_v24, %v329_v62 }
  0xb4   : > { %v337_v3 = vmul.f32 %v322_v1, %v559_v4  ;;  %v334_v6 = vsel %vm332_vm8, %v333_v0, %v331_v2 }
  0xb5   : > { %v338_v7 = vmul.f32 %v334_v6, %v561_v5 }
  0xb7   : > { %v340_v8 = vpack.c.bf16 %v338_v7, %v337_v3 }
  0xb9   : > { %342 = vst [vmem:[%s208_s30 + $0x8] sm:$0xff] %v340_v8 }
  0xba PF: > { %s13_s14 = sadd.s32 1, %s507_s14   ;;  %s606_s12 = smov %s503_s13 }
  0xbb   : > { %p10_p5 = scmp.ge.s32.totalorder %s13_s14, 4   ;;  %s607_s13 = smov %s609_s15 }
  0xbd   :  { %12 = sbr.rel (!%p10_p5) target bundleno = 2 (0x2), region = 62 }

// kernel: hyperprior_forward.14
= control target key start
LH: loop header
LB: loop body
LE: loop exit
PB: predicated region body
PF: predicated region fallthrough
CT: control target
= control target key end

     0   :  { %s898_s12 = smov 0   ;;  %s900_s13 = smov 0   ;;  %s1258_s0 = inlined_call_operand.vmem [shape: bf16[2,16,1024], index: 0, kind: input, shape index: {}]   ;;  %s1259_s1 = inlined_call_operand.vmem [shape: f32[16,16], index: 1, kind: input, shape index: {}]   ;;  %s1260_s2 = inlined_call_operand.vmem [shape: f32[16,1], index: 2, kind: input, shape index: {}]   ;;  %s1261_s3 = inlined_call_operand.vmem [shape: bf16[2,16,1024], index: 3, kind: output, shape index: {}]  }
   0x1   :  { %s902_s14 = smov 0  }
   0x2 LB: > { %s25_s15 = sadd.s32 1, %s871_s13  ;;  %p770_p0 = scmp.ge.s32.totalorder %s875_s14, 1  ;;  %s875_s14 = sphi %s902_s14, %s13_s14   ;;  %s871_s13 = sphi %s900_s13, %s1263_s13   ;;  %s867_s12 = sphi %s898_s12, %s1262_s12  }
   0x3   : > { %p27_p1 = scmp.ge.s32.totalorder %s25_s15, 2  ;;  %p158_p2 = scmp.lt.s32.totalorder %s875_s14, 3 }
   0x5   : > { %s1265_s15 = smov (%p27_p1, %s25_s15), 0  ;;  %p159_p3 = pnand %p770_p0, %p158_p2 }
   0x6   : > { %p191_p4 = scmp.lt.s32.totalorder (!%p159_p3), %s867_s12, 1 }
   0x7   : > { %162 = sbr.rel (%p159_p3) target bundleno = 222 (0xde), region = 32 }
   0xc   : > { %v252_v0 = vld [vmem:[%s1260_s2] sm:$0xff]  ;;  %v877_v1 = vmov 0   ;;  %s1267_s12 = smov (!%p191_p4, %s867_s12), 1  ;;  %vm264_vm0 = vcmask 130048   ;;  %v253_v10 = vld [vmem:[%s1260_s2 + $0x8] sm:$0xff] }
   0xd   : > { %820 = vset.pattern.permute.xlu0 %v877_v1  ;;  %s793_s18 = sshll.u32 %s1267_s12, 6  ;;  %v234_v31 = vld [vmem:[%s1259_s1] sm:$0xff]  ;;  %v235_v44 = vld [vmem:[%s1259_s1 + $0x8] sm:$0xff] }
   0xe   : > { %256 = vperm.xlu0 %820, %v252_v0   ;;  %s198_s21 = scalar_lea.vmem %s1258_s0, %s793_s18  ;;  %s1096_s30 = scalar_lea.vmem %s1261_s3, %s793_s18 }
   0xf   : > { %v214_v2 = vld [vmem:[%s198_s21 + $0x20] sm:$0xff]  ;;  %v215_v3 = vld [vmem:[%s198_s21 + $0x28] sm:$0xff]  ;;  %v217_v15 = vld [vmem:[%s198_s21 + $0x38] sm:$0xff] }
  0x10   : > { %v210_v4 = vld [vmem:[%s198_s21] sm:$0xff]  ;;  %v927_v5 = vunpack.c.l.bf16 %v214_v2  ;;  %v929_v6 = vunpack.c.h.bf16 %v214_v2  ;;  %v931_v7 = vunpack.c.l.bf16 %v215_v3  ;;  %v933_v8 = vunpack.c.h.bf16 %v215_v3  ;;  %v211_v9 = vld [vmem:[%s198_s21 + $0x8] sm:$0xff]  ;;  %v216_v16 = vld [vmem:[%s198_s21 + $0x30] sm:$0xff] }
  0x11   : > { %v938_v11 = vunpack.c.l.bf16 %v210_v4  ;;  %v940_v12 = vunpack.c.h.bf16 %v210_v4  ;;  %v942_v13 = vunpack.c.l.bf16 %v211_v9  ;;  %v944_v14 = vunpack.c.h.bf16 %v211_v9  ;;  %v213_v21 = vld [vmem:[%s198_s21 + $0x18] sm:$0xff]  ;;  %v212_v22 = vld [vmem:[%s198_s21 + $0x10] sm:$0xff] }
  0x12   : > { %v244_v17 = vmul.f32 %v927_v5, %v927_v5  ;;  %v245_v18 = vmul.f32 %v929_v6, %v929_v6  ;;  %v246_v19 = vmul.f32 %v931_v7, %v931_v7  ;;  %v247_v20 = vmul.f32 %v933_v8, %v933_v8 }
  0x13   : > { %v236_v23 = vmul.f32 %v938_v11, %v938_v11  ;;  %v237_v24 = vmul.f32 %v940_v12, %v940_v12  ;;  %v238_v25 = vmul.f32 %v942_v13, %v942_v13  ;;  %v239_v26 = vmul.f32 %v944_v14, %v944_v14 }
  0x14   : > { %285 = vmatpush.msra.mxu0 %v244_v17  ;;  %308 = vmatpush.msra.mxu1 %v245_v18  ;;  %v962_v27 = vunpack.c.l.bf16 %v217_v15  ;;  %v964_v28 = vunpack.c.h.bf16 %v217_v15  ;;  %v966_v29 = vunpack.c.l.bf16 %v216_v16  ;;  %v968_v30 = vunpack.c.h.bf16 %v216_v16 }
  0x15   : > { %331 = vmatpush.msra.mxu2 %v246_v19  ;;  %354 = vmatpush.msra.mxu3 %v247_v20  ;;  %v973_v32 = vunpack.c.l.bf16 %v213_v21  ;;  %v975_v33 = vunpack.c.h.bf16 %v213_v21  ;;  %v977_v34 = vunpack.c.l.bf16 %v212_v22  ;;  %v979_v35 = vunpack.c.h.bf16 %v212_v22 }
  0x16   : > { %261 = vperm.xlu0 %820, %v253_v10   ;;  %286 = vmatpush.msra.mxu0 %v236_v23  ;;  %v250_v36 = vmul.f32 %v962_v27, %v962_v27  ;;  %v251_v37 = vmul.f32 %v964_v28, %v964_v28  ;;  %v248_v38 = vmul.f32 %v966_v29, %v966_v29 }
  0x17   : > { %309 = vmatpush.msra.mxu1 %v237_v24  ;;  %332 = vmatpush.msra.mxu2 %v238_v25  ;;  %v249_v39 = vmul.f32 %v968_v30, %v968_v30  ;;  %v242_v40 = vmul.f32 %v973_v32, %v973_v32  ;;  %v243_v41 = vmul.f32 %v975_v33, %v975_v33 }
  0x18   : > { %355 = vmatpush.msra.mxu3 %v239_v26  ;;  %775 = vmatmul.msk.f32.vlgmr.msra.gmra.mxu0 %vm264_vm0, %v234_v31  ;;  %v240_v42 = vmul.f32 %v977_v34, %v977_v34  ;;  %v241_v43 = vmul.f32 %v979_v35, %v979_v35 }
  0x19   : > { %777 = vmatmul.msk.f32.vlgmr.msra.gmra.mxu1 %vm264_vm0, %v234_v31  ;;  %779 = vmatmul.msk.f32.vlgmr.msra.gmra.mxu2 %vm264_vm0, %v234_v31 }
  0x1a   : > { %781 = vmatmul.msk.f32.vlgmr.msra.gmra.mxu3 %vm264_vm0, %v234_v31  ;;  %423 = vmatpush.msrb.mxu2 %v250_v36 }
  0x1b   : > { %446 = vmatpush.msrb.mxu3 %v251_v37  ;;  %377 = vmatpush.msrb.mxu0 %v248_v38 }
  0x1c   : > { %400 = vmatpush.msrb.mxu1 %v249_v39  ;;  %424 = vmatpush.msrb.mxu2 %v242_v40 }
  0x1d   : > { %447 = vmatpush.msrb.mxu3 %v243_v41  ;;  %378 = vmatpush.msrb.mxu0 %v240_v42 }
  0x1e   : > { %401 = vmatpush.msrb.mxu1 %v241_v43 }
  0x20   : > { %776 = vmatmul.msk.f32.gmra.mxu0 %vm264_vm0, %v235_v44 }
  0x21   : > { %778 = vmatmul.msk.f32.gmra.mxu1 %vm264_vm0, %v235_v44  ;;  %780 = vmatmul.msk.f32.gmra.mxu2 %vm264_vm0, %v235_v44 }
  0x22   : > { %782 = vmatmul.msk.f32.gmra.mxu3 %vm264_vm0, %v235_v44 }
  0x28   : > { %783 = vmatmul.msk.f32.vlgmr.msrb.gmra.mxu0 %vm264_vm0, %v234_v31 }
  0x29   : > { %785 = vmatmul.msk.f32.vlgmr.msrb.gmra.mxu1 %vm264_vm0, %v234_v31  ;;  %787 = vmatmul.msk.f32.vlgmr.msrb.gmra.mxu2 %vm264_vm0, %v234_v31 }
  0x2a   : > { %789 = vmatmul.msk.f32.vlgmr.msrb.gmra.mxu3 %vm264_vm0, %v234_v31 }
  0x30   : > { %784 = vmatmul.msk.f32.gmra.mxu0 %vm264_vm0, %v235_v44 }
  0x31   : > { %786 = vmatmul.msk.f32.gmra.mxu1 %vm264_vm0, %v235_v44  ;;  %788 = vmatmul.msk.f32.gmra.mxu2 %vm264_vm0, %v235_v44 }
  0x32   : > { %790 = vmatmul.msk.f32.gmra.mxu3 %vm264_vm0, %v235_v44 }
  0x80   : > { %v1016_v45 = vpop.permute.xlu0 %256 }
  0x88   : > { %v1026_v50 = vpop.permute.xlu0 %261 }
  0x95   : > { %v288_v46 = vpop.f32.mrf.mxu0 }
  0x96   : > { %v311_v47 = vpop.f32.mrf.mxu1  ;;  %v1019_v48 = vadd.f32 %v288_v46, %v1016_v45 }
  0x97   : > { %v1022_v49 = vadd.f32 %v311_v47, %v1016_v45 }
  0x98   : > { %821 = vrsqrt.f32 %v1019_v48  ;;  %vm462_vm1 = vcmp.eq.f32.partialorder %v1019_v48, inf  ;;  %vm464_vm2 = vcmp.eq.f32.partialorder %v1019_v48, 0.0  ;;  %v465_v15 = vand.u32 2147483648, %v1019_v48 }
  0x99   : > { %823 = vrsqrt.f32 %v1022_v49  ;;  %vm474_vm3 = vcmp.eq.f32.partialorder %v1022_v49, inf  ;;  %vm476_vm4 = vcmp.eq.f32.partialorder %v1022_v49, 0.0  ;;  %v477_v23 = vand.u32 2147483648, %v1022_v49 }
  0x9c   : > { %v334_v51 = vpop.f32.mrf.mxu2 }
  0x9d   : > { %v357_v52 = vpop.f32.mrf.mxu3  ;;  %v1029_v53 = vadd.f32 %v334_v51, %v1016_v45  ;;  %v291_v55 = vpop.f32.mrf.mxu0 }
  0x9e   : > { %v1032_v54 = vadd.f32 %v357_v52, %v1016_v45  ;;  %v314_v56 = vpop.f32.mrf.mxu1  ;;  %v822_v57 = vpop.eup %821  ;;  %v1035_v58 = vadd.f32 %v291_v55, %v1026_v50 }
  0x9f   : > { %v824_v59 = vpop.eup %823  ;;  %v456_v60 = vmul.f32 %v822_v57, %v1019_v48  ;;  %825 = vrsqrt.f32 %v1029_v53  ;;  %v1040_v61 = vadd.f32 %v314_v56, %v1026_v50  ;;  %v489_v31 = vand.u32 2147483648, %v1029_v53 }
  0xa0   : > { %v468_v62 = vmul.f32 %v824_v59, %v1022_v49  ;;  %827 = vrsqrt.f32 %v1032_v54  ;;  %vm486_vm5 = vcmp.eq.f32.partialorder %v1029_v53, inf  ;;  %v501_v41 = vand.u32 2147483648, %v1032_v54 }
  0xa1   : > { %v457_v63 = vmul.f32 %v822_v57, %v456_v60  ;;  %829 = vrsqrt.f32 %v1035_v58  ;;  %vm488_vm6 = vcmp.eq.f32.partialorder %v1029_v53, 0.0  ;;  %vm498_vm7 = vcmp.eq.f32.partialorder %v1032_v54, inf }
  0xa2   : > { %v469_v0 = vmul.f32 %v824_v59, %v468_v62  ;;  %831 = vrsqrt.f32 %v1040_v61  ;;  %vm500_vm8 = vcmp.eq.f32.partialorder %v1032_v54, 0.0  ;;  %vm558_vm9 = vcmp.eq.f32.partialorder %v1035_v58, inf }
  0xa3   : > { %v458_v1 = vmul.f32 0.5, %v457_v63  ;;  %v561_v52 = vand.u32 2147483648, %v1035_v58  ;;  %vm560_vm10 = vcmp.eq.f32.partialorder %v1035_v58, 0.0  ;;  %vm570_vm11 = vcmp.eq.f32.partialorder %v1040_v61, inf }
  0xa4   : > { %v470_v2 = vmul.f32 0.5, %v469_v0  ;;  %v337_v3 = vpop.f32.mrf.mxu2  ;;  %vm572_vm12 = vcmp.eq.f32.partialorder %v1040_v61, 0.0 }
  0xa5   : > { %v360_v4 = vpop.f32.mrf.mxu3  ;;  %v826_v9 = vpop.eup %825  ;;  %v459_v10 = vsub.f32 1.5, %v458_v1  ;;  %v1050_v16 = vadd.f32 %v337_v3, %v1026_v50 }
  0xa6   : > { %v1053_v17 = vadd.f32 %v360_v4, %v1026_v50  ;;  %v828_v18 = vpop.eup %827  ;;  %v471_v19 = vsub.f32 1.5, %v470_v2  ;;  %v480_v20 = vmul.f32 %v826_v9, %v1029_v53  ;;  %v380_v37 = vpop.f32.mrf.mxu0 }
  0xa7   : > { %v830_v21 = vpop.eup %829  ;;  %v460_v22 = vmul.f32 %v822_v57, %v459_v10  ;;  %v492_v24 = vmul.f32 %v828_v18, %v1032_v54  ;;  %833 = vrsqrt.f32 %v1050_v16  ;;  %v1078_v55 = vadd.f32 %v380_v37, %v1016_v45 }
  0xa8   : > { %v472_v25 = vmul.f32 %v824_v59, %v471_v19  ;;  %v481_v26 = vmul.f32 %v826_v9, %v480_v20  ;;  %v552_v36 = vmul.f32 %v830_v21, %v1035_v58  ;;  %v832_v38 = vpop.eup %831  ;;  %835 = vrsqrt.f32 %v1053_v17 }
  0xa9   : > { %v461_v39 = vmul.f32 %v460_v22, %v1019_v48  ;;  %v493_v40 = vmul.f32 %v828_v18, %v492_v24  ;;  %v564_v46 = vmul.f32 %v832_v38, %v1040_v61  ;;  %837 = vrsqrt.f32 %v1078_v55 }
  0xaa   : > { %v473_v42 = vmul.f32 %v472_v25, %v1022_v49  ;;  %v482_v43 = vmul.f32 0.5, %v481_v26  ;;  %v553_v44 = vmul.f32 %v830_v21, %v552_v36  ;;  %vm582_vm13 = vcmp.eq.f32.partialorder %v1050_v16, inf }
  0xab   : > { %v463_v47 = vsel %vm462_vm1, %v1019_v48, %v461_v39  ;;  %v494_v51 = vmul.f32 0.5, %v493_v40  ;;  %v565_v2 = vmul.f32 %v832_v38, %v564_v46  ;;  %vm584_vm14 = vcmp.eq.f32.partialorder %v1050_v16, 0.0 }
  0xac   : > { %v466_v56 = vsel %vm464_vm2, %v465_v15, %v463_v47  ;;  %v475_v57 = vsel %vm474_vm3, %v1022_v49, %v473_v42  ;;  %v483_v59 = vsub.f32 1.5, %v482_v43  ;;  %v554_v60 = vmul.f32 0.5, %v553_v44  ;;  %v403_v49 = vpop.f32.mrf.mxu1 }
  0xad   : > { %v834_v62 = vpop.eup %833  ;;  %v647_v63 = vmul.f32 %v466_v56, %v938_v11  ;;  %v478_v0 = vsel %vm476_vm4, %v477_v23, %v475_v57  ;;  %v495_v1 = vsub.f32 1.5, %v494_v51  ;;  %v566_v19 = vmul.f32 0.5, %v565_v2  ;;  %v426_v51 = vpop.f32.mrf.mxu2 }
  0xae   : > { %v648_v48 = vmul.f32 %v478_v0, %v940_v12  ;;  %v484_v3 = vmul.f32 %v826_v9, %v483_v59  ;;  %v555_v4 = vsub.f32 1.5, %v554_v60  ;;  %v576_v10 = vmul.f32 %v834_v62, %v1050_v16  ;;  %v836_v15 = vpop.eup %835  ;;  %v449_v60 = vpop.f32.mrf.mxu3 }
  0xaf   : > { %v496_v11 = vmul.f32 %v828_v18, %v495_v1  ;;  %v567_v24 = vsub.f32 1.5, %v566_v19  ;;  %v588_v25 = vmul.f32 %v836_v15, %v1053_v17  ;;  %v1110_v37 = vadd.f32 %v403_v49, %v1016_v45  ;;  %v838_v56 = vpop.eup %837 }
  0xb0   : > { %v663_v12 = vpack.c.bf16 %v648_v48, %v647_v63  ;;  %v485_v9 = vmul.f32 %v484_v3, %v1029_v53  ;;  %v556_v20 = vmul.f32 %v830_v21, %v555_v4  ;;  %v577_v22 = vmul.f32 %v834_v62, %v576_v10 }
  0xb1   : > { %v497_v23 = vmul.f32 %v496_v11, %v1032_v54  ;;  %v568_v40 = vmul.f32 %v832_v38, %v567_v24  ;;  %v589_v42 = vmul.f32 %v836_v15, %v588_v25  ;;  %v504_v59 = vmul.f32 %v838_v56, %v1078_v55 }
  0xb2   : > { %671 = vst [vmem:[%s1096_s30] sm:$0xff] %v663_v12  ;;  %v487_v18 = vsel %vm486_vm5, %v1029_v53, %v485_v9  ;;  %v557_v26 = vmul.f32 %v556_v20, %v1035_v58  ;;  %v578_v36 = vmul.f32 0.5, %v577_v22  ;;  %839 = vrsqrt.f32 %v1110_v37 }
  0xb3   : > { %v490_v21 = vsel %vm488_vm6, %v489_v31, %v487_v18  ;;  %v499_v39 = vsel %vm498_vm7, %v1032_v54, %v497_v23  ;;  %v569_v38 = vmul.f32 %v568_v40, %v1040_v61  ;;  %v590_v57 = vmul.f32 0.5, %v589_v42 }
  0xb4   : > { %v649_v43 = vmul.f32 %v490_v21, %v942_v13  ;;  %v502_v44 = vsel %vm500_vm8, %v501_v41, %v499_v39  ;;  %v559_v46 = vsel %vm558_vm9, %v1035_v58, %v557_v26  ;;  %v579_v47 = vsub.f32 1.5, %v578_v36  ;;  %v406_v24 = vpop.f32.mrf.mxu1 }
  0xb5   : > { %v650_v53 = vmul.f32 %v502_v44, %v944_v14  ;;  %v562_v31 = vsel %vm560_vm10, %v561_v52, %v559_v46  ;;  %v573_v54 = vand.u32 2147483648, %v1040_v61  ;;  %v571_v14 = vsel %vm570_vm11, %v1040_v61, %v569_v38  ;;  %v429_v25 = vpop.f32.mrf.mxu2 }
  0xb6   : > { %v655_v13 = vmul.f32 %v562_v31, %v927_v5  ;;  %v580_v41 = vmul.f32 %v834_v62, %v579_v47  ;;  %v591_v0 = vsub.f32 1.5, %v590_v57  ;;  %v505_v5 = vmul.f32 %v838_v56, %v504_v59  ;;  %v383_v62 = vpop.f32.mrf.mxu0  ;;  %v452_v36 = vpop.f32.mrf.mxu3 }
  0xb7   : > { %v664_v63 = vpack.c.bf16 %v650_v53, %v649_v43  ;;  %v574_v58 = vsel %vm572_vm12, %v573_v54, %v571_v14  ;;  %v585_v2 = vand.u32 2147483648, %v1050_v16  ;;  %v1144_v61 = vadd.f32 %v426_v51, %v1016_v45 }
  0xb8   : > { %v581_v52 = vmul.f32 %v580_v41, %v1050_v16  ;;  %v656_v1 = vmul.f32 %v574_v58, %v929_v6  ;;  %v592_v48 = vmul.f32 %v836_v15, %v591_v0  ;;  %v506_v4 = vmul.f32 0.5, %v505_v5 }
  0xb9   : > { %672 = vst [vmem:[%s1096_s30 + $0x8] sm:$0xff] %v664_v63  ;;  %v1147_v10 = vadd.f32 %v449_v60, %v1016_v45  ;;  %v1151_v6 = vadd.f32 %v383_v62, %v1026_v50  ;;  %vm594_vm15 = vcmp.eq.f32.partialorder %v1053_v17, inf  ;;  %v597_v15 = vand.u32 2147483648, %v1053_v17 }
  0xba   : > { %v583_v3 = vsel %vm582_vm13, %v1050_v16, %v581_v52  ;;  %v667_v11 = vpack.c.bf16 %v656_v1, %v655_v13  ;;  %v593_v49 = vmul.f32 %v592_v48, %v1053_v17  ;;  %v507_v12 = vsub.f32 1.5, %v506_v4  ;;  %v840_v16 = vpop.eup %839 }
  0xbb   : > { %v586_v19 = vsel %vm584_vm14, %v585_v2, %v583_v3  ;;  %841 = vrsqrt.f32 %v1144_v61  ;;  %vm596_vm0 = vcmp.eq.f32.partialorder %v1053_v17, 0.0  ;;  %v516_v23 = vmul.f32 %v840_v16, %v1110_v37 }
  0xbc   : > { %675 = vst [vmem:[%s1096_s30 + $0x20] sm:$0xff] %v667_v11  ;;  %v657_v9 = vmul.f32 %v586_v19, %v931_v7  ;;  %v595_v45 = vsel %vm594_vm15, %v1053_v17, %v593_v49  ;;  %843 = vrsqrt.f32 %v1147_v10  ;;  %v508_v22 = vmul.f32 %v838_v56, %v507_v12 }
  0xbd   : > { %v598_v20 = vsel %vm596_vm0, %v597_v15, %v595_v45  ;;  %845 = vrsqrt.f32 %v1151_v6  ;;  %v517_v7 = vmul.f32 %v840_v16, %v516_v23  ;;  %v1166_v17 = vadd.f32 %v406_v24, %v1026_v50 }
  0xbe   : > { %v658_v18 = vmul.f32 %v598_v20, %v933_v8  ;;  %v509_v26 = vmul.f32 %v508_v22, %v1078_v55  ;;  %v1169_v39 = vadd.f32 %v429_v25, %v1026_v50  ;;  %vm510_vm1 = vcmp.eq.f32.partialorder %v1078_v55, inf }
  0xbf   : > { %v518_v42 = vmul.f32 0.5, %v517_v7  ;;  %847 = vrsqrt.f32 %v1166_v17  ;;  %v1177_v46 = vadd.f32 %v452_v36, %v1026_v50  ;;  %v513_v47 = vand.u32 2147483648, %v1078_v55 }
  0xc0   : > { %v668_v21 = vpack.c.bf16 %v658_v18, %v657_v9  ;;  %v511_v8 = vsel %vm510_vm1, %v1078_v55, %v509_v26  ;;  %vm512_vm2 = vcmp.eq.f32.partialorder %v1078_v55, 0.0  ;;  %vm522_vm3 = vcmp.eq.f32.partialorder %v1110_v37, inf }
  0xc1   : > { %v842_v40 = vpop.eup %841  ;;  %v519_v51 = vsub.f32 1.5, %v518_v42  ;;  %849 = vrsqrt.f32 %v1169_v39  ;;  %v514_v38 = vsel %vm512_vm2, %v513_v47, %v511_v8  ;;  %vm524_vm4 = vcmp.eq.f32.partialorder %v1110_v37, 0.0 }
  0xc2   : > { %v844_v43 = vpop.eup %843  ;;  %676 = vst [vmem:[%s1096_s30 + $0x28] sm:$0xff] %v668_v21  ;;  %v528_v44 = vmul.f32 %v842_v40, %v1144_v61  ;;  %v525_v50 = vand.u32 2147483648, %v1110_v37  ;;  %851 = vrsqrt.f32 %v1177_v46  ;;  %vm534_vm5 = vcmp.eq.f32.partialorder %v1144_v61, inf }
  0xc3   : > { %v540_v56 = vmul.f32 %v844_v43, %v1147_v10  ;;  %v846_v53 = vpop.eup %845  ;;  %v520_v57 = vmul.f32 %v840_v16, %v519_v51  ;;  %v651_v14 = vmul.f32 %v514_v38, %v977_v34  ;;  %vm536_vm6 = vcmp.eq.f32.partialorder %v1144_v61, 0.0 }
  0xc4   : > { %v529_v31 = vmul.f32 %v842_v40, %v528_v44  ;;  %v600_v54 = vmul.f32 %v846_v53, %v1151_v6  ;;  %v537_v58 = vand.u32 2147483648, %v1144_v61  ;;  %vm546_vm7 = vcmp.eq.f32.partialorder %v1147_v10, inf }
  0xc5   : > { %v541_v13 = vmul.f32 %v844_v43, %v540_v56  ;;  %v521_v59 = vmul.f32 %v520_v57, %v1110_v37  ;;  %v848_v63 = vpop.eup %847  ;;  %vm548_vm8 = vcmp.eq.f32.partialorder %v1147_v10, 0.0  ;;  %v549_v12 = vand.u32 2147483648, %v1147_v10 }
  0xc6   : > { %v530_v41 = vmul.f32 0.5, %v529_v31  ;;  %v601_v60 = vmul.f32 %v846_v53, %v600_v54  ;;  %v612_v1 = vmul.f32 %v848_v63, %v1166_v17  ;;  %vm606_vm9 = vcmp.eq.f32.partialorder %v1151_v6, inf }
  0xc7   : > { %v542_v55 = vmul.f32 0.5, %v541_v13  ;;  %v523_v52 = vsel %vm522_vm3, %v1110_v37, %v521_v59  ;;  %v850_v2 = vpop.eup %849  ;;  %v609_v22 = vand.u32 2147483648, %v1151_v6  ;;  %vm608_vm10 = vcmp.eq.f32.partialorder %v1151_v6, 0.0 }
  0xc8   : > { %v531_v0 = vsub.f32 1.5, %v530_v41  ;;  %v602_v62 = vmul.f32 0.5, %v601_v60  ;;  %v526_v48 = vsel %vm524_vm4, %v525_v50, %v523_v52  ;;  %v613_v19 = vmul.f32 %v848_v63, %v612_v1  ;;  %v852_v49 = vpop.eup %851 }
  0xc9   : > { %v543_v5 = vsub.f32 1.5, %v542_v55  ;;  %v652_v34 = vmul.f32 %v526_v48, %v979_v35  ;;  %v624_v37 = vmul.f32 %v850_v2, %v1169_v39  ;;  %v636_v24 = vmul.f32 %v852_v49, %v1177_v46 }
  0xca   : > { %v532_v3 = vmul.f32 %v842_v40, %v531_v0  ;;  %v603_v11 = vsub.f32 1.5, %v602_v62  ;;  %v614_v20 = vmul.f32 0.5, %v613_v19  ;;  %vm618_vm11 = vcmp.eq.f32.partialorder %v1166_v17, inf }
  0xcb   : > { %v544_v4 = vmul.f32 %v844_v43, %v543_v5  ;;  %v665_v16 = vpack.c.bf16 %v652_v34, %v651_v14  ;;  %v625_v23 = vmul.f32 %v850_v2, %v624_v37  ;;  %v637_v42 = vmul.f32 %v852_v49, %v636_v24 }
  0xcc   : > { %v533_v15 = vmul.f32 %v532_v3, %v1144_v61  ;;  %v604_v45 = vmul.f32 %v846_v53, %v603_v11  ;;  %v615_v7 = vsub.f32 1.5, %v614_v20  ;;  %vm620_vm12 = vcmp.eq.f32.partialorder %v1166_v17, 0.0 }
  0xcd   : > { %v545_v9 = vmul.f32 %v544_v4, %v1147_v10  ;;  %673 = vst [vmem:[%s1096_s30 + $0x10] sm:$0xff] %v665_v16  ;;  %v626_v40 = vmul.f32 0.5, %v625_v23  ;;  %v638_v51 = vmul.f32 0.5, %v637_v42  ;;  %vm630_vm13 = vcmp.eq.f32.partialorder %v1169_v39, inf }
  0xce   : > { %v535_v35 = vsel %vm534_vm5, %v1144_v61, %v533_v15  ;;  %v605_v26 = vmul.f32 %v604_v45, %v1151_v6  ;;  %v616_v8 = vmul.f32 %v848_v63, %v615_v7  ;;  %v633_v50 = vand.u32 2147483648, %v1169_v39 }
  0xcf   : > { %v538_v25 = vsel %vm536_vm6, %v537_v58, %v535_v35  ;;  %v547_v18 = vsel %vm546_vm7, %v1147_v10, %v545_v9  ;;  %v627_v47 = vsub.f32 1.5, %v626_v40  ;;  %v621_v10 = vand.u32 2147483648, %v1166_v17 }
  0xd0   : > { %v653_v36 = vmul.f32 %v538_v25, %v973_v32  ;;  %v550_v21 = vsel %vm548_vm8, %v549_v12, %v547_v18  ;;  %v607_v61 = vsel %vm606_vm9, %v1151_v6, %v605_v26  ;;  %v617_v32 = vmul.f32 %v616_v8, %v1166_v17 }
  0xd1   : > { %v654_v43 = vmul.f32 %v550_v21, %v975_v33  ;;  %v610_v44 = vsel %vm608_vm10, %v609_v22, %v607_v61  ;;  %v628_v53 = vmul.f32 %v850_v2, %v627_v47  ;;  %v639_v31 = vsub.f32 1.5, %v638_v51 }
  0xd2   : > { %v659_v33 = vmul.f32 %v610_v44, %v966_v29  ;;  %v619_v38 = vsel %vm618_vm11, %v1166_v17, %v617_v32  ;;  %vm632_vm14 = vcmp.eq.f32.partialorder %v1169_v39, 0.0  ;;  %vm642_vm15 = vcmp.eq.f32.partialorder %v1177_v46, inf }
  0xd3   : > { %v666_v56 = vpack.c.bf16 %v654_v43, %v653_v36  ;;  %v622_v6 = vsel %vm620_vm12, %v621_v10, %v619_v38  ;;  %v629_v57 = vmul.f32 %v628_v53, %v1169_v39  ;;  %v640_v13 = vmul.f32 %v852_v49, %v639_v31 }
  0xd4   : > { %v660_v54 = vmul.f32 %v622_v6, %v968_v30  ;;  %v645_v55 = vand.u32 2147483648, %v1177_v46  ;;  %vm644_vm0 = vcmp.eq.f32.partialorder %v1177_v46, 0.0 }
  0xd5   : > { %674 = vst [vmem:[%s1096_s30 + $0x18] sm:$0xff] %v666_v56  ;;  %v631_v41 = vsel %vm630_vm13, %v1169_v39, %v629_v57  ;;  %v641_v29 = vmul.f32 %v640_v13, %v1177_v46 }
  0xd6   : > { %v669_v59 = vpack.c.bf16 %v660_v54, %v659_v33  ;;  %v634_v17 = vsel %vm632_vm14, %v633_v50, %v631_v41 }
  0xd7   : > { %v661_v60 = vmul.f32 %v634_v17, %v962_v27  ;;  %v643_v30 = vsel %vm642_vm15, %v1177_v46, %v641_v29 }
  0xd8   : > { %677 = vst [vmem:[%s1096_s30 + $0x30] sm:$0xff] %v669_v59  ;;  %v646_v63 = vsel %vm644_vm0, %v645_v55, %v643_v30 }
  0xd9   : > { %v662_v14 = vmul.f32 %v646_v63, %v964_v28 }
  0xdb   : > { %v670_v0 = vpack.c.bf16 %v662_v14, %v661_v60 }
  0xdd   : > { %678 = vst [vmem:[%s1096_s30 + $0x38] sm:$0xff] %v670_v0 }
  0xde PF: > { %s13_s14 = sadd.s32 1, %s875_s14   ;;  %s1262_s12 = smov %s871_s13 }
  0xdf   : > { %p10_p5 = scmp.ge.s32.totalorder %s13_s14, 4   ;;  %s1263_s13 = smov %s1265_s15 }
  0xe1   :  { %12 = sbr.rel (!%p10_p5) target bundleno = 2 (0x2), region = 62 }

// kernel: hyperprior_forward.15
= control target key start
LH: loop header
LB: loop body
LE: loop exit
PB: predicated region body
PF: predicated region fallthrough
CT: control target
= control target key end

     0   :  { %s1276_s30 = smov 0   ;;  %s1278_s10 = smov 0   ;;  %s1504_s0 = inlined_call_operand.vmem [shape: f32[2,24,512], index: 0, kind: input, shape index: {}]   ;;  %s1505_s1 = inlined_call_operand.vmem [shape: f32[2,24,512], index: 1, kind: input, shape index: {}]   ;;  %s1506_s2 = inlined_call_operand.vmem [shape: f32[6,128], index: 2, kind: input, shape index: {}]   ;;  %s1507_s3 = inlined_call_operand.vmem [shape: f32[6,128], index: 3, kind: input, shape index: {}]   ;;  %s1508_s4 = inlined_call_operand.vmem [shape: f32[6,128], index: 4, kind: input, shape index: {}]   ;;  %s1509_s5 = inlined_call_operand.vmem [shape: f32[16,2], index: 5, kind: input, shape index: {}]   ;;  %s1510_s6 = inlined_call_operand.vmem [shape: f32[4,16,1], index: 6, kind: input, shape index: {}]   ;;  %s1511_s7 = inlined_call_operand.vmem [shape: f32[4,16,1], index: 7, kind: input, shape index: {}]   ;;  %s1512_s8 = inlined_call_operand.vmem [shape: f32[3,16,1], index: 8, kind: input, shape index: {}]   ;;  %s1513_s9 = inlined_call_operand.vmem [shape: f32[2,8,128], index: 9, kind: output, shape index: {}]  }
   0x1   :  { %s1280_s11 = smov 0  }
   0x2 LB: > { %s31_s12 = sadd.s32 1, %s1217_s10  ;;  %p1079_p0 = scmp.ge.s32.totalorder %s1221_s11, 1  ;;  %s1221_s11 = sphi %s1280_s11, %s19_s11   ;;  %s1217_s10 = sphi %s1278_s10, %s1521_s10   ;;  %s1213_s30 = sphi %s1276_s30, %s1520_s30  }
   0x3   : > { %p33_p1 = scmp.ge.s32.totalorder %s31_s12, 2  ;;  %p325_p2 = scmp.lt.s32.totalorder %s1221_s11, 3 }
   0x5   : > { %s1523_s12 = smov (%p33_p1, %s31_s12), 0  ;;  %p326_p3 = pnand %p1079_p0, %p325_p2 }
   0x6   : > { %p502_p4 = scmp.eq.s32.totalorder (!%p326_p3), %s1213_s30, 0  ;;  %p376_p5 = scmp.lt.s32.totalorder (!%p326_p3), %s1213_s30, 1 }
   0x7   : > { %329 = sbr.rel (%p326_p3) target bundleno = 630 (0x276), region = 56 }
   0xc   : > { %v1223_v0 = vmov 0.0   ;;  %s377_s13 = scalar_select %p376_p5, %s1213_s30, 1  ;;  %v646_v49 = vld [vmem:[%s1512_s8] sm:$0xff] (%p502_p4)  ;;  %v1224_v52 = vmov (%p502_p4), 0   ;;  %v647_v53 = vld [vmem:[%s1512_s8 + $0x8] sm:$0xff] (%p502_p4)  ;;  %v1087_v56 = vld [vmem:[%s1511_s7 + $0x10] sm:$0xff] (%p502_p4) }
   0xd   : > { %417 = vst [vmem:[#allocation3] sm:$0xff] %v1223_v0  ;;  %v632_v50 = vld [vmem:[%s1511_s7] sm:$0xff] (%p502_p4)  ;;  %1142 = vset.pattern.permute.xlu2 (%p502_p4), %v1224_v52  ;;  %1141 = vset.pattern.permute.xlu1 (%p502_p4), %v1224_v52  ;;  %v633_v54 = vld [vmem:[%s1511_s7 + $0x8] sm:$0xff] (%p502_p4)  ;;  %v1086_v57 = vld [vmem:[%s1510_s6 + $0x18] sm:$0xff] (%p502_p4)  ;;  %vm603_vm10 = vcmask (%p502_p4), 1045504  }
   0xe   : > { %s1106_s14 = smul.u32 96, %s377_s13  ;;  %s1082_s15 = sshll.u32 %s377_s13, 3  ;;  %v618_v51 = vld [vmem:[%s1510_s6] sm:$0xff] (%p502_p4)  ;;  %1140 = vset.pattern.permute.xlu0 (%p502_p4), %v1224_v52  ;;  %652 = vperm.xlu2 (%p502_p4), %1142, %v646_v49   ;;  %v619_v55 = vld [vmem:[%s1510_s6 + $0x8] sm:$0xff] (%p502_p4)  ;;  %v1085_v58 = vld [vmem:[%s1510_s6 + $0x10] sm:$0xff] (%p502_p4) }
   0xf   : > { %s1302_s18 = scalar_lea.vmem %s1513_s9, %s1082_s15  ;;  %636 = vperm.xlu1 (%p502_p4), %1141, %v632_v50   ;;  %622 = vperm.xlu0 (%p502_p4), %1140, %v618_v51   ;;  %v1090_v59 = vld [vmem:[%s1512_s8 + $0x18] sm:$0xff] (%p502_p4)  ;;  %v1089_v60 = vld [vmem:[%s1512_s8 + $0x10] sm:$0xff] (%p502_p4)  ;;  %v1093_v62 = vld [vmem:[%s1511_s7 + $0x20] sm:$0xff] (%p502_p4) }
  0x10   : > { %s1307_s21 = scalar_lea.vmem %s1504_s0, %s1106_s14  ;;  %s1312_s24 = scalar_lea.vmem %s1505_s1, %s1106_s14  ;;  %v1088_v61 = vld [vmem:[%s1511_s7 + $0x18] sm:$0xff] (%p502_p4)  ;;  %v1092_v63 = vld [vmem:[%s1510_s6 + $0x28] sm:$0xff] (%p502_p4)  ;;  %v1091_v0 = vld [vmem:[%s1510_s6 + $0x20] sm:$0xff] (%p502_p4) }
  0x11   : > { %v418_v1 = vld [vmem:[%s1307_s21] sm:$0xff]  ;;  %v419_v3 = vld [vmem:[%s1307_s21 + $0x8] sm:$0xff]  ;;  %v420_v6 = vld [vmem:[%s1307_s21 + $0x10] sm:$0xff] }
  0x12   : > { %v430_v2 = vld [vmem:[%s1312_s24] sm:$0xff]  ;;  %v431_v5 = vld [vmem:[%s1312_s24 + $0x8] sm:$0xff]  ;;  %v432_v7 = vld [vmem:[%s1312_s24 + $0x10] sm:$0xff] }
  0x13   : > { %v442_v4 = vsub.f32 %v418_v1, %v430_v2  ;;  %v443_v8 = vsub.f32 %v419_v3, %v431_v5  ;;  %v444_v9 = vsub.f32 %v420_v6, %v432_v7  ;;  %v421_v10 = vld [vmem:[%s1307_s21 + $0x18] sm:$0xff]  ;;  %v422_v12 = vld [vmem:[%s1307_s21 + $0x20] sm:$0xff]  ;;  %v423_v16 = vld [vmem:[%s1307_s21 + $0x28] sm:$0xff] }
  0x14   : > { %v433_v11 = vld [vmem:[%s1312_s24 + $0x18] sm:$0xff]  ;;  %v434_v15 = vld [vmem:[%s1312_s24 + $0x20] sm:$0xff]  ;;  %v435_v17 = vld [vmem:[%s1312_s24 + $0x28] sm:$0xff] }
  0x15   : > { %v466_v13 = vmul.f32 %v442_v4, %v442_v4  ;;  %v445_v14 = vsub.f32 %v421_v10, %v433_v11  ;;  %v467_v18 = vmul.f32 %v443_v8, %v443_v8  ;;  %v468_v19 = vmul.f32 %v444_v9, %v444_v9  ;;  %v424_v22 = vld [vmem:[%s1307_s21 + $0x30] sm:$0xff]  ;;  %v425_v24 = vld [vmem:[%s1307_s21 + $0x38] sm:$0xff]  ;;  %v426_v28 = vld [vmem:[%s1307_s21 + $0x40] sm:$0xff] }
  0x16   : > { %v446_v20 = vsub.f32 %v422_v12, %v434_v15  ;;  %v447_v21 = vsub.f32 %v423_v16, %v435_v17  ;;  %v436_v23 = vld [vmem:[%s1312_s24 + $0x30] sm:$0xff]  ;;  %v437_v27 = vld [vmem:[%s1312_s24 + $0x38] sm:$0xff]  ;;  %v438_v29 = vld [vmem:[%s1312_s24 + $0x40] sm:$0xff]  ;;  %657 = vperm.xlu2 (%p502_p4), %1142, %v647_v53  }
  0x17   : > { %v469_v25 = vmul.f32 %v445_v14, %v445_v14  ;;  %v448_v26 = vsub.f32 %v424_v22, %v436_v23  ;;  %v427_v32 = vld [vmem:[%s1307_s21 + $0x48] sm:$0xff]  ;;  %v428_v34 = vld [vmem:[%s1307_s21 + $0x50] sm:$0xff]  ;;  %490 = vst [vmem:[#allocation2 + $0x30] sm:$0xff] %v466_v13  ;;  %v449_v36 = vsub.f32 %v425_v24, %v437_v27  ;;  %v450_v37 = vsub.f32 %v426_v28, %v438_v29  ;;  %v429_v39 = vld [vmem:[%s1307_s21 + $0x58] sm:$0xff] }
  0x18   : > { %v470_v30 = vmul.f32 %v446_v20, %v446_v20  ;;  %v471_v31 = vmul.f32 %v447_v21, %v447_v21  ;;  %v439_v33 = vld [vmem:[%s1312_s24 + $0x48] sm:$0xff]  ;;  %v440_v38 = vld [vmem:[%s1312_s24 + $0x50] sm:$0xff]  ;;  %v441_v40 = vld [vmem:[%s1312_s24 + $0x58] sm:$0xff]  ;;  %491 = vst [vmem:[#allocation2] sm:$0xff] %v467_v18  ;;  %641 = vperm.xlu1 (%p502_p4), %1141, %v633_v54   ;;  %627 = vperm.xlu0 (%p502_p4), %1140, %v619_v55  }
  0x19   : > { %v472_v35 = vmul.f32 %v448_v26, %v448_v26  ;;  %v451_v41 = vsub.f32 %v427_v32, %v439_v33  ;;  %v452_v42 = vsub.f32 %v428_v34, %v440_v38  ;;  %492 = vst [vmem:[#allocation2 + $0x58] sm:$0xff] %v468_v19  ;;  %v473_v43 = vmul.f32 %v449_v36, %v449_v36  ;;  %v1096_v1 = vld [vmem:[%s1512_s8 + $0x28] sm:$0xff] (%p502_p4)  ;;  %v1095_v2 = vld [vmem:[%s1512_s8 + $0x20] sm:$0xff] (%p502_p4)  ;;  %v1099_v4 = vld [vmem:[%s1511_s7 + $0x30] sm:$0xff] (%p502_p4) }
  0x1a   : > { %v474_v44 = vmul.f32 %v450_v37, %v450_v37  ;;  %v453_v45 = vsub.f32 %v429_v39, %v441_v40  ;;  %493 = vst [vmem:[#allocation2 + $0x18] sm:$0xff] %v469_v25  ;;  %v1094_v3 = vld [vmem:[%s1511_s7 + $0x28] sm:$0xff] (%p502_p4)  ;;  %v1098_v5 = vld [vmem:[%s1510_s6 + $0x38] sm:$0xff] (%p502_p4)  ;;  %v1097_v6 = vld [vmem:[%s1510_s6 + $0x30] sm:$0xff] (%p502_p4) }
  0x1b   : > { %v475_v46 = vmul.f32 %v451_v41, %v451_v41  ;;  %v476_v47 = vmul.f32 %v452_v42, %v452_v42  ;;  %494 = vst [vmem:[#allocation2 + $0x50] sm:$0xff] %v470_v30  ;;  %v1100_v7 = vld [vmem:[%s1511_s7 + $0x38] sm:$0xff] (%p502_p4)  ;;  %v508_v8 = vld [vmem:[%s1507_s3] sm:$0x3f] (%p502_p4)  ;;  %v615_v27 = vld [vmem:[%s1509_s5 + $0x8] sm:$0xff] (%p502_p4) }
  0x1c   : > { %v477_v48 = vmul.f32 %v453_v45, %v453_v45  ;;  %495 = vst [vmem:[#allocation2 + $0x20] sm:$0xff] %v471_v31  ;;  %v509_v9 = vmax.f32 (%p502_p4), %v508_v8, 0.11  ;;  %v614_v11 = vld [vmem:[%s1509_s5] sm:$0xff] (%p502_p4)  ;;  %v617_v34 = vadd.f32 (%p502_p4), 0.5, %v615_v27 }
  0x1d   : > { %496 = vst [vmem:[#allocation2 + $0x8] sm:$0xff] %v472_v35  ;;  %v507_v12 = vld [vmem:[%s1506_s2] sm:$0x3f] (%p502_p4)  ;;  %v616_v16 = vadd.f32 (%p502_p4), 0.5, %v614_v11  ;;  %v1101_v17 = vadd.f32 (%p502_p4), -0.5, %v614_v11  ;;  %v1102_v35 = vadd.f32 (%p502_p4), -0.5, %v615_v27 }
  0x1e   : > { %497 = vst [vmem:[#allocation2 + $0x38] sm:$0xff] %v473_v43  ;;  %506 = sbr.rel (!%p502_p4) target bundleno = 426 (0x1aa), region = 64  ;;  %684 = vperm.xlu2 (%p502_p4), %1142, %v1087_v56   ;;  %1143 = vrcp.f32 (%p502_p4), %v509_v9  ;;  %v511_v13 = vadd.f32 (%p502_p4), 0.5, %v507_v12  ;;  %v1084_v14 = vadd.f32 (%p502_p4), -0.5, %v507_v12 }
  0x1f   : > { %498 = vst [vmem:[#allocation2 + $0x28] sm:$0xff] %v474_v44 }
  0x20   : > { %499 = vst [vmem:[#allocation2 + $0x48] sm:$0xff] %v475_v46  ;;  %674 = vperm.xlu1 (%p502_p4), %1141, %v1086_v57   ;;  %669 = vperm.xlu0 (%p502_p4), %1140, %v1085_v58  }
  0x21   : > { %500 = vst [vmem:[#allocation2 + $0x10] sm:$0xff] %v476_v47 }
  0x22   : > { %501 = vst [vmem:[#allocation2 + $0x40] sm:$0xff] %v477_v48 }
  0x24   : > { %v1144_v15 = vpop.eup %1143 }
  0x25   : > { %v512_v18 = vmul.f32 %v1144_v15, %v511_v13  ;;  %v553_v19 = vmul.f32 %v1144_v15, %v1084_v14 }
  0x26   : > { %706 = vperm.xlu2 %1142, %v1090_v59  }
  0x27   : > { %v1415_v21 = vmul.f32 0.70710677, %v512_v18  ;;  %v1417_v22 = vmul.f32 0.70710677, %v553_v19 }
  0x28   : > { %701 = vperm.xlu1 %1141, %v1089_v60   ;;  %689 = vperm.xlu0 %1140, %v1088_v61  }
  0x29   : > { %v1423_v28 = vand.u32 2147483647, %v1415_v21  ;;  %v1426_v29 = vand.u32 2147483647, %v1417_v22  ;;  %vm514_vm8 = vcmp.ge.f32.partialorder %v1415_v21, 0.0  ;;  %vm555_vm9 = vcmp.ge.f32.partialorder %v1417_v22, 0.0 }
  0x2b   : > { %v517_v32 = vmul.f32 0.3275911, %v1423_v28  ;;  %v558_v33 = vmul.f32 0.3275911, %v1426_v29 }
  0x2d   : > { %v518_v36 = vadd.f32 1.0, %v517_v32  ;;  %v1430_v37 = vadd.f32 1.0, %v558_v33 }
  0x2e   : > { %733 = vperm.xlu2 %1142, %v1093_v62  }
  0x2f   : > { %vm524_vm0 = vweird.f32 %v518_v36  ;;  %v528_v8 = vand.u32 2147483647, %v518_v36  ;;  %vm565_vm4 = vweird.f32 %v1430_v37  ;;  %v569_v19 = vand.u32 2147483647, %v1430_v37 }
  0x30   : > { %723 = vperm.xlu1 %1141, %v1092_v63   ;;  %718 = vperm.xlu0 %1140, %v1091_v0  }
  0x31   : > { %vm529_vm3 = vcmp.eq.f32.partialorder %v528_v8, 8.507059e+37  ;;  %vm570_vm7 = vcmp.eq.f32.partialorder %v569_v19, 8.507059e+37 }
  0x36   : > { %755 = vperm.xlu2 %1142, %v1096_v1   ;;  %v530_v1 = vand.u32 2147483648, %v518_v36 }
  0x38   : > { %750 = vperm.xlu1 %1141, %v1095_v2   ;;  %738 = vperm.xlu0 %1140, %v1094_v3   ;;  %v531_v9 = vor.u32 1.1754944e-38, %v530_v1 }
  0x3e   : > { %782 = vperm.xlu2 %1142, %v1099_v4  }
  0x40   : > { %772 = vperm.xlu1 %1141, %v1098_v5   ;;  %767 = vperm.xlu0 %1140, %v1097_v6  }
  0x48   : > { %787 = vperm.xlu0 %1140, %v1100_v7  }
  0x68   : > { %v653_v10 = vpop.permute.xlu2 %652 }
  0x70   : > { %v658_v20 = vpop.permute.xlu2 %657 }
  0x78   : > { %v685_v42 = vpop.permute.xlu2 %684 }
  0x80   : > { %v1434_v4 = vpop.permute.xlu2 %706 }
  0x81   : > { %v637_v23 = vpop.permute.xlu1 %636  ;;  %v623_v24 = vpop.permute.xlu0 %622 }
  0x82   : > { %v630_v25 = vmul.f32 %v623_v24, %v616_v16  ;;  %v832_v26 = vmul.f32 %v1101_v17, %v623_v24 }
  0x84   : > { %v644_v30 = vadd.f32 %v637_v23, %v630_v25  ;;  %v834_v31 = vadd.f32 %v832_v26, %v637_v23 }
  0x86   : > { %1145 = vtanh.f32 %v644_v30 }
  0x87   : > { %1147 = vtanh.f32 %v834_v31 }
  0x88   : > { %1149 = vrcp.f32 %v518_v36 }
  0x89   : > { %1151 = vrcp.f32 %v1430_v37 }
  0x8a   : > { %v642_v38 = vpop.permute.xlu1 %641  ;;  %v628_v39 = vpop.permute.xlu0 %627 }
  0x8b   : > { %v631_v40 = vmul.f32 %v628_v39, %v617_v34  ;;  %v833_v41 = vmul.f32 %v1102_v35, %v628_v39  ;;  %v734_v39 = vpop.permute.xlu2 %733 }
  0x8c   : > { %v1146_v43 = vpop.eup %1145 }
  0x8d   : > { %v645_v44 = vadd.f32 %v642_v38, %v631_v40  ;;  %v835_v45 = vadd.f32 %v833_v41, %v642_v38  ;;  %v1148_v46 = vpop.eup %1147  ;;  %v660_v47 = vmul.f32 %v1146_v43, %v653_v10 }
  0x8e   : > { %v1150_v48 = vpop.eup %1149  ;;  %v838_v49 = vmul.f32 %v1148_v46, %v653_v10 }
  0x8f   : > { %1153 = vtanh.f32 %v645_v44  ;;  %v1152_v50 = vpop.eup %1151  ;;  %v662_v51 = vadd.f32 %v660_v47, %v644_v30  ;;  %v520_v52 = vmul.f32 %v1150_v48, %v518_v36  ;;  %vm525_vm1 = vweird.f32 %v1150_v48 }
  0x90   : > { %1155 = vtanh.f32 %v835_v45  ;;  %v840_v53 = vadd.f32 %v838_v49, %v834_v31  ;;  %v561_v54 = vmul.f32 %v1152_v50, %v1430_v37  ;;  %vm526_vm2 = vmor %vm524_vm0, %vm525_vm1  ;;  %vm566_vm5 = vweird.f32 %v1152_v50 }
  0x91   : > { %v521_v57 = vsub.f32 1.0, %v520_v52  ;;  %vm1437_vm6 = vmor %vm565_vm4, %vm566_vm5 }
  0x92   : > { %v675_v55 = vpop.permute.xlu1 %674  ;;  %v670_v56 = vpop.permute.xlu0 %669  ;;  %v562_v60 = vsub.f32 1.0, %v561_v54 }
  0x93   : > { %v677_v58 = vmul.f32 %v670_v56, %v662_v51  ;;  %v842_v59 = vmul.f32 %v840_v53, %v670_v56  ;;  %v522_v61 = vmul.f32 %v1150_v48, %v521_v57 }
  0x94   : > { %v563_v2 = vmul.f32 %v1152_v50, %v562_v60 }
  0x95   : > { %v1154_v62 = vpop.eup %1153  ;;  %v692_v63 = vadd.f32 %v685_v42, %v677_v58  ;;  %v844_v0 = vadd.f32 %v842_v59, %v685_v42  ;;  %v523_v6 = vadd.f32 %v1150_v48, %v522_v61  ;;  %v584_v42 = vsub.f32 0.0, %v1426_v29 }
  0x96   : > { %v1156_v3 = vpop.eup %1155  ;;  %v661_v5 = vmul.f32 %v1154_v62, %v658_v20  ;;  %v564_v12 = vadd.f32 %v1152_v50, %v563_v2 }
  0x97   : > { %v839_v7 = vmul.f32 %v1156_v3, %v658_v20  ;;  %1157 = vtanh.f32 %v692_v63  ;;  %v527_v11 = vsel %vm526_vm2, %v1150_v48, %v523_v6  ;;  %v571_v20 = vand.u32 2147483648, %v1430_v37 }
  0x98   : > { %v663_v10 = vadd.f32 %v661_v5, %v645_v44  ;;  %1159 = vtanh.f32 %v844_v0  ;;  %v532_v17 = vsel %vm529_vm3, %v531_v9, %v527_v11  ;;  %v568_v25 = vsel %vm1437_vm6, %v1152_v50, %v564_v12  ;;  %v756_v5 = vpop.permute.xlu2 %755 }
  0x99   : > { %v841_v13 = vadd.f32 %v839_v7, %v835_v45  ;;  %v534_v24 = vmul.f32 1.0614054, %v532_v17  ;;  %v572_v27 = vor.u32 1.1754944e-38, %v571_v20  ;;  %v543_v37 = vsub.f32 0.0, %v1423_v28 }
  0x9a   : > { %v678_v14 = vmul.f32 %v675_v55, %v663_v10  ;;  %v702_v15 = vpop.permute.xlu1 %701  ;;  %v690_v16 = vpop.permute.xlu0 %689  ;;  %v585_v48 = vmul.f32 %v584_v42, %v1426_v29  ;;  %v1225_v20 = vmov -1.0  }
  0x9b   : > { %v843_v23 = vmul.f32 %v841_v13, %v675_v55  ;;  %v535_v32 = vadd.f32 -1.4531521, %v534_v24  ;;  %v1445_v35 = vsel %vm570_vm7, %v572_v27, %v568_v25  ;;  %v544_v45 = vmul.f32 %v543_v37, %v1423_v28 }
  0x9c   : > { %v693_v26 = vadd.f32 %v690_v16, %v678_v14  ;;  %v575_v41 = vmul.f32 1.0614054, %v1445_v35 }
  0x9d   : > { %v1158_v30 = vpop.eup %1157  ;;  %v845_v31 = vadd.f32 %v843_v23, %v690_v16  ;;  %v536_v38 = vmul.f32 %v535_v32, %v532_v17  ;;  %v545_v53 = vmul.f32 1.442695, %v544_v45  ;;  %v515_v23 = vsel %vm514_vm8, 1.0, %v1225_v20 }
  0x9e   : > { %v1160_v33 = vpop.eup %1159  ;;  %v709_v34 = vmul.f32 %v1158_v30, %v702_v15  ;;  %1161 = vtanh.f32 %v693_v26  ;;  %v576_v47 = vadd.f32 -1.4531521, %v575_v41 }
  0x9f   : > { %v848_v36 = vmul.f32 %v1160_v33, %v702_v15  ;;  %1163 = vtanh.f32 %v845_v31  ;;  %v537_v44 = vadd.f32 1.4214138, %v536_v38 }
  0xa0   : > { %v711_v40 = vadd.f32 %v709_v34, %v692_v63  ;;  %v577_v55 = vmul.f32 %v576_v47, %v1445_v35  ;;  %1165 = vpow2.f32 %v545_v53  ;;  %v586_v63 = vmul.f32 1.442695, %v585_v48  ;;  %v783_v37 = vpop.permute.xlu2 %782 }
  0xa1   : > { %v850_v43 = vadd.f32 %v848_v36, %v844_v0  ;;  %v538_v52 = vmul.f32 %v537_v44, %v532_v17 }
  0xa2   : > { %v719_v46 = vpop.permute.xlu0 %718  ;;  %v724_v49 = vpop.permute.xlu1 %723  ;;  %v578_v61 = vadd.f32 1.4214138, %v577_v55 }
  0xa3   : > { %v726_v50 = vmul.f32 %v719_v46, %v711_v40  ;;  %v852_v51 = vmul.f32 %v850_v43, %v719_v46  ;;  %v539_v60 = vadd.f32 -0.28449672, %v538_v52  ;;  %v556_v43 = vsel %vm555_vm9, 1.0, %v1225_v20 }
  0xa4   : > { %v1162_v54 = vpop.eup %1161  ;;  %v579_v1 = vmul.f32 %v578_v61, %v1445_v35 }
  0xa5   : > { %v1164_v56 = vpop.eup %1163  ;;  %v710_v57 = vmul.f32 %v1162_v54, %v1434_v4  ;;  %v741_v58 = vadd.f32 %v734_v39, %v726_v50  ;;  %v854_v59 = vadd.f32 %v852_v51, %v734_v39  ;;  %v540_v29 = vmul.f32 %v539_v60, %v532_v17 }
  0xa6   : > { %v849_v28 = vmul.f32 %v1164_v56, %v1434_v4  ;;  %v580_v8 = vadd.f32 -0.28449672, %v579_v1  ;;  %v1166_v4 = vpop.eup %1165 }
  0xa7   : > { %v712_v62 = vadd.f32 %v710_v57, %v693_v26  ;;  %1167 = vtanh.f32 %v741_v58  ;;  %v541_v3 = vadd.f32 0.2548296, %v540_v29 }
  0xa8   : > { %v851_v0 = vadd.f32 %v849_v28, %v845_v31  ;;  %1169 = vtanh.f32 %v854_v59  ;;  %v581_v12 = vmul.f32 %v580_v8, %v1445_v35 }
  0xa9   : > { %v727_v2 = vmul.f32 %v724_v49, %v712_v62  ;;  %v542_v10 = vmul.f32 %v541_v3, %v532_v17  ;;  %1171 = vpow2.f32 %v586_v63 }
  0xaa   : > { %v853_v6 = vmul.f32 %v851_v0, %v724_v49  ;;  %v739_v7 = vpop.permute.xlu0 %738  ;;  %v751_v14 = vpop.permute.xlu1 %750  ;;  %v582_v17 = vadd.f32 0.2548296, %v581_v12 }
  0xab   : > { %v742_v9 = vadd.f32 %v739_v7, %v727_v2  ;;  %v547_v15 = vmul.f32 %v1166_v4, %v542_v10 }
  0xac   : > { %v855_v11 = vadd.f32 %v853_v6, %v739_v7  ;;  %v583_v32 = vmul.f32 %v582_v17, %v1445_v35 }
  0xad   : > { %v1168_v13 = vpop.eup %1167  ;;  %1173 = vtanh.f32 %v742_v9  ;;  %v548_v24 = vsub.f32 1.0, %v547_v15 }
  0xae   : > { %v1170_v16 = vpop.eup %1169  ;;  %v758_v18 = vmul.f32 %v1168_v13, %v751_v14  ;;  %1175 = vtanh.f32 %v855_v11 }
  0xaf   : > { %v858_v19 = vmul.f32 %v1170_v16, %v751_v14  ;;  %v1172_v26 = vpop.eup %1171  ;;  %v549_v31 = vmul.f32 %v548_v24, %v515_v23 }
  0xb0   : > { %v760_v25 = vadd.f32 %v758_v18, %v741_v58  ;;  %v588_v39 = vmul.f32 %v1172_v26, %v583_v32 }
  0xb1   : > { %v860_v27 = vadd.f32 %v858_v19, %v854_v59  ;;  %v550_v45 = vadd.f32 1.0, %v549_v31 }
  0xb2   : > { %v768_v30 = vpop.permute.xlu0 %767  ;;  %v589_v46 = vsub.f32 1.0, %v588_v39  ;;  %v773_v47 = vpop.permute.xlu1 %772 }
  0xb3   : > { %v1174_v33 = vpop.eup %1173  ;;  %v775_v34 = vmul.f32 %v768_v30, %v760_v25  ;;  %v862_v36 = vmul.f32 %v860_v27, %v768_v30  ;;  %v551_v55 = vmul.f32 0.5, %v550_v45 }
  0xb4   : > { %v1176_v38 = vpop.eup %1175  ;;  %v759_v21 = vmul.f32 %v1174_v33, %v756_v5  ;;  %v590_v35 = vmul.f32 %v589_v46, %v556_v43 }
  0xb5   : > { %v859_v40 = vmul.f32 %v1176_v38, %v756_v5  ;;  %v790_v41 = vadd.f32 %v783_v37, %v775_v34  ;;  %v864_v42 = vadd.f32 %v862_v36, %v783_v37  ;;  %v601_v34 = vld [vmem:[%s1508_s4] sm:$0x3f] }
  0xb6   : > { %v761_v44 = vadd.f32 %v759_v21, %v742_v9  ;;  %v591_v56 = vadd.f32 1.0, %v590_v35 }
  0xb7   : > { %v861_v48 = vadd.f32 %v859_v40, %v855_v11  ;;  %v792_v49 = vsub.f32 0.0, %v790_v41  ;;  %v866_v22 = vsub.f32 0.0, %v864_v42 }
  0xb8   : > { %v776_v50 = vmul.f32 %v773_v47, %v761_v44  ;;  %v592_v59 = vmul.f32 0.5, %v591_v56 }
  0xb9   : > { %v863_v51 = vmul.f32 %v861_v48, %v773_v47  ;;  %v794_v52 = vmul.f32 1.442695, %v792_v49  ;;  %v868_v53 = vmul.f32 1.442695, %v866_v22 }
  0xba   : > { %v788_v54 = vpop.permute.xlu0 %787  ;;  %v593_v61 = vsub.f32 %v551_v55, %v592_v59 }
  0xbb   : > { %1177 = vpow2.f32 %v794_v52  ;;  %v791_v57 = vadd.f32 %v788_v54, %v776_v50  ;;  %v865_v58 = vadd.f32 %v863_v51, %v788_v54 }
  0xbc   : > { %1179 = vpow2.f32 %v868_v53  ;;  %v594_v63 = vmax.f32 %v593_v61, 1e-09 }
  0xbd   : > { %v793_v60 = vsub.f32 0.0, %v791_v57  ;;  %v867_v28 = vsub.f32 0.0, %v865_v58 }
  0xbf   : > { %v796_v62 = vmul.f32 1.442695, %v793_v60  ;;  %v870_v29 = vmul.f32 1.442695, %v867_v28 }
  0xc1   : > { %v1178_v0 = vpop.eup %1177  ;;  %1181 = vpow2.f32 %v796_v62 }
  0xc2   : > { %v1180_v1 = vpop.eup %1179  ;;  %v798_v2 = vadd.f32 1.0, %v1178_v0  ;;  %1183 = vpow2.f32 %v870_v29 }
  0xc3   : > { %v872_v3 = vadd.f32 1.0, %v1180_v1  ;;  %1185 = vlog2.f32 %v594_v63 }
  0xc4   : > { %1187 = vrcp.f32 %v798_v2  ;;  %v809_v13 = vand.u32 2147483647, %v798_v2  ;;  %v811_v16 = vand.u32 2147483648, %v798_v2  ;;  %vm805_vm11 = vweird.f32 %v798_v2 }
  0xc5   : > { %1189 = vrcp.f32 %v872_v3  ;;  %v883_v19 = vand.u32 2147483647, %v872_v3  ;;  %v885_v20 = vand.u32 2147483648, %v872_v3  ;;  %vm879_vm14 = vweird.f32 %v872_v3 }
  0xc6   : > { %vm1466_vm13 = vcmp.eq.f32.partialorder %v809_v13, 8.507059e+37  ;;  %v812_v30 = vor.u32 1.1754944e-38, %v811_v16 }
  0xc7   : > { %v1182_v5 = vpop.eup %1181  ;;  %vm1474_vm0 = vcmp.eq.f32.partialorder %v883_v19, 8.507059e+37  ;;  %v886_v37 = vor.u32 1.1754944e-38, %v885_v20 }
  0xc8   : > { %v1184_v6 = vpop.eup %1183  ;;  %v1460_v7 = vadd.f32 1.0, %v1182_v5 }
  0xc9   : > { %v1186_v8 = vpop.eup %1185  ;;  %v1462_v9 = vadd.f32 1.0, %v1184_v6 }
  0xca   : > { %v1188_v10 = vpop.eup %1187  ;;  %1191 = vrcp.f32 %v1460_v7  ;;  %v596_v4 = vmul.f32 0.6931472, %v1186_v8  ;;  %v824_v40 = vand.u32 2147483647, %v1460_v7  ;;  %v826_v44 = vand.u32 2147483648, %v1460_v7 }
  0xcb   : > { %v1190_v11 = vpop.eup %1189  ;;  %v801_v12 = vmul.f32 %v1188_v10, %v798_v2  ;;  %1193 = vrcp.f32 %v1462_v9  ;;  %vm806_vm12 = vweird.f32 %v1188_v10  ;;  %v898_v45 = vand.u32 2147483647, %v1462_v9 }
  0xcc   : > { %v875_v14 = vmul.f32 %v1190_v11, %v872_v3  ;;  %v597_v15 = vsub.f32 0.0, %v596_v4  ;;  %vm880_vm15 = vweird.f32 %v1190_v11  ;;  %vm807_vm1 = vmor %vm805_vm11, %vm806_vm12  ;;  %v900_v35 = vand.u32 2147483648, %v1462_v9 }
  0xcd   : > { %v802_v18 = vsub.f32 1.0, %v801_v12  ;;  %vm881_vm2 = vmor %vm879_vm14, %vm880_vm15  ;;  %vm820_vm5 = vweird.f32 %v1460_v7  ;;  %v827_v55 = vor.u32 1.1754944e-38, %v826_v44  ;;  %vm894_vm7 = vweird.f32 %v1462_v9 }
  0xce   : > { %v876_v23 = vsub.f32 1.0, %v875_v14  ;;  %v598_v24 = vmul.f32 1.442695, %v597_v15  ;;  %vm825_vm8 = vcmp.eq.f32.partialorder %v824_v40, 8.507059e+37  ;;  %v901_v59 = vor.u32 1.1754944e-38, %v900_v35 }
  0xcf   : > { %v803_v25 = vmul.f32 %v1188_v10, %v802_v18  ;;  %vm899_vm11 = vcmp.eq.f32.partialorder %v898_v45, 8.507059e+37 }
  0xd0   : > { %v1192_v26 = vpop.eup %1191  ;;  %v599_v27 = vmax.f32 %v598_v24, 0.0  ;;  %v877_v31 = vmul.f32 %v1190_v11, %v876_v23 }
  0xd1   : > { %v1194_v32 = vpop.eup %1193  ;;  %v816_v33 = vmul.f32 %v1192_v26, %v1460_v7  ;;  %v804_v36 = vadd.f32 %v1188_v10, %v803_v25  ;;  %vm821_vm3 = vweird.f32 %v1192_v26 }
  0xd2   : > { %v890_v21 = vmul.f32 %v1194_v32, %v1462_v9  ;;  %v600_v39 = vmin.f32 %v599_v27, 50.0  ;;  %v878_v41 = vadd.f32 %v1190_v11, %v877_v31  ;;  %vm895_vm4 = vweird.f32 %v1194_v32  ;;  %vm822_vm6 = vmor %vm820_vm5, %vm821_vm3 }
  0xd3   : > { %v817_v42 = vsub.f32 1.0, %v816_v33  ;;  %v808_v43 = vsel %vm807_vm1, %v1188_v10, %v804_v36  ;;  %vm896_vm9 = vmor %vm894_vm7, %vm895_vm4 }
  0xd4   : > { %v891_v46 = vsub.f32 1.0, %v890_v21  ;;  %v602_v47 = vmul.f32 %v601_v34, %v600_v39  ;;  %v813_v48 = vsel %vm1466_vm13, %v812_v30, %v808_v43  ;;  %v882_v49 = vsel %vm881_vm2, %v1190_v11, %v878_v41 }
  0xd5   : > { %v818_v22 = vmul.f32 %v1192_v26, %v817_v42  ;;  %v887_v50 = vsel %vm1474_vm0, %v886_v37, %v882_v49 }
  0xd6   : > { %v892_v51 = vmul.f32 %v1194_v32, %v891_v46  ;;  %v604_v52 = vsel %vm603_vm10, %v602_v47, 0.0  ;;  %v904_v53 = vsub.f32 %v813_v48, %v887_v50  ;;  %vm920_vm10 = vcmask 15360  }
  0xd7   : > { %605 = vadd.xlane.f32.xlu1 %v604_v52  ;;  %v819_v54 = vadd.f32 %v1192_v26, %v818_v22 }
  0xd8   : > { %v893_v56 = vadd.f32 %v1194_v32, %v892_v51  ;;  %v906_v57 = vmax.f32 %v904_v53, 1e-09 }
  0xd9   : > { %v823_v58 = vsel %vm822_vm6, %v1192_v26, %v819_v54 }
  0xda   : > { %v828_v60 = vsel %vm825_vm8, %v827_v55, %v823_v58  ;;  %v897_v28 = vsel %vm896_vm9, %v1194_v32, %v893_v56  ;;  %1195 = vlog2.f32 %v906_v57  ;;  %v933_v32 = vlaneseq }
  0xdb   : > { %v902_v61 = vsel %vm899_vm11, %v901_v59, %v897_v28 }
  0xdc   : > { %v905_v62 = vsub.f32 %v828_v60, %v902_v61  ;;  %v934_v33 = vand.u32 127, %v933_v32 }
  0xde   : > { %v907_v29 = vmax.f32 %v905_v62, 1e-09  ;;  %vm936_vm12 = vcmp.eq.s32.totalorder %v934_v33, 2  ;;  %vm935_vm13 = vcmp.eq.s32.totalorder %v934_v33, 1 }
  0xe0   : > { %v1196_v63 = vpop.eup %1195  ;;  %1197 = vlog2.f32 %v907_v29 }
  0xe1   : > { %v909_v0 = vmul.f32 0.6931472, %v1196_v63 }
  0xe3   : > { %v912_v1 = vsub.f32 0.0, %v909_v0 }
  0xe5   : > { %v914_v2 = vmul.f32 1.442695, %v912_v1 }
  0xe6   : > { %v1198_v3 = vpop.eup %1197 }
  0xe7   : > { %v911_v5 = vmul.f32 0.6931472, %v1198_v3  ;;  %v916_v7 = vmax.f32 %v914_v2, 0.0 }
  0xe9   : > { %v913_v6 = vsub.f32 0.0, %v911_v5  ;;  %v918_v10 = vmin.f32 %v916_v7, 50.0 }
  0xeb   : > { %v915_v8 = vmul.f32 1.442695, %v913_v6  ;;  %v921_v11 = vsel %vm920_vm10, %v918_v10, 0.0 }
  0xed   : > { %v917_v9 = vmax.f32 %v915_v8, 0.0 }
  0xef   : > { %v919_v4 = vmin.f32 %v917_v9, 50.0 }
  0xf1   : > { %v922_v12 = vsel %vm920_vm10, %v919_v4, 0.0 }
  0xf2   : > { %v923_v13 = vadd.f32 %v922_v12, %v921_v11 }
  0xf4   : > { %924 = vadd.xlane.f32.xlu2 %v923_v13 }
 0x14a   : > { %v606_v14 = vpop.xlane.xlu1 %605 }
 0x14b   : > { %v607_v15 = vrot.slane %v606_v14, 4 }
 0x14d   : > { %v608_v16 = vadd.f32 %v607_v15, %v606_v14 }
 0x14f   : > { %v609_v18 = vrot.slane %v608_v16, 2 }
 0x151   : > { %v610_v19 = vadd.f32 %v609_v18, %v608_v16 }
 0x153   : > { %v611_v20 = vrot.slane %v610_v19, 1 }
 0x155   : > { %v612_v23 = vadd.f32 %v611_v20, %v610_v19 }
 0x157   : > { %1107 = vpush %v612_v23 }
 0x167   : > { %v925_v24 = vpop.xlane.xlu2 %924 }
 0x168   : > { %v926_v25 = vrot.slane %v925_v24, 4 }
 0x16a   : > { %v927_v17 = vadd.f32 %v926_v25, %v925_v24 }
 0x16c   : > { %v928_v26 = vrot.slane %v927_v17, 2 }
 0x16e   : > { %v929_v27 = vadd.f32 %v928_v26, %v927_v17 }
 0x170   : > { %v930_v30 = vrot.slane %v929_v27, 1 }
 0x172   : > { %v931_v31 = vadd.f32 %v930_v30, %v929_v27 }
 0x174   : > { %1109 = vpush %v931_v31 }
 0x188   : > { %s1108_s28 = spop %1107 }
 0x189   : > { %v939_v36 = vstv %s1108_s28 }
 0x1a5   : > { %s1110_s29 = spop %1109 }
 0x1a6   : > { %v937_v34 = vstv %s1110_s29 }
 0x1a7   : > { %v938_v38 = vsel %vm936_vm12, %v937_v34, 0.0 }
 0x1a8   : > { %v940_v37 = vsel %vm935_vm13, %v939_v36, %v938_v38 }
 0x1a9   : > { %941 = vst [vmem:[#allocation3] sm:$0xff] %v940_v37 }
 0x1aa PF: > { %v948_v21 = vld [vmem:[#allocation2 + $0x30] sm:$0xff]  ;;  %v949_v39 = vld [vmem:[#allocation2] sm:$0xff]  ;;  %v950_v40 = vld [vmem:[#allocation2 + $0x58] sm:$0xff]  ;;  %v945_v0 = vlaneseq }
 0x1ab   : > { %v960_v41 = vadd.f32 %v949_v39, %v948_v21  ;;  %v951_v42 = vld [vmem:[#allocation2 + $0x18] sm:$0xff]  ;;  %v952_v44 = vld [vmem:[#allocation2 + $0x50] sm:$0xff]  ;;  %v953_v46 = vld [vmem:[#allocation2 + $0x20] sm:$0xff] }
 0x1ac   : > { %v954_v48 = vld [vmem:[#allocation2 + $0x8] sm:$0xff]  ;;  %v955_v22 = vld [vmem:[#allocation2 + $0x38] sm:$0xff]  ;;  %v946_v1 = vand.u32 127, %v945_v0 }
 0x1ad   : > { %v961_v43 = vadd.f32 %v960_v41, %v950_v40  ;;  %v956_v35 = vld [vmem:[#allocation2 + $0x28] sm:$0xff] }
 0x1ae   : > { %v957_v52 = vld [vmem:[#allocation2 + $0x48] sm:$0xff]  ;;  %vm947_vm14 = vcmp.eq.s32.totalorder %v946_v1, 0 }
 0x1af   : > { %v962_v45 = vadd.f32 %v961_v43, %v951_v42  ;;  %v958_v54 = vld [vmem:[#allocation2 + $0x10] sm:$0xff] }
 0x1b0   : > { %v959_v56 = vld [vmem:[#allocation2 + $0x40] sm:$0xff] }
 0x1b1   : > { %v963_v47 = vadd.f32 %v962_v45, %v952_v44  ;;  %v980_v2 = vld [vmem:[#allocation3] sm:$0xff] }
 0x1b3   : > { %v964_v49 = vadd.f32 %v963_v47, %v953_v46 }
 0x1b5   : > { %v965_v50 = vadd.f32 %v964_v49, %v954_v48 }
 0x1b7   : > { %v966_v51 = vadd.f32 %v965_v50, %v955_v22 }
 0x1b9   : > { %v967_v53 = vadd.f32 %v966_v51, %v956_v35 }
 0x1bb   : > { %v968_v55 = vadd.f32 %v967_v53, %v957_v52 }
 0x1bd   : > { %v969_v57 = vadd.f32 %v968_v55, %v958_v54 }
 0x1bf   : > { %v970_v58 = vadd.f32 %v969_v57, %v959_v56 }
 0x1c1   : > { %971 = vadd.xlane.f32.xlu0 %v970_v58 }
 0x234   : > { %v972_v59 = vpop.xlane.xlu0 %971 }
 0x235   : > { %v973_v60 = vrot.slane %v972_v59, 4 }
 0x237   : > { %v974_v28 = vadd.f32 %v973_v60, %v972_v59 }
 0x239   : > { %v975_v61 = vrot.slane %v974_v28, 2 }
 0x23b   : > { %v976_v62 = vadd.f32 %v975_v61, %v974_v28 }
 0x23d   : > { %v977_v29 = vrot.slane %v976_v62, 1 }
 0x23f   : > { %v978_v63 = vadd.f32 %v977_v29, %v976_v62 }
 0x241   : > { %1111 = vpush %v978_v63 }
 0x272   : > { %s1112_s13 = spop %1111 }
 0x273   : > { %v981_v3 = vstv %s1112_s13 }
 0x274   : > { %v982_v5 = vsel %vm947_vm14, %v981_v3, %v980_v2 }
 0x275   : > { %983 = vst [vmem:[%s1302_s18] sm:$0xff] %v982_v5 }
 0x276 PF: > { %s19_s11 = sadd.s32 1, %s1221_s11   ;;  %s1520_s30 = smov %s1217_s10 }
 0x277   : > { %p16_p6 = scmp.ge.s32.totalorder %s19_s11, 4   ;;  %s1521_s10 = smov %s1523_s12 }
 0x279   :  { %18 = sbr.rel (!%p16_p6) target bundleno = 2 (0x2), region = 109 }

</bundles_post_ra>
